<compile_context>
chip_gen: v7x
topology: tpu7x:2x2x1
jax: 0.10.0
libtpu: 0.0.40
codegen_flags: <defaults>
</compile_context>

<pallas_src>
import math
from functools import partial

import jax
import jax.numpy as jnp
from jax.experimental import pallas as pl
from jax.experimental.pallas import tpu as pltpu

_PAD = 8  # zero-column pad on each side of the W axis in the hidden-strip scratch


# ---------------------------------------------------------------------------
# Fused kernel: one (batch, row-strip) per grid step
# ---------------------------------------------------------------------------
def _mlp_fused_kernel(x_ref, x_hbm, w1_ref, b1_ref, wdw_ref, bdw_ref,
                      w2_ref, b2_ref, o_ref,
                      halo_buf, dma_sems, hs_ref, *, H, W, TH):
    # x_ref   : (1, TH, W, C) f32   this strip's rows (auto-pipelined)
    # x_hbm   : (B, H, W, C)  f32   raw HBM ref (halo-row DMA source)
    # w1_ref  : (C, Hd) bf16        b1_ref : (1, Hd) f32
    # wdw_ref : (9, Hd) f32 (3x3 depthwise taps, row-major kh,kw)   bdw_ref : (1, Hd) f32
    # w2_ref  : (Hd, Co) bf16       b2_ref : (1, Co) f32
    # o_ref   : (1, TH*W, Co)
    # halo_buf: (2, 1, W, C) f32 VMEM scratch, dma_sems: DMA sems (2,)
    # hs_ref  : (TH+2, W+2*PAD, Hd) f32 VMEM scratch (hidden strip + halo + zero columns)
    b = pl.program_id(0)
    r = pl.program_id(1)
    last = pl.num_programs(1) - 1
    Hd = w1_ref.shape[1]

    # ---- kick off the two 1-row halo DMAs (row above / below this strip) -------------
    # Source rows are clamped so the DMA is always in-bounds; the fetched data is masked
    # to zero below when the halo row lies outside the image.
    top_row = jnp.maximum(r * TH - 1, 0)
    bot_row = jnp.minimum(r * TH + TH, H - 1)
    cp_top = pltpu.make_async_copy(x_hbm.at[b, pl.ds(top_row, 1)],
                                   halo_buf.at[0], dma_sems.at[0])
    cp_bot = pltpu.make_async_copy(x_hbm.at[b, pl.ds(bot_row, 1)],
                                   halo_buf.at[1], dma_sems.at[1])
    cp_top.start()
    cp_bot.start()

    # ---- zero the boundary columns of the hidden-strip window (aligned 8-wide stores) -
    zcols = jnp.zeros((TH + 2, _PAD, Hd), jnp.float32)
    hs_ref[:, pl.ds(0, _PAD), :] = zcols
    hs_ref[:, pl.ds(W + _PAD, _PAD), :] = zcols

    # ---- fc1 on the strip's own TH rows (MXU; overlaps with the halo DMAs) ------------
    xs = x_ref[0].astype(jnp.bfloat16)                                   # (TH, W, C)
    hm = jnp.dot(xs.reshape(TH * W, xs.shape[-1]), w1_ref[...],
                 preferred_element_type=jnp.float32) + b1_ref[...]       # (TH*W, Hd) f32
    hs_ref[pl.ds(1, TH), pl.ds(_PAD, W), :] = hm.reshape(TH, W, Hd)

    # ---- fc1 on the two halo rows (tiny matmul), with the conv's zero padding in h ----
    cp_top.wait()
    cp_bot.wait()
    xh = halo_buf[...].reshape(2 * W, halo_buf.shape[-1]).astype(jnp.bfloat16)
    hh = (jnp.dot(xh, w1_ref[...], preferred_element_type=jnp.float32)
          + b1_ref[...]).reshape(2, W, Hd)
    # Rows outside the image must be ZERO in h-space (the conv zero-pads h, not x;
    # fc1(0) would be b1).  Only the two halo rows ever need this small select.
    hs_ref[0, pl.ds(_PAD, W), :] = jnp.where(r > 0, hh[0], 0.0)
    hs_ref[TH + 1, pl.ds(_PAD, W), :] = jnp.where(r < last, hh[1], 0.0)

    # ---- depthwise 3x3: the three W-shifted views are static slices of the padded
    #      scratch; the zero columns provide the W-boundary padding for free ------------
    win_l = hs_ref[:, pl.ds(_PAD - 1, W), :]     # h[:, w-1]   (TH+2, W, Hd)
    win_c = hs_ref[:, pl.ds(_PAD, W), :]         # h[:, w  ]
    win_r = hs_ref[:, pl.ds(_PAD + 1, W), :]     # h[:, w+1]
    views = (win_l, win_c, win_r)
    taps = wdw_ref[...]                          # (9, Hd), loaded once

    acc = jnp.broadcast_to(bdw_ref[...].reshape(1, 1, Hd), (TH, W, Hd))  # init from conv bias
    for kh in range(3):                          # row (H) shifts: leading-dim slices, free
        for kw in range(3):
            acc = acc + views[kw][kh:kh + TH] * taps[kh * 3 + kw]

    # exact (erf-based) GELU, matching torch.nn.GELU() default
    g = 0.5 * acc * (1.0 + jax.lax.erf(acc * (1.0 / math.sqrt(2.0))))

    # ---- fc2 ---------------------------------------------------------------------------
    g2 = g.reshape(TH * W, Hd).astype(w2_ref.dtype)                      # bf16 MXU input
    out = jnp.dot(g2, w2_ref[...], preferred_element_type=jnp.float32) + b2_ref[...]
    o_ref[0] = out.astype(o_ref.dtype)


# ---------------------------------------------------------------------------
# Wrapper
# ---------------------------------------------------------------------------
def mlp_forward(x, params, H, W, *, TH=None, out_dtype=None,
                vmem_limit_bytes=48 * 1024 * 1024):
    B, N, C = x.shape
    assert N == H * W, "sequence length must equal H*W"
    assert W % 8 == 0, "W must be a multiple of 8 (sublane-aligned layout)"

    w1 = params["w1"].astype(jnp.bfloat16)
    b1 = params["b1"].astype(jnp.float32).reshape(1, -1)
    wdw = params["wdw"].astype(jnp.float32)
    bdw = params["bdw"].astype(jnp.float32).reshape(1, -1)
    w2 = params["w2"].astype(jnp.bfloat16)
    b2 = params["b2"].astype(jnp.float32).reshape(1, -1)
    Hd = w1.shape[1]
    Co = w2.shape[1]
    if out_dtype is None:
        out_dtype = x.dtype

    # Row-strip height.  16 fits v7x (64 MiB VMEM) comfortably at realistic SegFormer
    # sizes; on v5e/v6e (128 MiB) sweeping TH up to 32 amortizes the 2/TH halo recompute.
    if TH is None:
        for cand in (16, 8, 4, 2, 1):
            if H % cand == 0:
                TH = cand
                break
    assert H % TH == 0
    R = H // TH

    # Free, contiguous reshape to NHWC; x stays f32 in HBM (no wrapper pad / cast pass).
    x4 = x.reshape(B, H, W, C)

    kernel = partial(_mlp_fused_kernel, H=H, W=W, TH=TH)
    out = pl.pallas_call(
        kernel,
        out_shape=jax.ShapeDtypeStruct((B, N, Co), out_dtype),
        grid=(B, R),
        in_specs=[
            # per-strip TH-row window of x, auto double-buffered by the pipeline
            pl.BlockSpec((1, TH, W, C), lambda b, r: (b, r, 0, 0)),
            # same x array as a raw HBM ref: source for the two 1-row halo DMAs
            pl.BlockSpec(memory_space=pl.ANY),
            # weights/biases: constant index maps -> fetched once, stay resident
            pl.BlockSpec((C, Hd), lambda b, r: (0, 0)),
            pl.BlockSpec((1, Hd), lambda b, r: (0, 0)),
            pl.BlockSpec((9, Hd), lambda b, r: (0, 0)),
            pl.BlockSpec((1, Hd), lambda b, r: (0, 0)),
            pl.BlockSpec((Hd, Co), lambda b, r: (0, 0)),
            pl.BlockSpec((1, Co), lambda b, r: (0, 0)),
        ],
        out_specs=pl.BlockSpec((1, TH * W, Co), lambda b, r: (b, r, 0)),
        scratch_shapes=[
            pltpu.VMEM((2, 1, W, C), jnp.float32),            # halo-row landing buffer
            pltpu.SemaphoreType.DMA((2,)),                    # one sem per halo DMA
            pltpu.VMEM((TH + 2, W + 2 * _PAD, Hd), jnp.float32),  # hidden strip + zero cols
        ],
        compiler_params=pltpu.CompilerParams(
            dimension_semantics=("parallel", "parallel"),
            vmem_limit_bytes=vmem_limit_bytes,
        ),
    )(x4, x4, w1, b1, wdw, bdw, w2, b2)
    return out


# ---------------------------------------------------------------------------
# Pure-JAX f32 reference (module semantics) for correctness check
# ---------------------------------------------------------------------------
def mlp_reference(x, params, H, W):
    B, N, C = x.shape
    h = x @ params["w1"] + params["b1"][0]
    Hd = h.shape[-1]
    h_nhwc = h.reshape(B, H, W, Hd)
    rhs = params["wdw"].reshape(3, 3, Hd)[:, :, None, :]        # HWIO, I/groups = 1
    conv = jax.lax.conv_general_dilated(
        h_nhwc, rhs, window_strides=(1, 1), padding=((1, 1), (1, 1)),
        dimension_numbers=("NHWC", "HWIO", "NHWC"), feature_group_count=Hd,
    ) + params["bdw"][0]
    g = jax.nn.gelu(conv, approximate=False)
    return g.reshape(B, N, Hd) @ params["w2"] + params["b2"][0]


if __name__ == "__main__":
    # Small but lane-aligned shapes (C, Hd, Co multiples of 128 -> lane-dense stores;
    # W multiple of 8 -> layout-free reshapes).  TH=8 with H=16 gives R=2 strips so both
    # the boundary-strip and interior-halo paths are exercised.
    B, C_in, Hd, H, W = 2, 128, 256, 16, 16
    C_out = C_in
    N = H * W

    key = jax.random.PRNGKey(0)
    k1, k2, k3, k4, k5, k6, kx = jax.random.split(key, 7)

    # Deterministic synthetic parameters (torch init zeroes the biases; small non-zero
    # biases are used here so the bias paths and the halo masking are exercised).
    params = dict(
        w1=0.02 * jax.random.truncated_normal(k1, -2.0, 2.0, (C_in, Hd), jnp.float32),
        b1=0.1 * jax.random.normal(k4, (1, Hd), jnp.float32),
        wdw=math.sqrt(2.0 / 9.0) * jax.random.normal(k2, (9, Hd), jnp.float32),
        bdw=0.1 * jax.random.normal(k5, (1, Hd), jnp.float32),
        w2=0.02 * jax.random.truncated_normal(k3, -2.0, 2.0, (Hd, C_out), jnp.float32),
        b2=0.1 * jax.random.normal(k6, (1, C_out), jnp.float32),
    )

    x = jax.random.normal(kx, (B, N, C_in), jnp.float32)

    out = jax.block_until_ready(mlp_forward(x, params, H, W, TH=8))
    ref = mlp_reference(x, params, H, W)

    assert out.shape == (B, N, C_out)
    # bf16 MXU inputs with f32 accumulation -> slightly looser tolerance than pure f32
    assert jnp.allclose(out, ref, atol=1e-2, rtol=1e-2), (
        "mismatch vs reference, max abs err = %e" % float(jnp.max(jnp.abs(out - ref))))
    print("KERNEL_OK")
</pallas_src>

<mosaic_0001>
module attributes {stable_mosaic.version = 11 : i64} {
  func.func @_mlp_fused_kernel(%arg0: i32, %arg1: i32, %arg2: memref<1x8x16x128xf32, #tpu.memory_space<vmem>>, %arg3: memref<2x16x16x128xf32, #tpu.memory_space<any>>, %arg4: memref<128x256xbf16, #tpu.memory_space<vmem>>, %arg5: memref<1x256xf32, #tpu.memory_space<vmem>>, %arg6: memref<9x256xf32, #tpu.memory_space<vmem>>, %arg7: memref<1x256xf32, #tpu.memory_space<vmem>>, %arg8: memref<256x128xbf16, #tpu.memory_space<vmem>>, %arg9: memref<1x128xf32, #tpu.memory_space<vmem>>, %arg10: memref<1x128x128xf32, #tpu.memory_space<vmem>>, %arg11: memref<2x1x16x128xf32, #tpu.memory_space<vmem>>, %arg12: memref<2x!tpu.dma_semaphore, #tpu.memory_space<semaphore_mem>>, %arg13: memref<10x32x256xf32, #tpu.memory_space<vmem>>) attributes {dimension_semantics = [#tpu.dimension_semantics<parallel>, #tpu.dimension_semantics<parallel>], iteration_bounds = array<i64: 2, 2>, scalar_prefetch = 0 : i64, scratch_operands = 3 : i64, tpu.core_type = #tpu.core_type<tc>, window_params = [{transform_indices = @transform_0, window_bounds = array<i64: 1, 8, 16, 128>}, {}, {pipeline_mode = #tpu.pipeline_mode<synchronous>, transform_indices = @transform_2, window_bounds = array<i64: 128, 256>}, {pipeline_mode = #tpu.pipeline_mode<synchronous>, transform_indices = @transform_3, window_bounds = array<i64: 1, 256>}, {pipeline_mode = #tpu.pipeline_mode<synchronous>, transform_indices = @transform_4, window_bounds = array<i64: 9, 256>}, {pipeline_mode = #tpu.pipeline_mode<synchronous>, transform_indices = @transform_5, window_bounds = array<i64: 1, 256>}, {pipeline_mode = #tpu.pipeline_mode<synchronous>, transform_indices = @transform_6, window_bounds = array<i64: 256, 128>}, {pipeline_mode = #tpu.pipeline_mode<synchronous>, transform_indices = @transform_7, window_bounds = array<i64: 1, 128>}, {transform_indices = @transform_8, window_bounds = array<i64: 1, 128, 128>}]} {
    %c8_i32 = arith.constant 8 : i32
    %0 = arith.muli %arg1, %c8_i32 : i32
    %c1_i32 = arith.constant 1 : i32
    %1 = arith.subi %0, %c1_i32 : i32
    %c0_i32 = arith.constant 0 : i32
    %2 = arith.maxsi %1, %c0_i32 : i32
    %c8_i32_0 = arith.constant 8 : i32
    %3 = arith.muli %arg1, %c8_i32_0 : i32
    %c8_i32_1 = arith.constant 8 : i32
    %4 = arith.addi %3, %c8_i32_1 : i32
    %c15_i32 = arith.constant 15 : i32
    %5 = arith.minsi %4, %c15_i32 : i32
    %c0_i32_2 = arith.constant 0 : i32
    %c0_i32_3 = arith.constant 0 : i32
    %c0_i32_4 = arith.constant 0 : i32
    %c0_i32_5 = arith.constant 0 : i32
    %6 = tpu.memref_slice %arg3[%arg0, %2, %c0_i32_4, %c0_i32_5] : memref<2x16x16x128xf32, #tpu.memory_space<any>> -> memref<1x1x16x128xf32, #tpu.memory_space<any>>
    %7 = tpu.memref_squeeze %6 : memref<1x1x16x128xf32, #tpu.memory_space<any>> -> memref<1x16x128xf32, #tpu.memory_space<any>>
    %c0_i32_6 = arith.constant 0 : i32
    %c0_i32_7 = arith.constant 0 : i32
    %c0_i32_8 = arith.constant 0 : i32
    %8 = tpu.memref_slice %arg11[%c0_i32_2, %c0_i32_6, %c0_i32_7, %c0_i32_8] : memref<2x1x16x128xf32, #tpu.memory_space<vmem>> -> memref<1x1x16x128xf32, #tpu.memory_space<vmem>>
    %9 = tpu.memref_squeeze %8 : memref<1x1x16x128xf32, #tpu.memory_space<vmem>> -> memref<1x16x128xf32, #tpu.memory_space<vmem>>
    %10 = tpu.memref_slice %arg12[%c0_i32_3] : memref<2x!tpu.dma_semaphore, #tpu.memory_space<semaphore_mem>> -> memref<1x!tpu.dma_semaphore, #tpu.memory_space<semaphore_mem>>
    %11 = tpu.memref_squeeze %10 : memref<1x!tpu.dma_semaphore, #tpu.memory_space<semaphore_mem>> -> memref<!tpu.dma_semaphore, #tpu.memory_space<semaphore_mem>>
    tpu.enqueue_dma source(%7 : memref<1x16x128xf32, #tpu.memory_space<any>>) target(%9 : memref<1x16x128xf32, #tpu.memory_space<vmem>>) target_semaphore(%11 : memref<!tpu.dma_semaphore, #tpu.memory_space<semaphore_mem>>)
    %c1_i32_9 = arith.constant 1 : i32
    %c1_i32_10 = arith.constant 1 : i32
    %c0_i32_11 = arith.constant 0 : i32
    %c0_i32_12 = arith.constant 0 : i32
    %12 = tpu.memref_slice %arg3[%arg0, %5, %c0_i32_11, %c0_i32_12] : memref<2x16x16x128xf32, #tpu.memory_space<any>> -> memref<1x1x16x128xf32, #tpu.memory_space<any>>
    %13 = tpu.memref_squeeze %12 : memref<1x1x16x128xf32, #tpu.memory_space<any>> -> memref<1x16x128xf32, #tpu.memory_space<any>>
    %c0_i32_13 = arith.constant 0 : i32
    %c0_i32_14 = arith.constant 0 : i32
    %c0_i32_15 = arith.constant 0 : i32
    %14 = tpu.memref_slice %arg11[%c1_i32_9, %c0_i32_13, %c0_i32_14, %c0_i32_15] : memref<2x1x16x128xf32, #tpu.memory_space<vmem>> -> memref<1x1x16x128xf32, #tpu.memory_space<vmem>>
    %15 = tpu.memref_squeeze %14 : memref<1x1x16x128xf32, #tpu.memory_space<vmem>> -> memref<1x16x128xf32, #tpu.memory_space<vmem>>
    %16 = tpu.memref_slice %arg12[%c1_i32_10] : memref<2x!tpu.dma_semaphore, #tpu.memory_space<semaphore_mem>> -> memref<1x!tpu.dma_semaphore, #tpu.memory_space<semaphore_mem>>
    %17 = tpu.memref_squeeze %16 : memref<1x!tpu.dma_semaphore, #tpu.memory_space<semaphore_mem>> -> memref<!tpu.dma_semaphore, #tpu.memory_space<semaphore_mem>>
    tpu.enqueue_dma source(%13 : memref<1x16x128xf32, #tpu.memory_space<any>>) target(%15 : memref<1x16x128xf32, #tpu.memory_space<vmem>>) target_semaphore(%17 : memref<!tpu.dma_semaphore, #tpu.memory_space<semaphore_mem>>)
    %cst = arith.constant 0.000000e+00 : f32
    %18 = vector.broadcast %cst : f32 to vector<10x8x256xf32>
    %c0 = arith.constant 0 : index
    %c0_16 = arith.constant 0 : index
    %c0_17 = arith.constant 0 : index
    %19 = vector.load %arg13[%c0, %c0_16, %c0_17] : memref<10x32x256xf32, #tpu.memory_space<vmem>>, vector<10x8x256xf32>
    tpu.vector_store %arg13[%c0, %c0_16, %c0_17], %18 {strides = array<i32>} : memref<10x32x256xf32, #tpu.memory_space<vmem>>, vector<10x8x256xf32>,
    %c0_18 = arith.constant 0 : index
    %c24 = arith.constant 24 : index
    %c0_19 = arith.constant 0 : index
    %20 = vector.load %arg13[%c0_18, %c24, %c0_19] : memref<10x32x256xf32, #tpu.memory_space<vmem>>, vector<10x8x256xf32>
    tpu.vector_store %arg13[%c0_18, %c24, %c0_19], %18 {strides = array<i32>} : memref<10x32x256xf32, #tpu.memory_space<vmem>>, vector<10x8x256xf32>,
    %c0_20 = arith.constant 0 : index
    %c0_21 = arith.constant 0 : index
    %c0_22 = arith.constant 0 : index
    %c0_23 = arith.constant 0 : index
    %21 = vector.load %arg2[%c0_20, %c0_21, %c0_22, %c0_23] : memref<1x8x16x128xf32, #tpu.memory_space<vmem>>, vector<1x8x16x128xf32>
    %22 = vector.shape_cast %21 : vector<1x8x16x128xf32> to vector<8x16x128xf32>
    %23 = arith.truncf %22 : vector<8x16x128xf32> to vector<8x16x128xbf16>
    %24 = vector.shape_cast %23 : vector<8x16x128xbf16> to vector<128x128xbf16>
    %c0_24 = arith.constant 0 : index
    %c0_25 = arith.constant 0 : index
    %25 = vector.load %arg4[%c0_24, %c0_25] : memref<128x256xbf16, #tpu.memory_space<vmem>>, vector<128x256xbf16>
    %cst_26 = arith.constant dense<0.000000e+00> : vector<128x256xf32>
    %26 = tpu.matmul %24, %25, %cst_26 {dimension_numbers = #tpu.dot_dimension_numbers<[1], [0], [0], [1], [0, 0, 1, 1], [], []>} : vector<128x128xbf16>, vector<128x256xbf16>, vector<128x256xf32> -> vector<128x256xf32>
    %c0_27 = arith.constant 0 : index
    %c0_28 = arith.constant 0 : index
    %27 = vector.load %arg5[%c0_27, %c0_28] : memref<1x256xf32, #tpu.memory_space<vmem>>, vector<1x256xf32>
    %28 = vector.broadcast %27 : vector<1x256xf32> to vector<128x256xf32>
    %29 = arith.addf %26, %28 : vector<128x256xf32>
    %30 = vector.shape_cast %29 : vector<128x256xf32> to vector<8x16x256xf32>
    %c1 = arith.constant 1 : index
    %c8 = arith.constant 8 : index
    %c0_29 = arith.constant 0 : index
    %31 = vector.load %arg13[%c1, %c8, %c0_29] : memref<10x32x256xf32, #tpu.memory_space<vmem>>, vector<8x16x256xf32>
    tpu.vector_store %arg13[%c1, %c8, %c0_29], %30 {strides = array<i32>} : memref<10x32x256xf32, #tpu.memory_space<vmem>>, vector<8x16x256xf32>,
    %c0_i32_30 = arith.constant 0 : i32
    %c0_i32_31 = arith.constant 0 : i32
    %c0_i32_32 = arith.constant 0 : i32
    %c0_i32_33 = arith.constant 0 : i32
    %32 = tpu.memref_slice %arg3[%arg0, %2, %c0_i32_32, %c0_i32_33] : memref<2x16x16x128xf32, #tpu.memory_space<any>> -> memref<1x1x16x128xf32, #tpu.memory_space<any>>
    %33 = tpu.memref_squeeze %32 : memref<1x1x16x128xf32, #tpu.memory_space<any>> -> memref<1x16x128xf32, #tpu.memory_space<any>>
    %c0_i32_34 = arith.constant 0 : i32
    %c0_i32_35 = arith.constant 0 : i32
    %c0_i32_36 = arith.constant 0 : i32
    %34 = tpu.memref_slice %arg11[%c0_i32_30, %c0_i32_34, %c0_i32_35, %c0_i32_36] : memref<2x1x16x128xf32, #tpu.memory_space<vmem>> -> memref<1x1x16x128xf32, #tpu.memory_space<vmem>>
    %35 = tpu.memref_squeeze %34 : memref<1x1x16x128xf32, #tpu.memory_space<vmem>> -> memref<1x16x128xf32, #tpu.memory_space<vmem>>
    %36 = tpu.memref_slice %arg12[%c0_i32_31] : memref<2x!tpu.dma_semaphore, #tpu.memory_space<semaphore_mem>> -> memref<1x!tpu.dma_semaphore, #tpu.memory_space<semaphore_mem>>
    %37 = tpu.memref_squeeze %36 : memref<1x!tpu.dma_semaphore, #tpu.memory_space<semaphore_mem>> -> memref<!tpu.dma_semaphore, #tpu.memory_space<semaphore_mem>>
    tpu.wait_dma2 semaphore(%37 : memref<!tpu.dma_semaphore, #tpu.memory_space<semaphore_mem>>) src(%33 : memref<1x16x128xf32, #tpu.memory_space<any>>) dst(%35 : memref<1x16x128xf32, #tpu.memory_space<vmem>>)
    %c1_i32_37 = arith.constant 1 : i32
    %c1_i32_38 = arith.constant 1 : i32
    %c0_i32_39 = arith.constant 0 : i32
    %c0_i32_40 = arith.constant 0 : i32
    %38 = tpu.memref_slice %arg3[%arg0, %5, %c0_i32_39, %c0_i32_40] : memref<2x16x16x128xf32, #tpu.memory_space<any>> -> memref<1x1x16x128xf32, #tpu.memory_space<any>>
    %39 = tpu.memref_squeeze %38 : memref<1x1x16x128xf32, #tpu.memory_space<any>> -> memref<1x16x128xf32, #tpu.memory_space<any>>
    %c0_i32_41 = arith.constant 0 : i32
    %c0_i32_42 = arith.constant 0 : i32
    %c0_i32_43 = arith.constant 0 : i32
    %40 = tpu.memref_slice %arg11[%c1_i32_37, %c0_i32_41, %c0_i32_42, %c0_i32_43] : memref<2x1x16x128xf32, #tpu.memory_space<vmem>> -> memref<1x1x16x128xf32, #tpu.memory_space<vmem>>
    %41 = tpu.memref_squeeze %40 : memref<1x1x16x128xf32, #tpu.memory_space<vmem>> -> memref<1x16x128xf32, #tpu.memory_space<vmem>>
    %42 = tpu.memref_slice %arg12[%c1_i32_38] : memref<2x!tpu.dma_semaphore, #tpu.memory_space<semaphore_mem>> -> memref<1x!tpu.dma_semaphore, #tpu.memory_space<semaphore_mem>>
    %43 = tpu.memref_squeeze %42 : memref<1x!tpu.dma_semaphore, #tpu.memory_space<semaphore_mem>> -> memref<!tpu.dma_semaphore, #tpu.memory_space<semaphore_mem>>
    tpu.wait_dma2 semaphore(%43 : memref<!tpu.dma_semaphore, #tpu.memory_space<semaphore_mem>>) src(%39 : memref<1x16x128xf32, #tpu.memory_space<any>>) dst(%41 : memref<1x16x128xf32, #tpu.memory_space<vmem>>)
    %c0_44 = arith.constant 0 : index
    %c0_45 = arith.constant 0 : index
    %c0_46 = arith.constant 0 : index
    %c0_47 = arith.constant 0 : index
    %44 = vector.load %arg11[%c0_44, %c0_45, %c0_46, %c0_47] : memref<2x1x16x128xf32, #tpu.memory_space<vmem>>, vector<2x1x16x128xf32>
    %45 = vector.shape_cast %44 : vector<2x1x16x128xf32> to vector<32x128xf32>
    %46 = arith.truncf %45 : vector<32x128xf32> to vector<32x128xbf16>
    %c0_48 = arith.constant 0 : index
    %c0_49 = arith.constant 0 : index
    %47 = vector.load %arg4[%c0_48, %c0_49] : memref<128x256xbf16, #tpu.memory_space<vmem>>, vector<128x256xbf16>
    %cst_50 = arith.constant dense<0.000000e+00> : vector<32x256xf32>
    %48 = tpu.matmul %46, %47, %cst_50 {dimension_numbers = #tpu.dot_dimension_numbers<[1], [0], [0], [1], [0, 0, 1, 1], [], []>} : vector<32x128xbf16>, vector<128x256xbf16>, vector<32x256xf32> -> vector<32x256xf32>
    %c0_51 = arith.constant 0 : index
    %c0_52 = arith.constant 0 : index
    %49 = vector.load %arg5[%c0_51, %c0_52] : memref<1x256xf32, #tpu.memory_space<vmem>>, vector<1x256xf32>
    %50 = vector.broadcast %49 : vector<1x256xf32> to vector<32x256xf32>
    %51 = arith.addf %48, %50 : vector<32x256xf32>
    %52 = vector.shape_cast %51 : vector<32x256xf32> to vector<2x16x256xf32>
    %c0_i32_53 = arith.constant 0 : i32
    %53 = arith.cmpi sgt, %arg1, %c0_i32_53 : i32
    %54 = vector.extract_strided_slice %52 {offsets = [0, 0, 0], sizes = [1, 16, 256], strides = [1, 1, 1]} : vector<2x16x256xf32> to vector<1x16x256xf32>
    %55 = vector.shape_cast %54 : vector<1x16x256xf32> to vector<16x256xf32>
    %cst_54 = arith.constant 0.000000e+00 : f32
    %56 = vector.broadcast %cst_54 : f32 to vector<16x256xf32>
    %57 = arith.select %53, %55, %56 : vector<16x256xf32>
    %c0_55 = arith.constant 0 : index
    %c8_56 = arith.constant 8 : index
    %c0_57 = arith.constant 0 : index
    %58 = vector.load %arg13[%c0_55, %c8_56, %c0_57] : memref<10x32x256xf32, #tpu.memory_space<vmem>>, vector<1x16x256xf32>
    %59 = vector.shape_cast %58 : vector<1x16x256xf32> to vector<16x256xf32>
    %60 = vector.shape_cast %57 : vector<16x256xf32> to vector<1x16x256xf32>
    tpu.vector_store %arg13[%c0_55, %c8_56, %c0_57], %60 {strides = array<i32>} : memref<10x32x256xf32, #tpu.memory_space<vmem>>, vector<1x16x256xf32>,
    %c1_i32_58 = arith.constant 1 : i32
    %61 = arith.cmpi slt, %arg1, %c1_i32_58 : i32
    %62 = vector.extract_strided_slice %52 {offsets = [1, 0, 0], sizes = [1, 16, 256], strides = [1, 1, 1]} : vector<2x16x256xf32> to vector<1x16x256xf32>
    %63 = vector.shape_cast %62 : vector<1x16x256xf32> to vector<16x256xf32>
    %cst_59 = arith.constant 0.000000e+00 : f32
    %64 = vector.broadcast %cst_59 : f32 to vector<16x256xf32>
    %65 = arith.select %61, %63, %64 : vector<16x256xf32>
    %c9 = arith.constant 9 : index
    %c8_60 = arith.constant 8 : index
    %c0_61 = arith.constant 0 : index
    %66 = vector.load %arg13[%c9, %c8_60, %c0_61] : memref<10x32x256xf32, #tpu.memory_space<vmem>>, vector<1x16x256xf32>
    %67 = vector.shape_cast %66 : vector<1x16x256xf32> to vector<16x256xf32>
    %68 = vector.shape_cast %65 : vector<16x256xf32> to vector<1x16x256xf32>
    tpu.vector_store %arg13[%c9, %c8_60, %c0_61], %68 {strides = array<i32>} : memref<10x32x256xf32, #tpu.memory_space<vmem>>, vector<1x16x256xf32>,
    %c0_62 = arith.constant 0 : index
    %c7 = arith.constant 7 : index
    %c0_63 = arith.constant 0 : index
    %69 = vector.load %arg13[%c0_62, %c7, %c0_63] : memref<10x32x256xf32, #tpu.memory_space<vmem>>, vector<10x16x256xf32>
    %c0_64 = arith.constant 0 : index
    %c8_65 = arith.constant 8 : index
    %c0_66 = arith.constant 0 : index
    %70 = vector.load %arg13[%c0_64, %c8_65, %c0_66] : memref<10x32x256xf32, #tpu.memory_space<vmem>>, vector<10x16x256xf32>
    %c0_67 = arith.constant 0 : index
    %c9_68 = arith.constant 9 : index
    %c0_69 = arith.constant 0 : index
    %71 = vector.load %arg13[%c0_67, %c9_68, %c0_69] : memref<10x32x256xf32, #tpu.memory_space<vmem>>, vector<10x16x256xf32>
    %c0_70 = arith.constant 0 : index
    %c0_71 = arith.constant 0 : index
    %72 = vector.load %arg6[%c0_70, %c0_71] : memref<9x256xf32, #tpu.memory_space<vmem>>, vector<9x256xf32>
    %c0_72 = arith.constant 0 : index
    %c0_73 = arith.constant 0 : index
    %73 = vector.load %arg7[%c0_72, %c0_73] : memref<1x256xf32, #tpu.memory_space<vmem>>, vector<1x256xf32>
    %74 = vector.shape_cast %73 : vector<1x256xf32> to vector<1x1x256xf32>
    %75 = vector.shape_cast %74 : vector<1x1x256xf32> to vector<1x1x256xf32>
    %76 = vector.broadcast %75 : vector<1x1x256xf32> to vector<8x16x256xf32>
    %77 = vector.extract_strided_slice %69 {offsets = [0, 0, 0], sizes = [8, 16, 256], strides = [1, 1, 1]} : vector<10x16x256xf32> to vector<8x16x256xf32>
    %78 = vector.extract_strided_slice %72 {offsets = [0, 0], sizes = [1, 256], strides = [1, 1]} : vector<9x256xf32> to vector<1x256xf32>
    %79 = vector.shape_cast %78 : vector<1x256xf32> to vector<256xf32>
    %80 = vector.shape_cast %79 : vector<256xf32> to vector<1x1x256xf32>
    %81 = vector.broadcast %80 : vector<1x1x256xf32> to vector<8x16x256xf32>
    %82 = arith.mulf %77, %81 : vector<8x16x256xf32>
    %83 = arith.addf %76, %82 : vector<8x16x256xf32>
    %84 = vector.extract_strided_slice %70 {offsets = [0, 0, 0], sizes = [8, 16, 256], strides = [1, 1, 1]} : vector<10x16x256xf32> to vector<8x16x256xf32>
    %85 = vector.extract_strided_slice %72 {offsets = [1, 0], sizes = [1, 256], strides = [1, 1]} : vector<9x256xf32> to vector<1x256xf32>
    %86 = vector.shape_cast %85 : vector<1x256xf32> to vector<256xf32>
    %87 = vector.shape_cast %86 : vector<256xf32> to vector<1x1x256xf32>
    %88 = vector.broadcast %87 : vector<1x1x256xf32> to vector<8x16x256xf32>
    %89 = arith.mulf %84, %88 : vector<8x16x256xf32>
    %90 = arith.addf %83, %89 : vector<8x16x256xf32>
    %91 = vector.extract_strided_slice %71 {offsets = [0, 0, 0], sizes = [8, 16, 256], strides = [1, 1, 1]} : vector<10x16x256xf32> to vector<8x16x256xf32>
    %92 = vector.extract_strided_slice %72 {offsets = [2, 0], sizes = [1, 256], strides = [1, 1]} : vector<9x256xf32> to vector<1x256xf32>
    %93 = vector.shape_cast %92 : vector<1x256xf32> to vector<256xf32>
    %94 = vector.shape_cast %93 : vector<256xf32> to vector<1x1x256xf32>
    %95 = vector.broadcast %94 : vector<1x1x256xf32> to vector<8x16x256xf32>
    %96 = arith.mulf %91, %95 : vector<8x16x256xf32>
    %97 = arith.addf %90, %96 : vector<8x16x256xf32>
    %98 = vector.extract_strided_slice %69 {offsets = [1, 0, 0], sizes = [8, 16, 256], strides = [1, 1, 1]} : vector<10x16x256xf32> to vector<8x16x256xf32>
    %99 = vector.extract_strided_slice %72 {offsets = [3, 0], sizes = [1, 256], strides = [1, 1]} : vector<9x256xf32> to vector<1x256xf32>
    %100 = vector.shape_cast %99 : vector<1x256xf32> to vector<256xf32>
    %101 = vector.shape_cast %100 : vector<256xf32> to vector<1x1x256xf32>
    %102 = vector.broadcast %101 : vector<1x1x256xf32> to vector<8x16x256xf32>
    %103 = arith.mulf %98, %102 : vector<8x16x256xf32>
    %104 = arith.addf %97, %103 : vector<8x16x256xf32>
    %105 = vector.extract_strided_slice %70 {offsets = [1, 0, 0], sizes = [8, 16, 256], strides = [1, 1, 1]} : vector<10x16x256xf32> to vector<8x16x256xf32>
    %106 = vector.extract_strided_slice %72 {offsets = [4, 0], sizes = [1, 256], strides = [1, 1]} : vector<9x256xf32> to vector<1x256xf32>
    %107 = vector.shape_cast %106 : vector<1x256xf32> to vector<256xf32>
    %108 = vector.shape_cast %107 : vector<256xf32> to vector<1x1x256xf32>
    %109 = vector.broadcast %108 : vector<1x1x256xf32> to vector<8x16x256xf32>
    %110 = arith.mulf %105, %109 : vector<8x16x256xf32>
    %111 = arith.addf %104, %110 : vector<8x16x256xf32>
    %112 = vector.extract_strided_slice %71 {offsets = [1, 0, 0], sizes = [8, 16, 256], strides = [1, 1, 1]} : vector<10x16x256xf32> to vector<8x16x256xf32>
    %113 = vector.extract_strided_slice %72 {offsets = [5, 0], sizes = [1, 256], strides = [1, 1]} : vector<9x256xf32> to vector<1x256xf32>
    %114 = vector.shape_cast %113 : vector<1x256xf32> to vector<256xf32>
    %115 = vector.shape_cast %114 : vector<256xf32> to vector<1x1x256xf32>
    %116 = vector.broadcast %115 : vector<1x1x256xf32> to vector<8x16x256xf32>
    %117 = arith.mulf %112, %116 : vector<8x16x256xf32>
    %118 = arith.addf %111, %117 : vector<8x16x256xf32>
    %119 = vector.extract_strided_slice %69 {offsets = [2, 0, 0], sizes = [8, 16, 256], strides = [1, 1, 1]} : vector<10x16x256xf32> to vector<8x16x256xf32>
    %120 = vector.extract_strided_slice %72 {offsets = [6, 0], sizes = [1, 256], strides = [1, 1]} : vector<9x256xf32> to vector<1x256xf32>
    %121 = vector.shape_cast %120 : vector<1x256xf32> to vector<256xf32>
    %122 = vector.shape_cast %121 : vector<256xf32> to vector<1x1x256xf32>
    %123 = vector.broadcast %122 : vector<1x1x256xf32> to vector<8x16x256xf32>
    %124 = arith.mulf %119, %123 : vector<8x16x256xf32>
    %125 = arith.addf %118, %124 : vector<8x16x256xf32>
    %126 = vector.extract_strided_slice %70 {offsets = [2, 0, 0], sizes = [8, 16, 256], strides = [1, 1, 1]} : vector<10x16x256xf32> to vector<8x16x256xf32>
    %127 = vector.extract_strided_slice %72 {offsets = [7, 0], sizes = [1, 256], strides = [1, 1]} : vector<9x256xf32> to vector<1x256xf32>
    %128 = vector.shape_cast %127 : vector<1x256xf32> to vector<256xf32>
    %129 = vector.shape_cast %128 : vector<256xf32> to vector<1x1x256xf32>
    %130 = vector.broadcast %129 : vector<1x1x256xf32> to vector<8x16x256xf32>
    %131 = arith.mulf %126, %130 : vector<8x16x256xf32>
    %132 = arith.addf %125, %131 : vector<8x16x256xf32>
    %133 = vector.extract_strided_slice %71 {offsets = [2, 0, 0], sizes = [8, 16, 256], strides = [1, 1, 1]} : vector<10x16x256xf32> to vector<8x16x256xf32>
    %134 = vector.extract_strided_slice %72 {offsets = [8, 0], sizes = [1, 256], strides = [1, 1]} : vector<9x256xf32> to vector<1x256xf32>
    %135 = vector.shape_cast %134 : vector<1x256xf32> to vector<256xf32>
    %136 = vector.shape_cast %135 : vector<256xf32> to vector<1x1x256xf32>
    %137 = vector.broadcast %136 : vector<1x1x256xf32> to vector<8x16x256xf32>
    %138 = arith.mulf %133, %137 : vector<8x16x256xf32>
    %139 = arith.addf %132, %138 : vector<8x16x256xf32>
    %cst_74 = arith.constant 5.000000e-01 : f32
    %140 = vector.broadcast %cst_74 : f32 to vector<8x16x256xf32>
    %141 = arith.mulf %140, %139 : vector<8x16x256xf32>
    %cst_75 = arith.constant 0.707106769 : f32
    %142 = vector.broadcast %cst_75 : f32 to vector<8x16x256xf32>
    %143 = arith.mulf %139, %142 : vector<8x16x256xf32>
    %144 = math.erf %143 : vector<8x16x256xf32>
    %cst_76 = arith.constant 1.000000e+00 : f32
    %145 = vector.broadcast %cst_76 : f32 to vector<8x16x256xf32>
    %146 = arith.addf %145, %144 : vector<8x16x256xf32>
    %147 = arith.mulf %141, %146 : vector<8x16x256xf32>
    %148 = vector.shape_cast %147 : vector<8x16x256xf32> to vector<128x256xf32>
    %149 = arith.truncf %148 : vector<128x256xf32> to vector<128x256xbf16>
    %c0_77 = arith.constant 0 : index
    %c0_78 = arith.constant 0 : index
    %150 = vector.load %arg8[%c0_77, %c0_78] : memref<256x128xbf16, #tpu.memory_space<vmem>>, vector<256x128xbf16>
    %cst_79 = arith.constant dense<0.000000e+00> : vector<128x128xf32>
    %151 = tpu.matmul %149, %150, %cst_79 {dimension_numbers = #tpu.dot_dimension_numbers<[1], [0], [0], [1], [0, 0, 1, 1], [], []>} : vector<128x256xbf16>, vector<256x128xbf16>, vector<128x128xf32> -> vector<128x128xf32>
    %c0_80 = arith.constant 0 : index
    %c0_81 = arith.constant 0 : index
    %152 = vector.load %arg9[%c0_80, %c0_81] : memref<1x128xf32, #tpu.memory_space<vmem>>, vector<1x128xf32>
    %153 = vector.broadcast %152 : vector<1x128xf32> to vector<128x128xf32>
    %154 = arith.addf %151, %153 : vector<128x128xf32>
    %c0_82 = arith.constant 0 : index
    %c0_83 = arith.constant 0 : index
    %c0_84 = arith.constant 0 : index
    %155 = vector.load %arg10[%c0_82, %c0_83, %c0_84] : memref<1x128x128xf32, #tpu.memory_space<vmem>>, vector<1x128x128xf32>
    %156 = vector.shape_cast %155 : vector<1x128x128xf32> to vector<128x128xf32>
    %157 = vector.shape_cast %154 : vector<128x128xf32> to vector<1x128x128xf32>
    tpu.vector_store %arg10[%c0_82, %c0_83, %c0_84], %157 {strides = array<i32>} : memref<1x128x128xf32, #tpu.memory_space<vmem>>, vector<1x128x128xf32>,
    return
  }
  func.func @transform_0(%arg0: i32, %arg1: i32) -> (i32, i32, i32, i32) {
    %c0_i32 = arith.constant 0 : i32
    %c0_i32_0 = arith.constant 0 : i32
    %c0_i32_1 = arith.constant 0 : i32
    return %arg0, %arg1, %c0_i32, %c0_i32_0 : i32, i32, i32, i32
  }
  func.func @transform_2(%arg0: i32, %arg1: i32) -> (i32, i32) {
    %c0_i32 = arith.constant 0 : i32
    %c0_i32_0 = arith.constant 0 : i32
    %c0_i32_1 = arith.constant 0 : i32
    return %c0_i32, %c0_i32_0 : i32, i32
  }
  func.func @transform_3(%arg0: i32, %arg1: i32) -> (i32, i32) {
    %c0_i32 = arith.constant 0 : i32
    %c0_i32_0 = arith.constant 0 : i32
    %c0_i32_1 = arith.constant 0 : i32
    return %c0_i32, %c0_i32_0 : i32, i32
  }
  func.func @transform_4(%arg0: i32, %arg1: i32) -> (i32, i32) {
    %c0_i32 = arith.constant 0 : i32
    %c0_i32_0 = arith.constant 0 : i32
    %c0_i32_1 = arith.constant 0 : i32
    return %c0_i32, %c0_i32_0 : i32, i32
  }
  func.func @transform_5(%arg0: i32, %arg1: i32) -> (i32, i32) {
    %c0_i32 = arith.constant 0 : i32
    %c0_i32_0 = arith.constant 0 : i32
    %c0_i32_1 = arith.constant 0 : i32
    return %c0_i32, %c0_i32_0 : i32, i32
  }
  func.func @transform_6(%arg0: i32, %arg1: i32) -> (i32, i32) {
    %c0_i32 = arith.constant 0 : i32
    %c0_i32_0 = arith.constant 0 : i32
    %c0_i32_1 = arith.constant 0 : i32
    return %c0_i32, %c0_i32_0 : i32, i32
  }
  func.func @transform_7(%arg0: i32, %arg1: i32) -> (i32, i32) {
    %c0_i32 = arith.constant 0 : i32
    %c0_i32_0 = arith.constant 0 : i32
    %c0_i32_1 = arith.constant 0 : i32
    return %c0_i32, %c0_i32_0 : i32, i32
  }
  func.func @transform_8(%arg0: i32, %arg1: i32) -> (i32, i32, i32) {
    %c0_i32 = arith.constant 0 : i32
    %c0_i32_0 = arith.constant 0 : i32
    return %arg0, %arg1, %c0_i32 : i32, i32, i32
  }
}

</mosaic_0001>

<bundles_post_ra>
// kernel: tpu_custom_call.1
= control target key start
LH: loop header
LB: loop body
LE: loop exit
PB: predicated region body
PF: predicated region fallthrough
CT: control target
= control target key end

     0   :  { %s7147_s0 = inlined_call_operand.hbm [shape: f32[2,16,16,128], index: 0, kind: input, shape index: {}]   ;;  %s7148_s1 = inlined_call_operand.hbm [shape: f32[2,16,16,128], index: 1, kind: input, shape index: {}]   ;;  %s7149_s2 = inlined_call_operand.hbm [shape: bf16[128,256], index: 2, kind: input, shape index: {}]   ;;  %s7150_s3 = inlined_call_operand.vmem [shape: f32[1,256], index: 3, kind: input, shape index: {}]   ;;  %s7151_s4 = inlined_call_operand.hbm [shape: f32[9,256], index: 4, kind: input, shape index: {}]   ;;  %s7152_s5 = inlined_call_operand.vmem [shape: f32[1,256], index: 5, kind: input, shape index: {}]   ;;  %s7153_s6 = inlined_call_operand.hbm [shape: bf16[256,128], index: 6, kind: input, shape index: {}]   ;;  %s7154_s7 = inlined_call_operand.vmem [shape: f32[1,128], index: 7, kind: input, shape index: {}]   ;;  %s7155_s8 = inlined_call_operand.hbm [shape: f32[2,256,128], index: 8, kind: output, shape index: {}]  }
   0x1   :  { %7285 = sst [smem:[#allocation116_spill]] %s7149_s2 }
   0x2   :  { %7286 = sst [smem:[#allocation117_spill]] %s7150_s3 }
   0x3   :  { %7287 = sst [smem:[#allocation118_spill]] %s7151_s4 }
   0x4   :  { %7288 = sst [smem:[#allocation119_spill]] %s7152_s5 }
   0x5   :  { %7289 = sst [smem:[#allocation120_spill]] %s7153_s6 }
   0x6   :  { %7290 = sst [smem:[#allocation121_spill]] %s7154_s7 }
   0x7   :  { %7291 = sst [smem:[#allocation122_spill]] %s7155_s8 }
   0x8   :  { %13 = vsyncpa [#allocation6], 0 }
   0x9   :  { %15 = vsyncpa [#allocation6 + $0x1], 0 }
   0xa   :  { %16 = vsyncpa [#allocation9], 0 }
   0xb   :  { %17 = vsyncpa [#allocation12], 0 }
   0xc   :  { %18 = vsyncpa [#allocation7], 0 }
   0xd   :  { %20 = vsyncpa [#allocation7 + $0x1], 0  ;;  %s4475_s27 = smov 0   ;;  %s4477_s28 = smov 0  }
   0xe   :  { %s4479_s29 = smov 0   ;;  %s4481_s30 = smov 0  }
   0xf   :  { %s4483_s9 = smov 0   ;;  %s4485_s10 = smov 0  }
  0x10   :  { %s4487_s11 = smov 0   ;;  %s4489_s12 = smov 0  }
  0x11 LB: > { %7292 = sst [smem:[#allocation26_spill]] %s4383_s27  ;;  %s3701_s13 = sadd.s32 4294967295, %s4411_s12   ;;  %s4411_s12 = sphi %s4489_s12, %s26_s12   ;;  %s4407_s11 = sphi %s4487_s11, %s7768_s11   ;;  %s4403_s10 = sphi %s4485_s10, %s7767_s10   ;;  %s4399_s9 = sphi %s4483_s9, %s7766_s9   ;;  %s4395_s30 = sphi %s4481_s30, %s7765_s30   ;;  %s4391_s29 = sphi %s4479_s29, %s7764_s29   ;;  %s4387_s28 = sphi %s4477_s28, %s7763_s28   ;;  %s4383_s27 = sphi %s4475_s27, %s7762_s27  }
  0x12   : > { %s3702_s14 = sadd.s32 4294967294, %s4411_s12   ;;  %p60_p0 = scmp.ne.s32.totalorder %s4387_s28, %s4383_s27 }
  0x13   : > { %p4519_p1 = scmp.eq.s32.totalorder %s3701_s13, 0  ;;  %p4523_p2 = scmp.eq.s32.totalorder %s3701_s13, 3 }
  0x14   : > { %p218_p3 = scmp.eq.s32.totalorder %s3702_s14, 3  ;;  %p3703_p5 = scmp.ge.s32.totalorder %s4411_s12, 1 }
  0x15   : > { %s7293_s15 = scalar_select %p4519_p1, 1, 0 }
  0x16   : > { %s7294_s16 = scalar_select %p4523_p2, 1, 0 }
  0x17   : > { %p4529_p4 = por %p4519_p1, %p60_p0  ;;  %p4534_p6 = por %p218_p3, %p60_p0 }
  0x18   : > { %p225_p7 = scmp.lt.s32.totalorder %s4411_s12, 5  ;;  %s4413_s20 = smov [#allocation8]  }
  0x19   : > { %s7295_s17 = scalar_select %p4529_p4, 1, 0 }
  0x1a   : > { %s7296_s18 = scalar_select %p4534_p6, 1, 0 }
  0x1b   : > { %p4539_p8 = pnand %p3703_p5, %p225_p7  ;;  %s237_s21 = sshll.u32 %s4413_s20, 4  ;;  %s238_s21 = int_to_ptr.vmem [resolvable:$true] %s237_s21 }
  0x1c   : > { %7297 = sst [smem:[#allocation27_spill]] %s7296_s18  ;;  %s4414_s23 = smov [#allocation10]  }
  0x1d   : > { %s7298_s19 = scalar_select %p4539_p8, 1, 0 }
  0x1e   : > { %p3866_p9 = pneg %p4539_p8  ;;  %s253_s24 = sshll.u32 %s4414_s23, 4  ;;  %s4551_s24 = int_to_ptr.vmem [resolvable:$true] %s253_s24 }
  0x1f   : > { %s7300_s2 = sld [smem:[#allocation116_spill]] }
  0x20   : > { %p4547_p10 = pnand %p3866_p9, %p4519_p1 }
  0x22   : > { %p4561_p12 = pneg %p4547_p10 }
  0x25   : > { %s4139_s13 = scalar_lea.hbm %s7300_s2, 2048 }
  0x26   : > { %p4140_p11 = scmp.ne.s32.totalorder %s7300_s2, %s4139_s13  ;;  %p4146_p3 = scmp.lt.u32.totalorder %s4139_s13, %s7300_s2 }
  0x28   : > { %p4142_p13 = pnand %p4561_p12, %p4140_p11 }
  0x2a   : > { %p4143_p0 = pneg %p4142_p13 }
  0x2c   : > { %p4148_p5 = pnand %p4146_p3, %p4143_p0 }
  0x2e   : > { %4151 = shalt.err (!%p4148_p5)
}
  0x2f   : > { %s4152_s25 = scalar_lea.vmem %s238_s21, 2048  ;;  %p4160_p1 = scmp.lt.s32.totalorder %s238_s21, %s238_s21 }
  0x30   : > { %p4153_p7 = scmp.ne.s32.totalorder %s238_s21, %s4152_s25  ;;  %p4161_p4 = scmp.lt.s32.totalorder %s4152_s25, %s4152_s25 }
  0x32   : > { %p4155_p9 = pnand %p4153_p7, %p4561_p12  ;;  %p4162_p8 = por %p4161_p4, %p4160_p1 }
  0x34   : > { %p4156_p6 = pneg %p4155_p9 }
  0x36   : > { %p4163_p2 = pnand %p4162_p8, %p4156_p6 }
  0x38   : > { %4166 = shalt.err (!%p4163_p2)
}
  0x39   : > { %s7164_s18 = smov 128   ;;  %s7165_s26 = smov 8  }
  0x3a   : > { %3869 = dma.hbm_to_vmem [thread:$0]  (!%p4547_p10), %s7300_s2, 2048, %s238_s21, [#allocation9], %s7164_s18, %s7164_s18, %s7165_s26  }
  0x3b   : > { %s7302_s4 = sld [smem:[#allocation118_spill]] }
  0x41   : > { %s4167_s8 = scalar_lea.hbm %s7302_s4, 512 }
  0x42   : > { %p4168_p1 = scmp.ne.s32.totalorder %s7302_s4, %s4167_s8  ;;  %p4174_p6 = scmp.lt.u32.totalorder %s4167_s8, %s7302_s4 }
  0x44   : > { %p4170_p2 = pnand %p4168_p1, %p4561_p12 }
  0x46   : > { %p4171_p4 = pneg %p4170_p2 }
  0x48   : > { %p4176_p8 = pnand %p4174_p6, %p4171_p4 }
  0x4a   : > { %4179 = shalt.err (!%p4176_p8)
}
  0x4b   : > { %s4180_s21 = scalar_lea.vmem %s4551_s24, 512  ;;  %p4188_p3 = scmp.lt.s32.totalorder %s4551_s24, %s4551_s24 }
  0x4c   : > { %p4181_p11 = scmp.ne.s32.totalorder %s4551_s24, %s4180_s21  ;;  %p4189_p5 = scmp.lt.s32.totalorder %s4180_s21, %s4180_s21 }
  0x4e   : > { %p4183_p13 = pnand %p4181_p11, %p4561_p12  ;;  %p4190_p7 = por %p4189_p5, %p4188_p3 }
  0x50   : > { %p4184_p0 = pneg %p4183_p13 }
  0x52   : > { %p4191_p9 = pnand %p4190_p7, %p4184_p0 }
  0x54   : > { %4194 = shalt.err (!%p4191_p9)
}
  0x55   : > { %s4417_s7 = smov 256   ;;  %s4418_s3 = smov 16  }
  0x56   : > { %3872 = dma.hbm_to_vmem [thread:$0]  (!%p4547_p10), %s7302_s4, 512, %s4551_s24, [#allocation9], %s4417_s7, %s4417_s7, %s4418_s3  }
  0x57   : > { %s4419_s27 = smov [#allocation11]   ;;  %s7303_s6 = sld [smem:[#allocation120_spill]] }
  0x58   : > { %s269_s13 = sshll.u32 %s4419_s27, 4  ;;  %s270_s13 = int_to_ptr.vmem [resolvable:$true] %s269_s13 }
  0x5d   : > { %s4195_s25 = scalar_lea.hbm %s7303_s6, 2048 }
  0x5e   : > { %p4196_p1 = scmp.ne.s32.totalorder %s7303_s6, %s4195_s25  ;;  %p4202_p6 = scmp.lt.u32.totalorder %s4195_s25, %s7303_s6 }
  0x60   : > { %p4198_p2 = pnand %p4196_p1, %p4561_p12 }
  0x62   : > { %p4199_p4 = pneg %p4198_p2 }
  0x64   : > { %p4204_p8 = pnand %p4202_p6, %p4199_p4 }
  0x66   : > { %4207 = shalt.err (!%p4204_p8)
}
  0x67   : > { %s4208_s24 = scalar_lea.vmem %s270_s13, 2048  ;;  %p4216_p3 = scmp.lt.s32.totalorder %s270_s13, %s270_s13 }
  0x68   : > { %p4209_p11 = scmp.ne.s32.totalorder %s270_s13, %s4208_s24  ;;  %p4217_p5 = scmp.lt.s32.totalorder %s4208_s24, %s4208_s24 }
  0x6a   : > { %p4211_p13 = pnand %p4209_p11, %p4561_p12  ;;  %p4218_p7 = por %p4217_p5, %p4216_p3 }
  0x6c   : > { %p4212_p0 = pneg %p4211_p13 }
  0x6e   : > { %p4219_p9 = pnand %p4218_p7, %p4212_p0 }
  0x70   : > { %4222 = shalt.err (!%p4219_p9)
}
  0x71   : > { %s4420_s18 = smov 64   ;;  %s4421_s2 = smov 4  }
  0x72   : > { %3875 = dma.hbm_to_vmem [thread:$0]  (!%p4547_p10), %s7303_s6, 2048, %s270_s13, [#allocation12], %s4420_s18, %s4420_s18, %s4421_s2  }
  0x73   : > { %s35_s7 = sadd.s32 1, %s4403_s10  ;;  %s38_s3 = sadd.s32 1, %s4407_s11 }
  0x74   : > { %p36_p12 = scmp.ge.s32.totalorder %s35_s7, 2  ;;  %s47_s5 = sadd.s32 1, %s4391_s29 }
  0x75   : > { %p54_p1 = scmp.ne.s32.totalorder %s4391_s29, %s4387_s28  ;;  %p55_p2 = scmp.eq.s32.totalorder %s4411_s12, 0 }
  0x76   : > { %s7770_s7 = smov (%p36_p12, %s35_s7), 0  ;;  %s7772_s3 = smov (!%p36_p12, %s38_s3), %s4407_s11 }
  0x77   : > { %s43_s8 = ssub.s32 %s4403_s10, %s7770_s7  ;;  %p40_p4 = scmp.ge.s32.totalorder %s7772_s3, 2 }
  0x78   : > { %p7304_p6 = scmp.ne.s32.totalorder %s7294_s16, 0  ;;  %p4638_p10 = por %p55_p2, %p54_p1 }
  0x79   : > { %p3887_p11 = scmp.lt.s32.totalorder %s4411_s12, 4  ;;  %s7774_s3 = smov (%p40_p4, %s7772_s3), 0 }
  0x7a   : > { %p4634_p8 = por %p7304_p6, %p54_p1  ;;  %7307 = sst [smem:[#allocation28_spill]] %s7774_s3 }
  0x7b   : > { %s286_s13 = sand.u32 1, %s4391_s29   ;;  %s3785_s14 = sshll.u32 %s4403_s10, 4 }
  0x7c   : > { %s42_s23 = ssub.s32 %s4407_s11, %s7774_s3  ;;  %s3708_s21 = sshll.u32 %s286_s13, 7 }
  0x7d   : > { %s44_s25 = sor.u32 %s43_s8, %s42_s23  ;;  %s3711_s16 = sshll.u32 %s4407_s11, 5 }
  0x7e   : > { %p45_p13 = scmp.eq.s32.totalorder %s44_s25, 0  ;;  %s290_s24 = scalar_lea.vmem [#allocation5], %s3708_s21 }
  0x7f   : > { %s300_s18 = sshll.u32 %s290_s24, 4  ;;  %s297_s20 = sadd.s32 %s3785_s14, %s3711_s16  ;;  %s4653_s18 = int_to_ptr.vmem [resolvable:$true] %s300_s18 }
  0x80   : > { %s4651_s2 = scalar_select %p45_p13, %s4391_s29, %s47_s5  }
  0x81   : > { %s3712_s26 = sshll.u32 %s297_s20, 7  ;;  %p4659_p0 = pnand %p3887_p11, %p4638_p10 }
  0x82   : > { %s4666_s8 = scalar_lea.hbm %s7147_s0, %s3712_s26  ;;  %s4668_s5 = scalar_lea.sflag [#allocation6], %s286_s13 }
  0x83   : > { %s4223_s14 = scalar_lea.hbm %s4666_s8, 2048  ;;  %p4225_p5 = pneg %p4659_p0 }
  0x84   : > { %p4224_p3 = scmp.ne.s32.totalorder %s4666_s8, %s4223_s14  ;;  %s4228_s3 = scalar_lea.hbm %s7147_s0, 8192 }
  0x85   : > { %p4229_p12 = scmp.lt.u32.totalorder %s4666_s8, %s7147_s0  ;;  %p4230_p1 = scmp.lt.u32.totalorder %s4228_s3, %s4223_s14 }
  0x86   : > { %p4226_p7 = pnand %p4225_p5, %p4224_p3  ;;  %p4232_p4 = scmp.lt.u32.totalorder %s4223_s14, %s4666_s8 }
  0x87   : > { %p4231_p2 = por %p4230_p1, %p4229_p12 }
  0x88   : > { %p4227_p9 = pneg %p4226_p7 }
  0x89   : > { %p4233_p6 = por %p4232_p4, %p4231_p2 }
  0x8b   : > { %p4234_p10 = pnand %p4233_p6, %p4227_p9 }
  0x8d   : > { %4237 = shalt.err (!%p4234_p10)
}
  0x8e   : > { %s4238_s13 = scalar_lea.vmem %s4653_s18, 2048  ;;  %s4422_s21 = smov [#allocation5]  }
  0x8f   : > { %p4239_p11 = scmp.ne.s32.totalorder %s4653_s18, %s4238_s13  ;;  %s4243_s16 = sshll.u32 %s4422_s21, 4  ;;  %s4244_s16 = int_to_ptr.vmem [resolvable:$false] %s4243_s16 }
  0x90   : > { %s4245_s24 = scalar_lea.vmem %s4244_s16, 4096  ;;  %p4246_p7 = scmp.lt.s32.totalorder %s4653_s18, %s4244_s16 }
  0x91   : > { %p4241_p13 = pnand %p4239_p11, %p4225_p5  ;;  %p4247_p12 = scmp.lt.s32.totalorder %s4245_s24, %s4238_s13 }
  0x93   : > { %p4242_p3 = pneg %p4241_p13  ;;  %p4248_p1 = por %p4247_p12, %p4246_p7 }
  0x95   : > { %p4249_p2 = pnand %p4248_p1, %p4242_p3 }
  0x97   : > { %4252 = shalt.err (!%p4249_p2)
}
  0x98   : > { %s7309_s20 = smov 8   ;;  %s7310_s26 = smov 128  }
  0x99   : > { %3879 = dma.hbm_to_vmem [thread:$0]  (!%p4659_p0), %s4666_s8, 2048, %s4653_s18, %s4668_s5, %s7310_s26, %s7310_s26, %s7309_s20  }
  0x9a   : > { %p7311_p5 = scmp.ne.s32.totalorder %s7298_s19, 0 }
  0x9c   : > { %312 = sbr.rel (%p7311_p5) target bundleno = 1277 (0x4fd), region = 48 }
  0xa3   : > { %s4702_s14 = sand.u32 1, %s4387_s28   ;;  %p7312_p9 = scmp.ne.s32.totalorder %s7295_s17, 0 }
  0xa4   : > { %s3714_s27 = sshll.u32 %s4702_s14, 7  ;;  %s315_s6 = scalar_lea.sflag [#allocation6], %s4702_s14 }
  0xa5   : > { %s4708_s4 = scalar_lea.vmem [#allocation5], %s3714_s27 }
  0xa6   : > { %4362 = dma.done.wait (%p7312_p9), %s315_s6, 2048  }
  0xa7   : > { %4364 = vsyncadd (%p7312_p9), %s315_s6, 4294965248  ;;  %p7313_p0 = scmp.ne.s32.totalorder %s7293_s15, 0 }
  0xa9   : > { %4366 = dma.done.wait (%p7313_p0), [#allocation9], 2560  }
  0xaa   : > { %4368 = vsyncadd (%p7313_p0), [#allocation9], 4294964736 }
  0xab   : > { %4370 = dma.done.wait (%p7313_p0), [#allocation12], 2048  }
  0xac   : > { %4372 = vsyncadd (%p7313_p0), [#allocation12], 4294965248  ;;  %v4423_v0 = vmov 0.0   ;;  %v4424_v1 = vmov 0   ;;  %v3971_v2 = vld [vmem:[#allocation8 + $0x4] ss:$8 sps:$4 sm:$0xff]  }
  0xad   : > { %404 = vst [vmem:[#allocation4] sm:$0xff] %v4423_v0  ;;  %405 = vst [vmem:[#allocation4 + $0x8] sm:$0xff] %v4423_v0  ;;  %608 = vmatprep.mubr.bf16.mxu0 %v4424_v1  ;;  %v3973_v3 = vld [vmem:[#allocation8] ss:$8 sps:$4 sm:$0xff]   ;;  %576 = vmatprep.subr.bf16.mxu0 %v3971_v2  ;;  %v3974_v4 = vld [vmem:[#allocation8 + $0x14] ss:$8 sps:$4 sm:$0xff]  }
  0xae   : > { %406 = vst [vmem:[#allocation4 + $0x40] sm:$0xff] %v4423_v0  ;;  %407 = vst [vmem:[#allocation4 + $0x48] sm:$0xff] %v4423_v0  ;;  %577 = vmatpush1.bf16.msra.mxu0 %v3973_v3  ;;  %v3976_v5 = vld [vmem:[#allocation8 + $0x10] ss:$8 sps:$4 sm:$0xff]   ;;  %v3977_v6 = vld [vmem:[#allocation8 + $0x24] ss:$8 sps:$4 sm:$0xff]  }
  0xaf   : > { %408 = vst [vmem:[#allocation4 + $0x80] sm:$0xff] %v4423_v0  ;;  %409 = vst [vmem:[#allocation4 + $0x88] sm:$0xff] %v4423_v0  ;;  %578 = vmatprep.subr.bf16.mxu0 %v3974_v4  ;;  %v3979_v7 = vld [vmem:[#allocation8 + $0x20] ss:$8 sps:$4 sm:$0xff]   ;;  %v3980_v8 = vld [vmem:[#allocation8 + $0x34] ss:$8 sps:$4 sm:$0xff]  }
  0xb0   : > { %410 = vst [vmem:[#allocation4 + $0xc0] sm:$0xff] %v4423_v0  ;;  %411 = vst [vmem:[#allocation4 + $0xc8] sm:$0xff] %v4423_v0  ;;  %v3982_v9 = vld [vmem:[#allocation8 + $0x30] ss:$8 sps:$4 sm:$0xff]   ;;  %v3983_v10 = vld [vmem:[#allocation8 + $0x44] ss:$8 sps:$4 sm:$0xff]  }
  0xb1   : > { %412 = vst [vmem:[#allocation4 + $0x100] sm:$0xff] %v4423_v0  ;;  %413 = vst [vmem:[#allocation4 + $0x108] sm:$0xff] %v4423_v0  ;;  %v3985_v11 = vld [vmem:[#allocation8 + $0x40] ss:$8 sps:$4 sm:$0xff]   ;;  %v3986_v12 = vld [vmem:[#allocation8 + $0x54] ss:$8 sps:$4 sm:$0xff]  }
  0xb2   : > { %414 = vst [vmem:[#allocation4 + $0x140] sm:$0xff] %v4423_v0  ;;  %415 = vst [vmem:[#allocation4 + $0x148] sm:$0xff] %v4423_v0  ;;  %579 = vmatpush1.bf16.msra.mxu0 %v3976_v5  ;;  %v3988_v13 = vld [vmem:[#allocation8 + $0x50] ss:$8 sps:$4 sm:$0xff]   ;;  %v3989_v14 = vld [vmem:[#allocation8 + $0x64] ss:$8 sps:$4 sm:$0xff]  }
  0xb3   : > { %416 = vst [vmem:[#allocation4 + $0x180] sm:$0xff] %v4423_v0  ;;  %417 = vst [vmem:[#allocation4 + $0x188] sm:$0xff] %v4423_v0  ;;  %580 = vmatprep.subr.bf16.mxu0 %v3977_v6  ;;  %v3991_v15 = vld [vmem:[#allocation8 + $0x60] ss:$8 sps:$4 sm:$0xff]   ;;  %v3992_v16 = vld [vmem:[#allocation8 + $0x74] ss:$8 sps:$4 sm:$0xff]  }
  0xb4   : > { %418 = vst [vmem:[#allocation4 + $0x1c0] sm:$0xff] %v4423_v0  ;;  %419 = vst [vmem:[#allocation4 + $0x1c8] sm:$0xff] %v4423_v0  ;;  %v3994_v17 = vld [vmem:[#allocation8 + $0x70] ss:$8 sps:$4 sm:$0xff]   ;;  %v444_v18 = vld [vmem:[%s4708_s4] sm:$0xff]  ;;  %s3719_s15 = sshll.u32 %s4395_s30, 3 }
  0xb5   : > { %420 = vst [vmem:[#allocation4 + $0x200] sm:$0xff] %v4423_v0  ;;  %421 = vst [vmem:[#allocation4 + $0x208] sm:$0xff] %v4423_v0  ;;  %v445_v19 = vld [vmem:[%s4708_s4 + $0x8] sm:$0xff]  ;;  %v446_v21 = vld [vmem:[%s4708_s4 + $0x10] sm:$0xff]  ;;  %s3720_s17 = sadd.s32 4294967295, %s3719_s15  ;;  %s368_s19 = sadd.s32 8, %s3719_s15 }
  0xb6   : > { %422 = vst [vmem:[#allocation4 + $0x240] sm:$0xff] %v4423_v0  ;;  %423 = vst [vmem:[#allocation4 + $0x248] sm:$0xff] %v4423_v0  ;;  %581 = vmatpush1.bf16.msra.mxu0 %v3979_v7  ;;  %v460_v20 = vpack.c.bf16 %v445_v19, %v444_v18  ;;  %v447_v22 = vld [vmem:[%s4708_s4 + $0x18] sm:$0xff]  ;;  %v448_v24 = vld [vmem:[%s4708_s4 + $0x20] sm:$0xff]  ;;  %p366_p4 = scmp.gt.s32.totalorder %s3720_s17, 0  ;;  %p369_p6 = scmp.lt.s32.totalorder %s368_s19, 15 }
  0xb7   : > { %424 = vst [vmem:[#allocation4 + $0x30] sm:$0xff] %v4423_v0  ;;  %425 = vst [vmem:[#allocation4 + $0x38] sm:$0xff] %v4423_v0  ;;  %582 = vmatprep.subr.bf16.mxu0 %v3980_v8  ;;  %v461_v23 = vpack.c.bf16 %v447_v22, %v446_v21  ;;  %v449_v25 = vld [vmem:[%s4708_s4 + $0x28] sm:$0xff]  ;;  %v450_v27 = vld [vmem:[%s4708_s4 + $0x30] sm:$0xff]  ;;  %s3722_s8 = sshll.u32 %s4399_s9, 8  ;;  %s4425_s23 = smov [#allocation2]  }
  0xb8   : > { %426 = vst [vmem:[#allocation4 + $0x70] sm:$0xff] %v4423_v0  ;;  %427 = vst [vmem:[#allocation4 + $0x78] sm:$0xff] %v4423_v0  ;;  %v462_v26 = vpack.c.bf16 %v449_v25, %v448_v24  ;;  %v451_v28 = vld [vmem:[%s4708_s4 + $0x38] sm:$0xff]  ;;  %v452_v30 = vld [vmem:[%s4708_s4 + $0x40] sm:$0xff]  ;;  %s7776_s17 = smov (!%p366_p4, %s3720_s17), 0  ;;  %s7778_s19 = smov (!%p369_p6, %s368_s19), 15 }
  0xb9   : > { %428 = vst [vmem:[#allocation4 + $0xb0] sm:$0xff] %v4423_v0  ;;  %429 = vst [vmem:[#allocation4 + $0xb8] sm:$0xff] %v4423_v0  ;;  %v463_v29 = vpack.c.bf16 %v451_v28, %v450_v27  ;;  %v453_v31 = vld [vmem:[%s4708_s4 + $0x48] sm:$0xff]  ;;  %v454_v33 = vld [vmem:[%s4708_s4 + $0x50] sm:$0xff]  ;;  %s3721_s18 = sshll.u32 %s7776_s17, 4  ;;  %s383_s25 = sshll.u32 %s4425_s23, 4  ;;  %s4753_s25 = int_to_ptr.vmem [resolvable:$true] %s383_s25 }
  0xba   : > { %430 = vst [vmem:[#allocation4 + $0xf0] sm:$0xff] %v4423_v0  ;;  %431 = vst [vmem:[#allocation4 + $0xf8] sm:$0xff] %v4423_v0  ;;  %583 = vmatpush1.bf16.msra.mxu0 %v3982_v9  ;;  %v464_v32 = vpack.c.bf16 %v453_v31, %v452_v30  ;;  %v455_v34 = vld [vmem:[%s4708_s4 + $0x58] sm:$0xff]  ;;  %v456_v36 = vld [vmem:[%s4708_s4 + $0x60] sm:$0xff]  ;;  %s373_s5 = sadd.s32 %s3722_s8, %s3721_s18  ;;  %s4255_s6 = scalar_lea.hbm %s7148_s1, 8192 }
  0xbb   : > { %432 = vst [vmem:[#allocation4 + $0x130] sm:$0xff] %v4423_v0  ;;  %433 = vst [vmem:[#allocation4 + $0x138] sm:$0xff] %v4423_v0  ;;  %584 = vmatprep.subr.bf16.mxu0 %v3983_v10  ;;  %v465_v35 = vpack.c.bf16 %v455_v34, %v454_v33  ;;  %v457_v37 = vld [vmem:[%s4708_s4 + $0x68] sm:$0xff]  ;;  %v458_v39 = vld [vmem:[%s4708_s4 + $0x70] sm:$0xff]  ;;  %s3723_s3 = sshll.u32 %s373_s5, 4 }
  0xbc   : > { %434 = vst [vmem:[#allocation4 + $0x170] sm:$0xff] %v4423_v0  ;;  %435 = vst [vmem:[#allocation4 + $0x178] sm:$0xff] %v4423_v0  ;;  %v466_v38 = vpack.c.bf16 %v457_v37, %v456_v36  ;;  %v459_v40 = vld [vmem:[%s4708_s4 + $0x78] sm:$0xff]  ;;  %s375_s16 = scalar_lea.hbm %s7148_s1, %s3723_s3 }
  0xbd   : > { %436 = vst [vmem:[#allocation4 + $0x1b0] sm:$0xff] %v4423_v0  ;;  %437 = vst [vmem:[#allocation4 + $0x1b8] sm:$0xff] %v4423_v0  ;;  %v467_v41 = vpack.c.bf16 %v459_v40, %v458_v39  ;;  %s4253_s24 = scalar_lea.hbm %s375_s16, 256  ;;  %p4256_p11 = scmp.lt.u32.totalorder %s375_s16, %s7148_s1 }
  0xbe   : > { %438 = vst [vmem:[#allocation4 + $0x1f0] sm:$0xff] %v4423_v0  ;;  %439 = vst [vmem:[#allocation4 + $0x1f8] sm:$0xff] %v4423_v0  ;;  %585 = vmatpush1.bf16.msra.mxu0 %v3985_v11  ;;  %p4254_p10 = scmp.ne.s32.totalorder %s375_s16, %s4253_s24  ;;  %p4257_p13 = scmp.lt.u32.totalorder %s4255_s6, %s4253_s24 }
  0xbf   : > { %440 = vst [vmem:[#allocation4 + $0x230] sm:$0xff] %v4423_v0  ;;  %441 = vst [vmem:[#allocation4 + $0x238] sm:$0xff] %v4423_v0  ;;  %586 = vmatprep.subr.bf16.mxu0 %v3986_v12  ;;  %p4259_p7 = scmp.lt.u32.totalorder %s4253_s24, %s375_s16 }
  0xc0   : > { %442 = vst [vmem:[#allocation4 + $0x270] sm:$0xff] %v4423_v0  ;;  %443 = vst [vmem:[#allocation4 + $0x278] sm:$0xff] %v4423_v0  ;;  %p4258_p3 = por %p4257_p13, %p4256_p11 }
  0xc2   : > { %587 = vmatpush1.bf16.msra.mxu0 %v3988_v13  ;;  %p4260_p12 = por %p4259_p7, %p4258_p3 }
  0xc3   : > { %588 = vmatprep.subr.bf16.mxu0 %v3989_v14 }
  0xc4   : > { %p4261_p1 = pnand %p4260_p12, %p4254_p10 }
  0xc6   : > { %589 = vmatpush1.bf16.msra.mxu0 %v3991_v15 }
  0xc7   : > { %590 = vmatprep.subr.bf16.mxu0 %v3992_v16 }
  0xca   : > { %591 = vmatpush1.bf16.msra.mxu0 %v3994_v17 }
  0xcd   : > { %609 = vmatmul.mubr.bf16.vlgmr.msra.gmra.mrb[0].mxu0 %v460_v20 }
  0xce   : > { %618 = vmatprep.mubr.bf16.mxu0 %v4424_v1 }
  0xd5   : > { %619 = vmatmul.mubr.bf16.gmra.mrb[4].mxu0 %v461_v23 }
  0xd6   : > { %628 = vmatprep.mubr.bf16.mxu0 %v4424_v1 }
  0xdd   : > { %629 = vmatmul.mubr.bf16.gmra.mrb[8].mxu0 %v462_v26 }
  0xde   : > { %638 = vmatprep.mubr.bf16.mxu0 %v4424_v1 }
  0xe5   : > { %639 = vmatmul.mubr.bf16.gmra.mrb[12].mxu0 %v463_v29 }
  0xe6   : > { %648 = vmatprep.mubr.bf16.mxu0 %v4424_v1 }
  0xed   : > { %649 = vmatmul.mubr.bf16.gmra.mrb[16].mxu0 %v464_v32 }
  0xee   : > { %658 = vmatprep.mubr.bf16.mxu0 %v4424_v1 }
  0xf5   : > { %659 = vmatmul.mubr.bf16.gmra.mrb[20].mxu0 %v465_v35 }
  0xf6   : > { %668 = vmatprep.mubr.bf16.mxu0 %v4424_v1 }
  0xfd   : > { %669 = vmatmul.mubr.bf16.gmra.mrb[24].mxu0 %v466_v38 }
  0xfe   : > { %678 = vmatprep.mubr.bf16.mxu0 %v4424_v1 }
 0x105   : > { %679 = vmatmul.mubr.bf16.gmra.mrb[28].mxu0 %v467_v41 }
 0x106   : > { %4264 = shalt.err (!%p4261_p1)  }
 0x107   : > { %s4265_s17 = scalar_lea.vmem %s4753_s25, 256  ;;  %s4269_s18 = scalar_lea.vmem %s4753_s25, 512 }
 0x108   : > { %p4266_p2 = scmp.ne.s32.totalorder %s4753_s25, %s4265_s17  ;;  %p4270_p5 = scmp.lt.s32.totalorder %s4753_s25, %s4753_s25 }
 0x109   : > { %p4271_p9 = scmp.lt.s32.totalorder %s4269_s18, %s4265_s17 }
 0x10b   : > { %p4272_p0 = por %p4271_p9, %p4270_p5 }
 0x10d   : > { %p4273_p4 = pnand %p4272_p0, %p4266_p2 }
 0x10f   : > { %4276 = shalt.err (!%p4273_p4)  }
 0x110   : > { %386 = dma.hbm_to_vmem [thread:$0]  %s375_s16, 256, %s4753_s25, [#allocation3] }
 0x111   : > { %s3724_s5 = sshll.u32 %s7778_s19, 4  ;;  %s4426_s13 = smov [#allocation2 + $0x10]  }
 0x112   : > { %s388_s3 = sadd.s32 %s3724_s5, %s3722_s8  ;;  %s400_s21 = sshll.u32 %s4426_s13, 4  ;;  %s401_s21 = int_to_ptr.vmem [resolvable:$true] %s400_s21 }
 0x113   : > { %s3725_s23 = sshll.u32 %s388_s3, 4 }
 0x114   : > { %s390_s26 = scalar_lea.hbm %s7148_s1, %s3725_s23 }
 0x115   : > { %s4277_s4 = scalar_lea.hbm %s390_s26, 256  ;;  %p4280_p10 = scmp.lt.u32.totalorder %s390_s26, %s7148_s1 }
 0x116   : > { %p4278_p6 = scmp.ne.s32.totalorder %s390_s26, %s4277_s4  ;;  %p4281_p11 = scmp.lt.u32.totalorder %s4255_s6, %s4277_s4 }
 0x117   : > { %p4283_p3 = scmp.lt.u32.totalorder %s4277_s4, %s390_s26 }
 0x118   : > { %p4282_p13 = por %p4281_p11, %p4280_p10 }
 0x11a   : > { %p4284_p7 = por %p4283_p3, %p4282_p13 }
 0x11c   : > { %p4285_p12 = pnand %p4284_p7, %p4278_p6 }
 0x11e   : > { %4288 = shalt.err (!%p4285_p12)  }
 0x11f   : > { %s4289_s19 = scalar_lea.vmem %s401_s21, 256  ;;  %p4294_p2 = scmp.lt.s32.totalorder %s401_s21, %s4753_s25 }
 0x120   : > { %p4290_p1 = scmp.ne.s32.totalorder %s401_s21, %s4289_s19  ;;  %p4295_p5 = scmp.lt.s32.totalorder %s4269_s18, %s4289_s19 }
 0x122   : > { %p4296_p9 = por %p4295_p5, %p4294_p2 }
 0x124   : > { %p4297_p0 = pnand %p4296_p9, %p4290_p1 }
 0x126   : > { %4300 = shalt.err (!%p4297_p0)  }
 0x127   : > { %403 = dma.hbm_to_vmem [thread:$0]  %s390_s26, 256, %s401_s21, [#allocation3 + $0x1]  ;;  %v486_v42 = vlaneseq }
 0x128   : > { %s7314_s6 = sld [smem:[#allocation117_spill]]  ;;  %s4826_s25 = scalar_lea.vmem [#allocation13], %s3714_s27 }
 0x129   : > { %v4775_v43 = vshrl.u32 %v486_v42, 7 }
 0x12b   : > { %v4778_v44 = vsub.s32 0, %v4775_v43  ;;  %v4784_v46 = vsub.s32 1, %v4775_v43 }
 0x12e   : > { %v484_v45 = vld [vmem:[%s7314_s6] sm:$0x3] }
 0x12f   : > { %v4787_v47 = vrot.slane %v484_v45, %v4778_v44  ;;  %v4790_v48 = vrot.slane %v484_v45, %v4784_v46 }
 0x1a0   : > { %v610_v49 = vpop.f32.mrb[0].mxu0 }
 0x1a1   : > { %v611_v50 = vadd.f32 %v610_v49, %v4787_v47  ;;  %v612_v51 = vpop.f32.mrb[1].mxu0 }
 0x1a2   : > { %v613_v52 = vadd.f32 %v612_v51, %v4790_v48  ;;  %v614_v53 = vpop.f32.mrb[2].mxu0 }
 0x1a3   : > { %690 = vst [vmem:[#allocation4 + $0x50] sm:$0xff] %v611_v50  ;;  %v615_v54 = vadd.f32 %v614_v53, %v4787_v47  ;;  %v616_v55 = vpop.f32.mrb[3].mxu0 }
 0x1a4   : > { %691 = vst [vmem:[#allocation4 + $0x58] sm:$0xff] %v613_v52  ;;  %v617_v56 = vadd.f32 %v616_v55, %v4790_v48 }
 0x1a5   : > { %692 = vst [vmem:[#allocation4 + $0x60] sm:$0xff] %v615_v54 }
 0x1a6   : > { %693 = vst [vmem:[#allocation4 + $0x68] sm:$0xff] %v617_v56 }
 0x1a8   : > { %v620_v57 = vpop.f32.mrb[4].mxu0 }
 0x1a9   : > { %v621_v58 = vadd.f32 %v620_v57, %v4787_v47  ;;  %v622_v59 = vpop.f32.mrb[5].mxu0 }
 0x1aa   : > { %v623_v60 = vadd.f32 %v622_v59, %v4790_v48  ;;  %v624_v61 = vpop.f32.mrb[6].mxu0 }
 0x1ab   : > { %694 = vst [vmem:[#allocation4 + $0x90] sm:$0xff] %v621_v58  ;;  %v625_v62 = vadd.f32 %v624_v61, %v4787_v47  ;;  %v626_v63 = vpop.f32.mrb[7].mxu0 }
 0x1ac   : > { %695 = vst [vmem:[#allocation4 + $0x98] sm:$0xff] %v623_v60  ;;  %v627_v0 = vadd.f32 %v626_v63, %v4790_v48 }
 0x1ad   : > { %696 = vst [vmem:[#allocation4 + $0xa0] sm:$0xff] %v625_v62 }
 0x1ae   : > { %697 = vst [vmem:[#allocation4 + $0xa8] sm:$0xff] %v627_v0 }
 0x1b0   : > { %v630_v2 = vpop.f32.mrb[8].mxu0 }
 0x1b1   : > { %v631_v3 = vadd.f32 %v630_v2, %v4787_v47  ;;  %v632_v4 = vpop.f32.mrb[9].mxu0 }
 0x1b2   : > { %v633_v5 = vadd.f32 %v632_v4, %v4790_v48  ;;  %v634_v6 = vpop.f32.mrb[10].mxu0 }
 0x1b3   : > { %698 = vst [vmem:[#allocation4 + $0xd0] sm:$0xff] %v631_v3  ;;  %v635_v7 = vadd.f32 %v634_v6, %v4787_v47  ;;  %v636_v8 = vpop.f32.mrb[11].mxu0 }
 0x1b4   : > { %699 = vst [vmem:[#allocation4 + $0xd8] sm:$0xff] %v633_v5  ;;  %v637_v9 = vadd.f32 %v636_v8, %v4790_v48 }
 0x1b5   : > { %700 = vst [vmem:[#allocation4 + $0xe0] sm:$0xff] %v635_v7 }
 0x1b6   : > { %701 = vst [vmem:[#allocation4 + $0xe8] sm:$0xff] %v637_v9 }
 0x1b8   : > { %v640_v10 = vpop.f32.mrb[12].mxu0 }
 0x1b9   : > { %v641_v11 = vadd.f32 %v640_v10, %v4787_v47  ;;  %v642_v12 = vpop.f32.mrb[13].mxu0 }
 0x1ba   : > { %v643_v13 = vadd.f32 %v642_v12, %v4790_v48  ;;  %v644_v14 = vpop.f32.mrb[14].mxu0 }
 0x1bb   : > { %702 = vst [vmem:[#allocation4 + $0x110] sm:$0xff] %v641_v11  ;;  %v645_v15 = vadd.f32 %v644_v14, %v4787_v47  ;;  %v646_v16 = vpop.f32.mrb[15].mxu0 }
 0x1bc   : > { %703 = vst [vmem:[#allocation4 + $0x118] sm:$0xff] %v643_v13  ;;  %v647_v17 = vadd.f32 %v646_v16, %v4790_v48 }
 0x1bd   : > { %704 = vst [vmem:[#allocation4 + $0x120] sm:$0xff] %v645_v15 }
 0x1be   : > { %705 = vst [vmem:[#allocation4 + $0x128] sm:$0xff] %v647_v17 }
 0x1c0   : > { %v650_v18 = vpop.f32.mrb[16].mxu0 }
 0x1c1   : > { %v651_v19 = vadd.f32 %v650_v18, %v4787_v47  ;;  %v652_v20 = vpop.f32.mrb[17].mxu0 }
 0x1c2   : > { %v653_v21 = vadd.f32 %v652_v20, %v4790_v48  ;;  %v654_v22 = vpop.f32.mrb[18].mxu0 }
 0x1c3   : > { %706 = vst [vmem:[#allocation4 + $0x150] sm:$0xff] %v651_v19  ;;  %v655_v23 = vadd.f32 %v654_v22, %v4787_v47  ;;  %v656_v24 = vpop.f32.mrb[19].mxu0 }
 0x1c4   : > { %707 = vst [vmem:[#allocation4 + $0x158] sm:$0xff] %v653_v21  ;;  %v657_v25 = vadd.f32 %v656_v24, %v4790_v48 }
 0x1c5   : > { %708 = vst [vmem:[#allocation4 + $0x160] sm:$0xff] %v655_v23 }
 0x1c6   : > { %709 = vst [vmem:[#allocation4 + $0x168] sm:$0xff] %v657_v25 }
 0x1c8   : > { %v660_v26 = vpop.f32.mrb[20].mxu0 }
 0x1c9   : > { %v661_v27 = vadd.f32 %v660_v26, %v4787_v47  ;;  %v662_v28 = vpop.f32.mrb[21].mxu0 }
 0x1ca   : > { %v663_v29 = vadd.f32 %v662_v28, %v4790_v48  ;;  %v664_v30 = vpop.f32.mrb[22].mxu0 }
 0x1cb   : > { %710 = vst [vmem:[#allocation4 + $0x190] sm:$0xff] %v661_v27  ;;  %v665_v31 = vadd.f32 %v664_v30, %v4787_v47  ;;  %v666_v32 = vpop.f32.mrb[23].mxu0 }
 0x1cc   : > { %711 = vst [vmem:[#allocation4 + $0x198] sm:$0xff] %v663_v29  ;;  %v667_v33 = vadd.f32 %v666_v32, %v4790_v48 }
 0x1cd   : > { %712 = vst [vmem:[#allocation4 + $0x1a0] sm:$0xff] %v665_v31 }
 0x1ce   : > { %713 = vst [vmem:[#allocation4 + $0x1a8] sm:$0xff] %v667_v33 }
 0x1d0   : > { %v670_v34 = vpop.f32.mrb[24].mxu0 }
 0x1d1   : > { %v671_v35 = vadd.f32 %v670_v34, %v4787_v47  ;;  %v672_v36 = vpop.f32.mrb[25].mxu0 }
 0x1d2   : > { %v673_v37 = vadd.f32 %v672_v36, %v4790_v48  ;;  %v674_v38 = vpop.f32.mrb[26].mxu0 }
 0x1d3   : > { %714 = vst [vmem:[#allocation4 + $0x1d0] sm:$0xff] %v671_v35  ;;  %v675_v39 = vadd.f32 %v674_v38, %v4787_v47  ;;  %v676_v40 = vpop.f32.mrb[27].mxu0 }
 0x1d4   : > { %715 = vst [vmem:[#allocation4 + $0x1d8] sm:$0xff] %v673_v37  ;;  %v677_v41 = vadd.f32 %v676_v40, %v4790_v48 }
 0x1d5   : > { %716 = vst [vmem:[#allocation4 + $0x1e0] sm:$0xff] %v675_v39 }
 0x1d6   : > { %717 = vst [vmem:[#allocation4 + $0x1e8] sm:$0xff] %v677_v41 }
 0x1d8   : > { %v680_v42 = vpop.f32.mrb[28].mxu0 }
 0x1d9   : > { %v681_v45 = vadd.f32 %v680_v42, %v4787_v47  ;;  %v682_v49 = vpop.f32.mrb[29].mxu0 }
 0x1da   : > { %v683_v50 = vadd.f32 %v682_v49, %v4790_v48  ;;  %v684_v51 = vpop.f32.mrb[30].mxu0 }
 0x1db   : > { %718 = vst [vmem:[#allocation4 + $0x210] sm:$0xff] %v681_v45  ;;  %v685_v52 = vadd.f32 %v684_v51, %v4787_v47  ;;  %v686_v53 = vpop.f32.mrb[31].mxu0 }
 0x1dc   : > { %719 = vst [vmem:[#allocation4 + $0x218] sm:$0xff] %v683_v50  ;;  %v687_v54 = vadd.f32 %v686_v53, %v4790_v48 }
 0x1dd   : > { %720 = vst [vmem:[#allocation4 + $0x220] sm:$0xff] %v685_v52 }
 0x1de   : > { %721 = vst [vmem:[#allocation4 + $0x228] sm:$0xff] %v687_v54 }
 0x1df   : > { %4373 = dma.done.wait [#allocation3], 256 }
 0x1e0   : > { %4374 = vsyncadd [#allocation3], 4294967040 }
 0x1e1   : > { %4375 = dma.done.wait [#allocation3 + $0x1], 256 }
 0x1e2   : > { %4376 = vsyncadd [#allocation3 + $0x1], 4294967040  ;;  %874 = vmatprep.mubr.bf16.mxu0 %v4424_v1  ;;  %v3995_v55 = vld [vmem:[#allocation8 + $0x4] ss:$8 sps:$4 sm:$0xff]   ;;  %v3997_v56 = vld [vmem:[#allocation8] ss:$8 sps:$4 sm:$0xff]  }
 0x1e3   : > { %842 = vmatprep.subr.bf16.mxu0 %v3995_v55  ;;  %v3998_v57 = vld [vmem:[#allocation8 + $0x14] ss:$8 sps:$4 sm:$0xff]   ;;  %v4000_v47 = vld [vmem:[#allocation8 + $0x10] ss:$8 sps:$4 sm:$0xff]   ;;  %v4001_v58 = vld [vmem:[#allocation8 + $0x24] ss:$8 sps:$4 sm:$0xff]  }
 0x1e4   : > { %843 = vmatpush1.bf16.msra.mxu0 %v3997_v56  ;;  %v4003_v48 = vld [vmem:[#allocation8 + $0x20] ss:$8 sps:$4 sm:$0xff]   ;;  %v4004_v59 = vld [vmem:[#allocation8 + $0x34] ss:$8 sps:$4 sm:$0xff]   ;;  %v4006_v60 = vld [vmem:[#allocation8 + $0x30] ss:$8 sps:$4 sm:$0xff]  }
 0x1e5   : > { %844 = vmatprep.subr.bf16.mxu0 %v3998_v57  ;;  %v4007_v61 = vld [vmem:[#allocation8 + $0x44] ss:$8 sps:$4 sm:$0xff]   ;;  %v4009_v62 = vld [vmem:[#allocation8 + $0x40] ss:$8 sps:$4 sm:$0xff]   ;;  %v4010_v63 = vld [vmem:[#allocation8 + $0x54] ss:$8 sps:$4 sm:$0xff]  }
 0x1e6   : > { %v4012_v0 = vld [vmem:[#allocation8 + $0x50] ss:$8 sps:$4 sm:$0xff]   ;;  %v4013_v2 = vld [vmem:[#allocation8 + $0x64] ss:$8 sps:$4 sm:$0xff]   ;;  %v4015_v3 = vld [vmem:[#allocation8 + $0x60] ss:$8 sps:$4 sm:$0xff]  }
 0x1e7   : > { %v4016_v4 = vld [vmem:[#allocation8 + $0x74] ss:$8 sps:$4 sm:$0xff]   ;;  %v4018_v5 = vld [vmem:[#allocation8 + $0x70] ss:$8 sps:$4 sm:$0xff]   ;;  %v728_v6 = vld [vmem:[#allocation2] sm:$0xff]  ;;  %v1399_v12 = vsub.s32 2, %v4775_v43 }
 0x1e8   : > { %845 = vmatpush1.bf16.msra.mxu0 %v4000_v47  ;;  %v729_v7 = vld [vmem:[#allocation2 + $0x8] sm:$0xff]  ;;  %v730_v9 = vld [vmem:[#allocation2 + $0x10] sm:$0xff]  ;;  %v731_v10 = vld [vmem:[#allocation2 + $0x18] sm:$0xff]  ;;  %p895_p4 = scmp.gt.s32.totalorder %s4395_s30, 0  ;;  %s7315_s5 = sld [smem:[#allocation119_spill]]  ;;  %v7168_v39 = vsub.s32 3, %v4775_v43 }
 0x1e9   : > { %846 = vmatprep.subr.bf16.mxu0 %v4001_v58  ;;  %v732_v8 = vpack.c.bf16 %v729_v7, %v728_v6  ;;  %v733_v11 = vpack.c.bf16 %v731_v10, %v730_v9  ;;  %v4831_v13 = vld [vmem:[#allocation10 + $0x8] sm:$0xff]  ;;  %v4833_v14 = vld [vmem:[#allocation10] sm:$0xff]  ;;  %p907_p6 = scmp.lt.s32.totalorder %s4395_s30, 1  ;;  %v1004_v25 = vld [vmem:[#allocation4 + $0x30] sm:$0x1]  ;;  %vm1252_vm0 = vcmask 1046528  }
 0x1ea   : > { %v4019_v15 = vld [vmem:[#allocation11 + $0x40] sm:$0xff]   ;;  %v4021_v17 = vld [vmem:[#allocation11 + $0x48] sm:$0xff]   ;;  %v4837_v18 = vrot.slane %v4831_v13, %v1399_v12  ;;  %v4844_v20 = vrot.slane %v4831_v13, %v4778_v44  ;;  %v4848_v22 = vrot.slane %v4833_v14, %v4778_v44  ;;  %v4851_v23 = vrot.slane %v4833_v14, %v1399_v12  ;;  %s4859_s13 = scalar_select %p895_p4, 1, 0  ;;  %v4023_v28 = vld [vmem:[#allocation11 + $0x50] sm:$0xff]  }
 0x1eb   : > { %v4020_v16 = vld [vmem:[#allocation11] sm:$0xff]   ;;  %3786 = vmatprep.subr.bf16.mxu1 %v4019_v15  ;;  %v921_v24 = vld [vmem:[#allocation4 + $0x8] sm:$0x80]  ;;  %s4867_s21 = scalar_select %p907_p6, 1, 0  ;;  %v4024_v38 = vld [vmem:[#allocation11 + $0x10] sm:$0xff]   ;;  %v4887_v40 = vrot.slane %v4833_v14, %v4784_v46  ;;  %v4891_v42 = vrot.slane %v4831_v13, %v4784_v46 }
 0x1ec   : > { %847 = vmatpush1.bf16.msra.mxu0 %v4003_v48  ;;  %7316 = vst [vmem:[#allocation29_spill] sm:$0xff] %v4844_v20  ;;  %v920_v21 = vld [vmem:[#allocation4] sm:$0x80]  ;;  %7317 = vst [vmem:[#allocation30_spill] sm:$0xff] %v4848_v22  ;;  %v750_v26 = vld [vmem:[%s7314_s6] sm:$0x3]  ;;  %3787 = vmatpush3.bf16.msra.mxu1 %v4020_v16  ;;  %v1085_v32 = vmul.f32 %v4844_v20, %v921_v24  ;;  %v4875_v34 = vmul.f32 %v4851_v23, %v1004_v25 }
 0x1ed   : > { %848 = vmatprep.subr.bf16.mxu0 %v4004_v59  ;;  %7318 = vst [vmem:[#allocation31_spill] sm:$0xff] %v4851_v23  ;;  %v4022_v27 = vld [vmem:[#allocation11 + $0x8] sm:$0xff]   ;;  %3788 = vmatprep.subr.bf16.mxu1 %v4021_v17  ;;  %v1084_v33 = vmul.f32 %v4848_v22, %v920_v21  ;;  %v4878_v35 = vrot.slane %v750_v26, %v4778_v44  ;;  %7324 = vst [vmem:[#allocation37_spill] sm:$0xff] %v4887_v40  ;;  %v4025_v41 = vld [vmem:[#allocation11 + $0x58] sm:$0xff]   ;;  %v7167_v45 = vsub.s32 4, %v4775_v43  ;;  %vm1501_vm1 = vcmask 1045504  }
 0x1ee   : > { %v1064_v19 = vld [vmem:[%s7315_s5] sm:$0x3]  ;;  %7321 = vst [vmem:[#allocation34_spill] sm:$0xff] %v4875_v34  ;;  %v4882_v37 = vrot.slane %v750_v26, %v4784_v46  ;;  %7325 = vst [vmem:[#allocation38_spill] sm:$0xff] %v4891_v42  ;;  %v4896_v50 = vld [vmem:[#allocation4 + $0x48] sm:$0x80] }
 0x1ef   : > { %v4862_v29 = vrot.slane %v1064_v19, %v4778_v44  ;;  %v4870_v31 = vrot.slane %v1064_v19, %v4784_v46  ;;  %7322 = vst [vmem:[#allocation35_spill] sm:$0xff] %v4878_v35  ;;  %v4898_v51 = vld [vmem:[#allocation4 + $0x58] sm:$0xff]  ;;  %v4900_v52 = vld [vmem:[#allocation4 + $0x68] sm:$0x7f]  ;;  %v4909_v55 = vld [vmem:[#allocation4 + $0x88] sm:$0x80]  ;;  %v1091_v57 = vmul.f32 %v4844_v20, %v4896_v50 }
 0x1f0   : > { %849 = vmatpush1.bf16.msra.mxu0 %v4006_v60  ;;  %7323 = vst [vmem:[#allocation36_spill] sm:$0xff] %v4882_v37  ;;  %3789 = vmatpush3.bf16.msra.mxu1 %v4022_v27  ;;  %v4911_v56 = vld [vmem:[#allocation4 + $0x98] sm:$0xff]  ;;  %v1095_v47 = vmul.f32 %v4844_v20, %v4900_v52  ;;  %v1193_v58 = vmul.f32 %v4891_v42, %v4898_v51  ;;  %v4920_v60 = vld [vmem:[#allocation4 + $0xa8] sm:$0x7f]  ;;  %v4028_v25 = vld [vmem:[#allocation11 + $0x20] sm:$0xff]   ;;  %vm3166_vm2 = vcmask 1040384  }
 0x1f1   : > { %850 = vmatprep.subr.bf16.mxu0 %v4007_v61  ;;  %7319 = vst [vmem:[#allocation32_spill] sm:$0xff] %v4862_v29  ;;  %3790 = vmatprep.subr.bf16.mxu1 %v4023_v28  ;;  %v4903_v53 = vadd.f32 %v1085_v32, %v4870_v31  ;;  %v4906_v54 = vadd.f32 %v1084_v33, %v4862_v29  ;;  %v4026_v59 = vld [vmem:[#allocation11 + $0x18] sm:$0xff]   ;;  %v4922_v61 = vld [vmem:[#allocation4 + $0x68] sm:$0xff]  ;;  %s7756_s26 = sld [smem:[#allocation121_spill]]  ;;  %s3778_s4 = sshll.u32 %s4395_s30, 4 }
 0x1f2   : > { %v1139_v6 = vadd.f32 %v1091_v57, %v4870_v31  ;;  %v1195_v7 = vmul.f32 %v4891_v42, %v4922_v61  ;;  %v4947_v9 = vld [vmem:[#allocation4 + $0x58] sm:$0xfe]  ;;  %v4949_v10 = vld [vmem:[#allocation4 + $0x78] sm:$0x1]  ;;  %v4960_v26 = vld [vmem:[#allocation4 + $0xc8] sm:$0x80]  ;;  %v1414_v28 = vmul.f32 %v4837_v18, %v4922_v61  ;;  %v4972_v57 = vmul.f32 %v4844_v20, %v4898_v51 }
 0x1f3   : > { %7326 = vst [vmem:[#allocation39_spill] sm:$0xff] %v4903_v53  ;;  %7327 = vst [vmem:[#allocation40_spill] sm:$0xff] %v4906_v54  ;;  %v4956_v17 = vld [vmem:[#allocation4 + $0x98] sm:$0xfe]  ;;  %v1412_v24 = vmul.f32 %v4837_v18, %v4947_v9  ;;  %v1416_v32 = vmul.f32 %v4837_v18, %v4949_v10  ;;  %v4030_v49 = vld [vmem:[#allocation11 + $0x28] sm:$0xff]   ;;  %s3779_s15 = sshll.u32 %s4399_s9, 5 }
 0x1f4   : > { %851 = vmatpush1.bf16.msra.mxu0 %v4009_v62  ;;  %3791 = vmatpush3.bf16.msra.mxu1 %v4024_v38  ;;  %v1097_v62 = vmul.f32 %v4844_v20, %v4909_v55  ;;  %v1263_v19 = vrot.slane %v1195_v7, 1  ;;  %v1418_v33 = vmul.f32 %v4837_v18, %v4956_v17  ;;  %v4029_v38 = vld [vmem:[#allocation11 + $0x68] sm:$0xff]   ;;  %v1516_v46 = vrot.slane %v1414_v28, 2  ;;  %v1016_v53 = vld [vmem:[#allocation4 + $0xb0] sm:$0x1]  ;;  %s3556_s17 = sadd.s32 %s3779_s15, %s3778_s4  ;;  %s3559_s19 = sshll.u32 %s4826_s25, 4  ;;  %s7085_s19 = int_to_ptr.vmem [resolvable:$true] %s3559_s19 }
 0x1f5   : > { %852 = vmatprep.subr.bf16.mxu0 %v4010_v63  ;;  %v1099_v63 = vmul.f32 %v4844_v20, %v4911_v56  ;;  %3792 = vmatprep.subr.bf16.mxu1 %v4025_v41  ;;  %v4968_v41 = vld [vmem:[#allocation4 + $0xb8] sm:$0x1]  ;;  %v1520_v44 = vrot.slane %v1416_v32, 2  ;;  %s3780_s8 = sshll.u32 %s3556_s17, 7  ;;  %s7757_s16 = sld [smem:[#allocation122_spill]] }
 0x1f6   : > { %v1145_v12 = vadd.f32 %v1097_v62, %v4870_v31  ;;  %s3544_s18 = scalar_lea.sflag [#allocation7], %s4702_s14  ;;  %s4301_s5 = scalar_lea.vmem %s7085_s19, 2048 }
 0x1f7   : > { %v1147_v15 = vadd.f32 %v1099_v63, %v4870_v31  ;;  %v1521_v34 = vsel %vm1501_vm1, %v1516_v46, %v1520_v44  ;;  %p4302_p10 = scmp.ne.s32.totalorder %s7085_s19, %s4301_s5  ;;  %s4427_s3 = smov [#allocation13]  }
 0x1f8   : > { %853 = vmatpush1.bf16.msra.mxu0 %v4012_v0  ;;  %v1197_v0 = vmul.f32 %v4891_v42, %v4911_v56  ;;  %3793 = vmatpush3.bf16.msra.mxu1 %v4026_v59  ;;  %s4305_s23 = sshll.u32 %s4427_s3, 4  ;;  %s4306_s23 = int_to_ptr.vmem [resolvable:$false] %s4305_s23 }
 0x1f9   : > { %854 = vmatprep.subr.bf16.mxu0 %v4013_v2  ;;  %v4933_v2 = vrot.slane %v4831_v13, %v7168_v39  ;;  %p4303_p11 = pnand %p4302_p10, %p4634_p8  ;;  %p4308_p3 = scmp.lt.s32.totalorder %s7085_s19, %s4306_s23 }
 0x1fa   : > { %v1266_v21 = vrot.slane %v1197_v0, 1 }
 0x1fb   : > { %7328 = vst [vmem:[#allocation41_spill] sm:$0xff] %v4933_v2  ;;  %v1693_v44 = vmul.f32 %v4933_v2, %v4909_v55  ;;  %s7092_s27 = scalar_lea.hbm %s7757_s16, %s3780_s8  ;;  %p4304_p13 = pneg %p4303_p11 }
 0x1fc   : > { %855 = vmatpush1.bf16.msra.mxu0 %v4015_v3  ;;  %v4027_v3 = vld [vmem:[#allocation11 + $0x60] sm:$0xff]   ;;  %v1362_v7 = vadd.f32 %v1266_v21, %v1145_v12  ;;  %v4990_v12 = vmul.f32 %v4933_v2, %v4896_v50  ;;  %v4032_v50 = vld [vmem:[#allocation11 + $0x30] sm:$0xff]  }
 0x1fd   : > { %856 = vmatprep.subr.bf16.mxu0 %v4016_v4  ;;  %v4935_v4 = vld [vmem:[#allocation4 + $0xa8] sm:$0xff]  ;;  %3794 = vmatprep.subr.bf16.mxu1 %v4027_v3  ;;  %v1422_v3 = vmul.f32 %v4837_v18, %v4968_v41 }
 0x1fe   : > { %v1199_v16 = vmul.f32 %v4891_v42, %v4935_v4  ;;  %v1420_v0 = vmul.f32 %v4837_v18, %v4935_v4  ;;  %3795 = vmatpush3.bf16.msra.mxu1 %v4028_v25  ;;  %7330 = vst [vmem:[#allocation43_spill] sm:$0xff] %v4990_v12 }
 0x1ff   : > { %3796 = vmatprep.subr.bf16.mxu1 %v4029_v38 }
 0x200   : > { %857 = vmatpush1.bf16.msra.mxu0 %v4018_v5  ;;  %v1101_v5 = vmul.f32 %v4844_v20, %v4920_v60  ;;  %v1269_v27 = vrot.slane %v1199_v16, 1  ;;  %v1513_v16 = vrot.slane %v1412_v24, 2  ;;  %v1526_v39 = vrot.slane %v1420_v0, 2 }
 0x202   : > { %v1270_v62 = vsel %vm1252_vm0, %v1266_v21, %v1269_v27  ;;  %v4993_v21 = vsel %vm1501_vm1, %v1513_v16, %v1516_v46  ;;  %3797 = vmatpush3.bf16.msra.mxu1 %v4030_v49  ;;  %v1697_v46 = vmul.f32 %v4933_v2, %v4920_v60 }
 0x203   : > { %875 = vmatmul.mubr.bf16.vlgmr.msra.gmra.mrb[32].mxu0 %v732_v8  ;;  %v4945_v8 = vrot.slane %v4831_v13, %v7167_v45  ;;  %v1364_v36 = vadd.f32 %v1270_v62, %v1147_v15  ;;  %v1523_v45 = vrot.slane %v1418_v33, 2 }
 0x204   : > { %884 = vmatprep.mubr.bf16.mxu0 %v4424_v1  ;;  %v1005_v1 = vld [vmem:[#allocation4 + $0x38] sm:$0x1] }
 0x205   : > { %v4865_v30 = vmul.f32 %v4837_v18, %v1005_v1  ;;  %7329 = vst [vmem:[#allocation42_spill] sm:$0xff] %v4945_v8  ;;  %v1260_v1 = vrot.slane %v1193_v58, 1  ;;  %v1149_v58 = vadd.f32 %v1101_v5, %v4870_v31  ;;  %v1530_v5 = vrot.slane %v1422_v3, 2 }
 0x206   : > { %v1527_v15 = vsel %vm1501_vm1, %v1523_v45, %v1526_v39  ;;  %v1643_v32 = vadd.f32 %v1523_v45, %v1362_v7  ;;  %v4033_v45 = vld [vmem:[#allocation11 + $0x78] sm:$0xff]   ;;  %v5023_v49 = vmul.f32 %v4945_v8, %v4935_v4 }
 0x207   : > { %7320 = vst [vmem:[#allocation33_spill] sm:$0xff] %v4865_v30  ;;  %v1356_v59 = vadd.f32 %v1260_v1, %v1139_v6  ;;  %v4031_v6 = vld [vmem:[#allocation11 + $0x70] sm:$0xff]   ;;  %v1366_v48 = vadd.f32 %v1269_v27, %v1149_v58  ;;  %v1531_v28 = vsel %vm1501_vm1, %v1526_v39, %v1530_v5  ;;  %v5013_v39 = vmul.f32 %v4945_v8, %v4922_v61  ;;  %v5041_v5 = vld [vmem:[#allocation10 + $0x18] ss:$0 sm:$0xff] }
 0x208   : > { %3798 = vmatprep.subr.bf16.mxu1 %v4031_v6  ;;  %v1699_v27 = vmul.f32 %v4933_v2, %v4960_v26 }
 0x209   : > { %v1637_v24 = vadd.f32 %v1513_v16, %v1356_v59  ;;  %7334 = vst [vmem:[#allocation47_spill] sm:$0xff] %v5013_v39  ;;  %v5030_v38 = vadd.f32 %v1531_v28, %v1366_v48  ;;  %3799 = vmatpush3.bf16.msra.mxu1 %v4032_v50  ;;  %v4034_v16 = vld [vmem:[#allocation11 + $0x38] sm:$0xff]   ;;  %v7174_v48 = vrot.slane %v5023_v49, 1 }
 0x20a   : > { %3800 = vmatprep.subr.bf16.mxu1 %v4033_v45  ;;  %v7175_v45 = vsub.s32 7, %v4775_v43 }
 0x20b   : > { %885 = vmatmul.mubr.bf16.gmra.mrb[36].mxu0 %v733_v11  ;;  %v1143_v11 = vadd.f32 %v1095_v47, %v4870_v31  ;;  %v4976_v47 = vmul.f32 %v4844_v20, %v4960_v26  ;;  %7337 = vst [vmem:[#allocation49_spill] sm:$0xff] %v5030_v38  ;;  %v1741_v58 = vadd.f32 %v1693_v44, %v1637_v24 }
 0x20c   : > { %v5058_v24 = vadd.f32 %v1699_v27, %v1643_v32  ;;  %v7176_v32 = vsub.s32 6, %v4775_v43  ;;  %v5079_v27 = vmul.f32 %v5041_v5, %v4956_v17 }
 0x20d   : > { %v1360_v63 = vadd.f32 %v1263_v19, %v1143_v11  ;;  %v4985_v11 = vsel %vm1252_vm0, %v1260_v1, %v1263_v19  ;;  %v4999_v1 = vmul.f32 %v4933_v2, %v4898_v51  ;;  %v5003_v19 = vadd.f32 %v1527_v15, %v1364_v36  ;;  %3801 = vmatpush3.bf16.msra.mxu1 %v4034_v16 }
 0x20e   : > { %v5019_v36 = vmul.f32 %v4945_v8, %v4911_v56  ;;  %7340 = vst [vmem:[#allocation52_spill] sm:$0xff] %v5058_v24  ;;  %7342 = vst [vmem:[#allocation54_spill] sm:$0xff] %v5079_v27  ;;  %v2611_v16 = vmul.f32 %v5041_v5, %v4968_v41 }
 0x20f   : > { %v1641_v25 = vadd.f32 %v1521_v34, %v1360_v63  ;;  %7331 = vst [vmem:[#allocation44_spill] sm:$0xff] %v4999_v1  ;;  %7332 = vst [vmem:[#allocation45_spill] sm:$0xff] %v5003_v19  ;;  %v5009_v34 = vmul.f32 %v4945_v8, %v4898_v51  ;;  %v7335_v51 = vsub.s32 5, %v4775_v43  ;;  %v7170_v63 = vrot.slane %v5013_v39, 1 }
 0x210   : > { %v7173_v0 = vrot.slane %v5019_v36, 1 }
 0x211   : > { %7333 = vst [vmem:[#allocation46_spill] sm:$0xff] %v5009_v34  ;;  %v5028_v33 = vrot.slane %v4831_v13, %v7335_v51  ;;  %v1745_v59 = vadd.f32 %v1697_v46, %v1641_v25  ;;  %v7171_v62 = vrot.slane %v5009_v34, 1 }
 0x212   : > { %v1957_v28 = vadd.f32 %v7173_v0, %v1741_v58  ;;  %v926_v0 = vld [vmem:[#allocation4 + $0x40] sm:$0x80] }
 0x213   : > { %7336 = vst [vmem:[#allocation48_spill] sm:$0xff] %v5028_v33  ;;  %v5037_v3 = vmul.f32 %v5028_v33, %v4947_v9  ;;  %v2009_v7 = vmul.f32 %v5028_v33, %v4922_v61  ;;  %v2011_v6 = vmul.f32 %v5028_v33, %v4949_v10  ;;  %v5048_v15 = vmul.f32 %v5028_v33, %v4956_v17 }
 0x214   : > { %v5052_v9 = vmul.f32 %v5028_v33, %v4935_v4  ;;  %v5056_v61 = vmul.f32 %v4933_v2, %v4900_v52  ;;  %v5062_v25 = vmul.f32 %v5028_v33, %v4968_v41  ;;  %v5073_v52 = vsel %vm1252_vm0, %v7171_v62, %v7170_v63  ;;  %v5106_v62 = vld [vmem:[#allocation4 + $0x80] sm:$0x80] }
 0x215   : > { %7338 = vst [vmem:[#allocation50_spill] sm:$0xff] %v5037_v3  ;;  %v7172_v10 = vrot.slane %v5037_v3, 2  ;;  %v2106_v44 = vrot.slane %v2009_v7, 2  ;;  %v2110_v50 = vrot.slane %v2011_v6, 2  ;;  %v7177_v46 = vrot.slane %v5048_v15, 2  ;;  %7341 = vst [vmem:[#allocation53_spill] sm:$0xff] %v5073_v52 }
 0x216   : > { %7339 = vst [vmem:[#allocation51_spill] sm:$0xff] %v5056_v61  ;;  %v5083_v51 = vadd.f32 %v7174_v48, %v1745_v59  ;;  %v2609_v6 = vmul.f32 %v5041_v5, %v4935_v4  ;;  %v5097_v17 = vrot.slane %v4831_v13, %v7176_v32  ;;  %v5102_v59 = vrot.slane %v4831_v13, %v7175_v45  ;;  %v930_v48 = vld [vmem:[#allocation4 + $0x60] sm:$0x7f]  ;;  %v1006_v52 = vld [vmem:[#allocation4 + $0x50] sm:$0xfe] }
 0x217   : > { %v5092_v63 = vsel %vm1501_vm1, %v7172_v10, %v2106_v44  ;;  %v5109_v7 = vsel %vm1501_vm1, %v2106_v44, %v2110_v50  ;;  %v5113_v10 = vadd.f32 %v7177_v46, %v1957_v28  ;;  %v1096_v13 = vmul.f32 %v4848_v22, %v5106_v62  ;;  %v5122_v32 = vld [vmem:[#allocation4 + $0xa0] sm:$0x7f] }
 0x218   : > { %7343 = vst [vmem:[#allocation55_spill] sm:$0xff] %v5092_v63  ;;  %7344 = vst [vmem:[#allocation56_spill] sm:$0xff] %v5097_v17  ;;  %v5120_v45 = vmul.f32 %v5102_v59, %v4911_v56  ;;  %v2706_v41 = vrot.slane %v2609_v6, 2  ;;  %v5125_v44 = vmul.f32 %v4848_v22, %v926_v0  ;;  %v5128_v28 = vmul.f32 %v4848_v22, %v930_v48  ;;  %v5142_v6 = vld [vmem:[#allocation4 + $0x90] sm:$0xff] }
 0x219   : > { %7345 = vst [vmem:[#allocation57_spill] sm:$0xff] %v5102_v59  ;;  %7346 = vst [vmem:[#allocation58_spill] sm:$0xff] %v5109_v7  ;;  %v5132_v50 = vmul.f32 %v5097_v17, %v4909_v55  ;;  %v5136_v46 = vmul.f32 %v5097_v17, %v4911_v56  ;;  %v5140_v58 = vmul.f32 %v5102_v59, %v4935_v4  ;;  %v2710_v63 = vrot.slane %v2611_v16, 2  ;;  %v982_v55 = vld [vmem:[#allocation4 + $0x60] sm:$0xff]  ;;  %v1010_v16 = vld [vmem:[#allocation4 + $0x70] sm:$0x1] }
 0x21a   : > { %7347 = vst [vmem:[#allocation59_spill] sm:$0xff] %v5120_v45  ;;  %v1100_v7 = vmul.f32 %v4848_v22, %v5122_v32  ;;  %v5148_v39 = vmul.f32 %v5097_v17, %v4920_v60  ;;  %v1144_v3 = vadd.f32 %v1096_v13, %v4862_v29  ;;  %v5158_v34 = vmul.f32 %v4887_v40, %v982_v55 }
 0x21b   : > { %7348 = vst [vmem:[#allocation60_spill] sm:$0xff] %v5132_v50  ;;  %7349 = vst [vmem:[#allocation61_spill] sm:$0xff] %v5136_v46  ;;  %v5150_v50 = vld [vmem:[#allocation4 + $0xa0] sm:$0xff]  ;;  %v1196_v46 = vmul.f32 %v4887_v40, %v5142_v6  ;;  %v5164_v13 = vmul.f32 %v4851_v23, %v1006_v52  ;;  %v5167_v30 = vmul.f32 %v4851_v23, %v982_v55  ;;  %v7352_v4 = vrot.slane %v5079_v27, 2 }
 0x21c   : > { %7350 = vst [vmem:[#allocation62_spill] sm:$0xff] %v5140_v58  ;;  %7351 = vst [vmem:[#allocation63_spill] sm:$0xff] %v5148_v39  ;;  %v1198_v60 = vmul.f32 %v4887_v40, %v5150_v50  ;;  %v1012_v39 = vld [vmem:[#allocation4 + $0x90] sm:$0xfe]  ;;  %v1148_v1 = vadd.f32 %v1100_v7, %v4862_v29  ;;  %v5175_v37 = vmul.f32 %v4851_v23, %v1010_v16 }
 0x21d   : > { %v1265_v12 = vrot.slane %v1196_v46, 1  ;;  %v5172_v61 = vsel %vm1501_vm1, %v7352_v4, %v2706_v41  ;;  %v1417_v35 = vmul.f32 %v4851_v23, %v1012_v39  ;;  %v5179_v46 = vsel %vm1501_vm1, %v2706_v41, %v2710_v63  ;;  %v5200_v41 = vld [vmem:[#allocation4 + $0x50] sm:$0xff] }
 0x21e   : > { %7353 = vst [vmem:[#allocation64_spill] sm:$0xff] %v5172_v61  ;;  %v1267_v54 = vrot.slane %v1198_v60, 1  ;;  %7354 = vst [vmem:[#allocation65_spill] sm:$0xff] %v5179_v46  ;;  %v5183_v24 = vmul.f32 %v4851_v23, %v5150_v50  ;;  %v5186_v27 = vmul.f32 %v4851_v23, %v1016_v53  ;;  %v7357_v4 = vrot.slane %v5140_v58, 1  ;;  %v5202_v46 = vld [vmem:[#allocation10 + $0x10] ss:$0 sm:$0xff] }
 0x21f   : > { %v1361_v7 = vadd.f32 %v1265_v12, %v1144_v3  ;;  %v7358_v60 = vrot.slane %v5120_v45, 1  ;;  %7361 = vst [vmem:[#allocation70_spill] sm:$0xff] %v5202_v46  ;;  %v1522_v23 = vrot.slane %v1417_v35, 2  ;;  %v7364_v3 = vsub.s32 4, %v4775_v43 }
 0x220   : > { %7355 = vst [vmem:[#allocation66_spill] sm:$0xff] %v5183_v24  ;;  %7356 = vst [vmem:[#allocation67_spill] sm:$0xff] %v5186_v27  ;;  %v5197_v63 = vsel %vm1252_vm0, %v1265_v12, %v1267_v54  ;;  %v5204_v38 = vadd.f32 %v1267_v54, %v1148_v1  ;;  %v7190_v45 = vrot.slane %v5183_v24, 2  ;;  %v7366_v54 = vsub.s32 5, %v4775_v43 }
 0x221   : > { %v5193_v61 = vsel %vm1252_vm0, %v7358_v60, %v7357_v4  ;;  %7360 = vst [vmem:[#allocation69_spill] sm:$0xff] %v5197_v63  ;;  %v7363_v60 = vsub.s32 3, %v4775_v43  ;;  %v5217_v19 = vrot.slane %v4833_v14, %v7364_v3  ;;  %v5230_v58 = vadd.f32 %v1522_v23, %v1361_v7 }
 0x222   : > { %7359 = vst [vmem:[#allocation68_spill] sm:$0xff] %v5193_v61  ;;  %7362 = vst [vmem:[#allocation71_spill] sm:$0xff] %v5204_v38  ;;  %v5222_v1 = vrot.slane %v4833_v14, %v7366_v54  ;;  %v5227_v35 = vsel %vm1501_vm1, %v1522_v23, %v7190_v45  ;;  %v7374_v24 = vsub.s32 7, %v4775_v43  ;;  %v5250_v23 = vmul.f32 %v5202_v46, %v1012_v39 }
 0x223   : > { %v5212_v12 = vrot.slane %v4833_v14, %v7363_v60  ;;  %7365 = vst [vmem:[#allocation72_spill] sm:$0xff] %v5217_v19  ;;  %7368 = vst [vmem:[#allocation74_spill] sm:$0xff] %v5227_v35  ;;  %v7370_v60 = vsub.s32 6, %v4775_v43  ;;  %v5264_v4 = vmul.f32 %v5217_v19, %v5150_v50 }
 0x224   : > { %7367 = vst [vmem:[#allocation73_spill] sm:$0xff] %v5222_v1  ;;  %7369 = vst [vmem:[#allocation75_spill] sm:$0xff] %v5230_v58  ;;  %v5247_v45 = vrot.slane %v4833_v14, %v7374_v24  ;;  %v5267_v43 = vmul.f32 %v5222_v1, %v1006_v52  ;;  %v2010_v24 = vmul.f32 %v5222_v1, %v1010_v16 }
 0x225   : > { %v5235_v38 = vrot.slane %v4833_v14, %v7370_v60  ;;  %v5238_v3 = vmul.f32 %v5212_v12, %v926_v0  ;;  %v5242_v54 = vmul.f32 %v5212_v12, %v5200_v41  ;;  %7376 = vst [vmem:[#allocation80_spill] sm:$0xff] %v5250_v23  ;;  %v5253_v7 = vmul.f32 %v5212_v12, %v930_v48 }
 0x226   : > { %7375 = vst [vmem:[#allocation79_spill] sm:$0xff] %v5247_v45  ;;  %v5257_v60 = vmul.f32 %v5217_v19, %v5200_v41  ;;  %v5260_v0 = vmul.f32 %v5217_v19, %v982_v55  ;;  %7380 = vst [vmem:[#allocation84_spill] sm:$0xff] %v5267_v43  ;;  %v2008_v14 = vmul.f32 %v5222_v1, %v982_v55  ;;  %v7197_v55 = vrot.slane %v5267_v43, 2  ;;  %v987_v43 = vld [vmem:[#allocation4 + $0xe8] sm:$0xff] }
 0x227   : > { %7371 = vst [vmem:[#allocation76_spill] sm:$0xff] %v5235_v38  ;;  %7372 = vst [vmem:[#allocation77_spill] sm:$0xff] %v5238_v3  ;;  %v5272_v48 = vmul.f32 %v5222_v1, %v1012_v39  ;;  %v5276_v58 = vmul.f32 %v5212_v12, %v5106_v62  ;;  %v5282_v61 = vmul.f32 %v5222_v1, %v5150_v50  ;;  %v2108_v39 = vrot.slane %v2010_v24, 2 }
 0x228   : > { %7373 = vst [vmem:[#allocation78_spill] sm:$0xff] %v5242_v54  ;;  %7377 = vst [vmem:[#allocation81_spill] sm:$0xff] %v5253_v7  ;;  %v7196_v35 = vrot.slane %v5257_v60, 1  ;;  %v7195_v27 = vrot.slane %v5260_v0, 1  ;;  %v5285_v52 = vmul.f32 %v5222_v1, %v1016_v53  ;;  %v2104_v16 = vrot.slane %v2008_v14, 2 }
 0x229   : > { %7378 = vst [vmem:[#allocation82_spill] sm:$0xff] %v5257_v60  ;;  %7379 = vst [vmem:[#allocation83_spill] sm:$0xff] %v5260_v0  ;;  %v5290_v7 = vmul.f32 %v5212_v12, %v5122_v32  ;;  %v5312_v0 = vmul.f32 %v5235_v38, %v5106_v62  ;;  %v5321_v63 = vmul.f32 %v5247_v45, %v5150_v50  ;;  %v1019_v60 = vld [vmem:[#allocation4 + $0xd8] sm:$0xfe] }
 0x22a   : > { %7381 = vst [vmem:[#allocation85_spill] sm:$0xff] %v5285_v52  ;;  %v5297_v54 = vsel %vm1252_vm0, %v7196_v35, %v7195_v27  ;;  %v5304_v14 = vsel %vm1501_vm1, %v7197_v55, %v2104_v16  ;;  %v5307_v24 = vsel %vm1501_vm1, %v2104_v16, %v2108_v39  ;;  %v5317_v35 = vmul.f32 %v5247_v45, %v5142_v6  ;;  %v943_v39 = vld [vmem:[#allocation4 + $0xe8] sm:$0x7f] }
 0x22b   : > { %7382 = vst [vmem:[#allocation86_spill] sm:$0xff] %v5297_v54  ;;  %7383 = vst [vmem:[#allocation87_spill] sm:$0xff] %v5304_v14  ;;  %v2608_v16 = vmul.f32 %v5202_v46, %v5150_v50  ;;  %v5327_v55 = vmul.f32 %v5235_v38, %v5142_v6  ;;  %v2610_v62 = vmul.f32 %v5202_v46, %v1016_v53  ;;  %v5336_v50 = vld [vmem:[#allocation4 + $0xd8] sm:$0xff] }
 0x22c   : > { %7384 = vst [vmem:[#allocation88_spill] sm:$0xff] %v5307_v24  ;;  %7385 = vst [vmem:[#allocation89_spill] sm:$0xff] %v5312_v0  ;;  %v1107_v27 = vmul.f32 %v4844_v20, %v943_v39  ;;  %v1141_v1 = vadd.f32 %v4972_v57, %v4870_v31  ;;  %v1151_v53 = vadd.f32 %v4976_v47, %v4870_v31  ;;  %v7390_v20 = vrot.slane %v5317_v35, 1  ;;  %v1023_v46 = vld [vmem:[#allocation4 + $0xf8] sm:$0x1] }
 0x22d   : > { %7386 = vst [vmem:[#allocation90_spill] sm:$0xff] %v5317_v35  ;;  %7387 = vst [vmem:[#allocation91_spill] sm:$0xff] %v5321_v63  ;;  %v2704_v14 = vrot.slane %v2608_v16, 2  ;;  %v2708_v54 = vrot.slane %v2610_v62, 2  ;;  %v1203_v57 = vmul.f32 %v4891_v42, %v987_v43  ;;  %v5345_v3 = vmul.f32 %v5235_v38, %v5122_v32 }
 0x22e   : > { %7388 = vst [vmem:[#allocation92_spill] sm:$0xff] %v5327_v55  ;;  %v1201_v55 = vmul.f32 %v4891_v42, %v5336_v50  ;;  %v1155_v24 = vadd.f32 %v1107_v27, %v4870_v31  ;;  %v1358_v16 = vadd.f32 %v4985_v11, %v1141_v1  ;;  %v1424_v0 = vmul.f32 %v4837_v18, %v1019_v60 }
 0x22f   : > { %v7389_v62 = vrot.slane %v5321_v63, 1  ;;  %v1275_v42 = vrot.slane %v1203_v57, 1  ;;  %v5358_v52 = vmul.f32 %v4837_v18, %v987_v43  ;;  %v5361_v32 = vmul.f32 %v4837_v18, %v1023_v46 }
 0x230   : > { %v1272_v45 = vrot.slane %v1201_v55, 1  ;;  %v1533_v27 = vrot.slane %v1424_v0, 2  ;;  %v1639_v11 = vadd.f32 %v4993_v21, %v1358_v16  ;;  %v1695_v1 = vmul.f32 %v4933_v2, %v4911_v56 }
 0x231   : > { %v5355_v47 = vsel %vm1252_vm0, %v7390_v20, %v7389_v62  ;;  %7392 = vst [vmem:[#allocation94_spill] sm:$0xff] %v5358_v52  ;;  %7393 = vst [vmem:[#allocation95_spill] sm:$0xff] %v5361_v32  ;;  %v7394_v63 = vrot.slane %v5250_v23, 2  ;;  %v5372_v55 = vsel %vm1501_vm1, %v2704_v14, %v2708_v54  ;;  %v7210_v62 = vrot.slane %v5358_v52, 2 }
 0x232   : > { %7391 = vst [vmem:[#allocation93_spill] sm:$0xff] %v5355_v47  ;;  %7396 = vst [vmem:[#allocation97_spill] sm:$0xff] %v5372_v55  ;;  %v1368_v57 = vadd.f32 %v1272_v45, %v1151_v53  ;;  %v5376_v47 = vsel %vm1252_vm0, %v1272_v45, %v1275_v42  ;;  %v5378_v0 = vadd.f32 %v1275_v42, %v1155_v24  ;;  %v7399_v54 = vrot.slane %v5023_v49, 1 }
 0x233   : > { %v5369_v20 = vsel %vm1501_vm1, %v7394_v63, %v2704_v14  ;;  %7397 = vst [vmem:[#allocation98_spill] sm:$0xff] %v5376_v47  ;;  %v1743_v21 = vadd.f32 %v1695_v1, %v1639_v11  ;;  %v5381_v16 = vmul.f32 %v4945_v8, %v987_v43  ;;  %v5385_v63 = vmul.f32 %v4933_v2, %v943_v39 }
 0x234   : > { %7395 = vst [vmem:[#allocation96_spill] sm:$0xff] %v5369_v20  ;;  %7398 = vst [vmem:[#allocation99_spill] sm:$0xff] %v5378_v0  ;;  %v7400_v14 = vrot.slane %v5019_v36, 1  ;;  %v5393_v45 = vmul.f32 %v5028_v33, %v1019_v60  ;;  %v5398_v42 = vsel %vm1501_vm1, %v1533_v27, %v7210_v62  ;;  %v5400_v24 = vadd.f32 %v1533_v27, %v1368_v57 }
 0x235   : > { %7401 = vst [vmem:[#allocation100_spill] sm:$0xff] %v5398_v42  ;;  %v5404_v56 = vmul.f32 %v5028_v33, %v987_v43  ;;  %v7403_v36 = vrot.slane %v5052_v9, 2  ;;  %v7404_v49 = vrot.slane %v5048_v15, 2  ;;  %v2293_v27 = vmul.f32 %v5097_v17, %v4960_v26  ;;  %v5437_v42 = vld [vmem:[#allocation4 + $0xe0] sm:$0x7f] }
 0x236   : > { %v1865_v53 = vsel %vm1252_vm0, %v7400_v14, %v7399_v54  ;;  %7402 = vst [vmem:[#allocation101_spill] sm:$0xff] %v5400_v24  ;;  %v7405_v14 = vrot.slane %v5062_v25, 2  ;;  %v5419_v57 = vmul.f32 %v5028_v33, %v1023_v46  ;;  %v2295_v15 = vmul.f32 %v5097_v17, %v5336_v50 }
 0x237   : > { %v1959_v1 = vadd.f32 %v1865_v53, %v1743_v21  ;;  %v2117_v54 = vsel %vm1501_vm1, %v7404_v49, %v7403_v36  ;;  %v7406_v0 = vmov %v7403_v36  ;;  %v2297_v25 = vmul.f32 %v5097_v17, %v943_v39 }
 0x238   : > { %v2121_v62 = vsel %vm1501_vm1, %v7406_v0, %v7405_v14  ;;  %v2341_v9 = vadd.f32 %v2293_v27, %v5113_v10  ;;  %v2395_v0 = vmul.f32 %v5102_v59, %v5336_v50  ;;  %v2397_v26 = vmul.f32 %v5102_v59, %v987_v43  ;;  %v5433_v14 = vld [vmem:[#allocation4 + $0xc0] sm:$0x80] }
 0x239   : > { %v2239_v53 = vadd.f32 %v2117_v54, %v1959_v1  ;;  %v2241_v11 = vadd.f32 %v2121_v62, %v5083_v51  ;;  %v2613_v36 = vmul.f32 %v5041_v5, %v1019_v60  ;;  %v2615_v49 = vmul.f32 %v5041_v5, %v987_v43 }
 0x23a   : > { %v2617_v1 = vmul.f32 %v5041_v5, %v1023_v46  ;;  %v2461_v62 = vrot.slane %v2395_v0, 1  ;;  %v1092_v39 = vmul.f32 %v4848_v22, %v5200_v41  ;;  %v2464_v10 = vrot.slane %v2397_v26, 1  ;;  %v5468_v0 = vld [vmem:[#allocation4 + $0xd0] sm:$0xfe] }
 0x23b   : > { %v2343_v54 = vadd.f32 %v2295_v15, %v2239_v53  ;;  %v2345_v51 = vadd.f32 %v2297_v25, %v2241_v11  ;;  %v2713_v27 = vrot.slane %v2613_v36, 2  ;;  %v2716_v21 = vrot.slane %v2615_v49, 2 }
 0x23c   : > { %v2720_v24 = vrot.slane %v2617_v1, 2  ;;  %v2557_v52 = vadd.f32 %v2461_v62, %v2341_v9  ;;  %v1102_v46 = vmul.f32 %v4848_v22, %v5433_v14  ;;  %v1106_v43 = vmul.f32 %v4848_v22, %v5437_v42  ;;  %v5450_v1 = vld [vmem:[#allocation4 + $0xd0] sm:$0xff] }
 0x23d   : > { %v2465_v11 = vsel %vm1252_vm0, %v2461_v62, %v2464_v10  ;;  %v2561_v53 = vadd.f32 %v2464_v10, %v2345_v51  ;;  %v2717_v15 = vsel %vm1501_vm1, %v2713_v27, %v2716_v21  ;;  %v1138_v9 = vadd.f32 %v5125_v44, %v4862_v29 }
 0x23e   : > { %v2721_v25 = vsel %vm1501_vm1, %v2716_v21, %v2720_v24  ;;  %v2559_v26 = vadd.f32 %v2465_v11, %v2343_v54  ;;  %v2837_v36 = vadd.f32 %v2713_v27, %v2557_v52  ;;  %v1140_v60 = vadd.f32 %v1092_v39, %v4862_v29  ;;  %v5457_v21 = vld [vmem:[#allocation4 + $0xe0] sm:$0xff] }
 0x23f   : > { %v2841_v49 = vadd.f32 %v2721_v25, %v2561_v53  ;;  %v1142_v62 = vadd.f32 %v5128_v28, %v4862_v29  ;;  %v1192_v51 = vmul.f32 %v4887_v40, %v5200_v41  ;;  %v1150_v52 = vadd.f32 %v1102_v46, %v4862_v29 }
 0x240   : > { %v2839_v10 = vadd.f32 %v2717_v15, %v2559_v26  ;;  %v2933_v24 = vmul.f32 0.70710677, %v2837_v36  ;;  %v1200_v44 = vmul.f32 %v4887_v40, %v5450_v1  ;;  %v1154_v27 = vadd.f32 %v1106_v43, %v4862_v29 }
 0x241   : > { %v2937_v54 = vmul.f32 0.70710677, %v2841_v49  ;;  %v1202_v39 = vmul.f32 %v4887_v40, %v5457_v21  ;;  %v1259_v11 = vrot.slane %v1192_v51, 1  ;;  %v2885_v28 = vmul.f32 0.5, %v2837_v36  ;;  %v5472_v36 = vld [vmem:[#allocation4 + $0xf0] sm:$0x1] }
 0x242   : > { %v2935_v53 = vmul.f32 0.70710677, %v2839_v10  ;;  %4035 = verf.f32 %v2933_v24  ;;  %v1271_v41 = vrot.slane %v1200_v44, 1  ;;  %v2889_v15 = vmul.f32 0.5, %v2841_v49  ;;  %v7409_v49 = vld [vmem:[#allocation31_spill] sm:$0xff] }
 0x243   : > { %4037 = verf.f32 %v2937_v54  ;;  %v7407_v25 = vrot.slane %v5158_v34, 1  ;;  %v1355_v26 = vadd.f32 %v1259_v11, %v1138_v9  ;;  %v1273_v32 = vrot.slane %v1202_v39, 1 }
 0x244   : > { %4039 = verf.f32 %v2935_v53  ;;  %v2887_v51 = vmul.f32 0.5, %v2839_v10  ;;  %v1367_v24 = vadd.f32 %v1271_v41, %v1150_v52  ;;  %v1423_v44 = vmul.f32 %v7409_v49, %v5468_v0 }
 0x245   : > { %v1262_v46 = vsel %vm1252_vm0, %v1259_v11, %v7407_v25  ;;  %v7408_v47 = vmov %v7407_v25  ;;  %v5478_v54 = vmul.f32 %v7409_v49, %v5457_v21  ;;  %v5482_v9 = vmul.f32 %v7409_v49, %v5472_v36 }
 0x246   : > { %v1357_v43 = vadd.f32 %v1262_v46, %v1140_v60  ;;  %v1359_v55 = vadd.f32 %v7408_v47, %v1142_v62  ;;  %v7412_v60 = vrot.slane %v5167_v30, 2  ;;  %v7413_v34 = vrot.slane %v5164_v13, 2 }
 0x247   : > { %7410 = vst [vmem:[#allocation102_spill] sm:$0xff] %v5478_v54  ;;  %7411 = vst [vmem:[#allocation103_spill] sm:$0xff] %v5482_v9  ;;  %v7414_v62 = vrot.slane %v5175_v37, 2  ;;  %v1532_v53 = vrot.slane %v1423_v44, 2  ;;  %v7215_v25 = vrot.slane %v5478_v54, 2  ;;  %v5498_v23 = vsel %vm1252_vm0, %v1271_v41, %v1273_v32 }
 0x248   : > { %v1515_v47 = vsel %vm1501_vm1, %v7413_v34, %v7412_v60  ;;  %v7415_v10 = vmov %v7412_v60  ;;  %v7416_v39 = vmov %v7413_v34  ;;  %7417 = vst [vmem:[#allocation104_spill] sm:$0xff] %v5498_v23  ;;  %v5500_v35 = vadd.f32 %v1273_v32, %v1154_v27 }
 0x249   : > { %v1519_v52 = vsel %vm1501_vm1, %v7415_v10, %v7414_v62  ;;  %v1636_v11 = vadd.f32 %v7416_v39, %v1355_v26  ;;  %v1638_v46 = vadd.f32 %v1515_v47, %v1357_v43  ;;  %v1694_v30 = vmul.f32 %v5212_v12, %v5142_v6  ;;  %v7420_v43 = vld [vmem:[#allocation73_spill] sm:$0xff] }
 0x24a   : > { %v1640_v20 = vadd.f32 %v1519_v52, %v1359_v55  ;;  %7418 = vst [vmem:[#allocation105_spill] sm:$0xff] %v5500_v35  ;;  %v5508_v37 = vsel %vm1501_vm1, %v1532_v53, %v7215_v25  ;;  %v5512_v13 = vmul.f32 %v5212_v12, %v5433_v14  ;;  %v5516_v55 = vmul.f32 %v5212_v12, %v5437_v42 }
 0x24b   : > { %7419 = vst [vmem:[#allocation106_spill] sm:$0xff] %v5508_v37  ;;  %v1740_v27 = vadd.f32 %v5276_v58, %v1636_v11  ;;  %v1794_v41 = vmul.f32 %v5217_v19, %v5142_v6  ;;  %v5524_v26 = vmul.f32 %v5217_v19, %v5457_v21  ;;  %v5528_v44 = vmul.f32 %v7420_v43, %v5468_v0 }
 0x24c   : > { %v1744_v32 = vadd.f32 %v5290_v7, %v1640_v20  ;;  %v5530_v34 = vadd.f32 %v1532_v53, %v1367_v24  ;;  %v1742_v47 = vadd.f32 %v1694_v30, %v1638_v46  ;;  %v7422_v62 = vrot.slane %v5264_v4, 1  ;;  %v4036_v7 = vpop.eup %4035  ;;  %v7425_v53 = vld [vmem:[#allocation85_spill] sm:$0xff] }
 0x24d   : > { %v5536_v58 = vmul.f32 %v7420_v43, %v5457_v21  ;;  %v1860_v20 = vrot.slane %v1794_v41, 1  ;;  %v5540_v52 = vmul.f32 %v7420_v43, %v5472_v36  ;;  %v7423_v39 = vrot.slane %v5282_v61, 2 }
 0x24e   : > { %7421 = vst [vmem:[#allocation107_spill] sm:$0xff] %v5530_v34  ;;  %v1960_v10 = vadd.f32 %v7422_v62, %v1744_v32  ;;  %v7424_v24 = vrot.slane %v5272_v48, 2  ;;  %v7426_v46 = vrot.slane %v7425_v53, 2  ;;  %v4038_v62 = vpop.eup %4037  ;;  %v3029_v25 = vadd.f32 1.0, %v4036_v7 }
 0x24f   : > { %v7427_v30 = vmov %v7423_v39  ;;  %v4040_v35 = vpop.eup %4039  ;;  %v3033_v37 = vadd.f32 1.0, %v4038_v62  ;;  %v7428_v54 = vrot.slane %v5264_v4, 1  ;;  %v2294_v7 = vmul.f32 %v5235_v38, %v5450_v1  ;;  %v7430_v4 = vld [vmem:[#allocation79_spill] sm:$0xff] }
 0x250   : > { %v2115_v11 = vsel %vm1501_vm1, %v7424_v24, %v7423_v39  ;;  %v2119_v32 = vsel %vm1501_vm1, %v7427_v30, %v7426_v46  ;;  %v1956_v39 = vadd.f32 %v1860_v20, %v1740_v27  ;;  %v2292_v24 = vmul.f32 %v5235_v38, %v5433_v14 }
 0x251   : > { %v2240_v34 = vadd.f32 %v2119_v32, %v1960_v10  ;;  %v1863_v9 = vsel %vm1252_vm0, %v1860_v20, %v7428_v54  ;;  %v3031_v61 = vadd.f32 1.0, %v4040_v35  ;;  %v3077_v53 = vmul.f32 %v3029_v25, %v2885_v28 }
 0x252   : > { %v1958_v46 = vadd.f32 %v1863_v9, %v1742_v47  ;;  %v3081_v30 = vmul.f32 %v3033_v37, %v2889_v15  ;;  %v7429_v60 = vrot.slane %v5272_v48, 2  ;;  %v2296_v32 = vmul.f32 %v5235_v38, %v5437_v42  ;;  %v5571_v42 = vld [vmem:[#allocation4 + $0x108] sm:$0x80] }
 0x253   : > { %v2394_v54 = vmul.f32 %v7430_v4, %v5450_v1  ;;  %v3079_v27 = vmul.f32 %v3031_v61, %v2887_v51  ;;  %v3180_v20 = vrot.slane %v3077_v53, 7  ;;  %v2396_v35 = vmul.f32 %v7430_v4, %v5457_v21  ;;  %v7432_v61 = vld [vmem:[#allocation29_spill] sm:$0xff] }
 0x254   : > { %v2236_v10 = vadd.f32 %v7429_v60, %v1956_v39  ;;  %v2238_v62 = vadd.f32 %v2115_v11, %v1958_v46  ;;  %v3185_v14 = vrot.slane %v3081_v30, 7  ;;  %v2344_v9 = vadd.f32 %v2296_v32, %v2240_v34  ;;  %v7431_v60 = vld [vmem:[#allocation70_spill] sm:$0xff]  ;;  %v5587_v32 = vld [vmem:[#allocation4 + $0x118] sm:$0xff] }
 0x255   : > { %v2460_v25 = vrot.slane %v2394_v54, 1  ;;  %v3181_v15 = vrot.slane %v3079_v27, 7  ;;  %v2462_v48 = vrot.slane %v2396_v35, 1  ;;  %v2612_v47 = vmul.f32 %v7431_v60, %v5468_v0  ;;  %7433 = vst [vmem:[#allocation85_spill] sm:$0xff] %v5587_v32  ;;  %v5589_v27 = vld [vmem:[#allocation4 + $0x128] sm:$0xff] }
 0x256   : > { %v2340_v28 = vadd.f32 %v2292_v24, %v2236_v10  ;;  %v2342_v37 = vadd.f32 %v2294_v7, %v2238_v62  ;;  %v2614_v51 = vmul.f32 %v7431_v60, %v5457_v21  ;;  %v2616_v11 = vmul.f32 %v7431_v60, %v5472_v36  ;;  %v949_v36 = vld [vmem:[#allocation4 + $0x128] sm:$0x7f]  ;;  %v5591_v62 = vld [vmem:[#allocation4 + $0x118] sm:$0xfe] }
 0x257   : > { %v1109_v24 = vmul.f32 %v7432_v61, %v5571_v42  ;;  %v5580_v34 = vsel %vm3166_vm2, %v3180_v20, %v3181_v15  ;;  %v5583_v53 = vsel %vm3166_vm2, %v3181_v15, %v3185_v14  ;;  %v2463_v46 = vsel %vm1252_vm0, %v2460_v25, %v2462_v48  ;;  %v7434_v14 = vld [vmem:[#allocation38_spill] sm:$0xff] }
 0x258   : > { %v2556_v39 = vadd.f32 %v2460_v25, %v2340_v28  ;;  %v2558_v7 = vadd.f32 %v2463_v46, %v2342_v37  ;;  %v2560_v30 = vadd.f32 %v2462_v48, %v2344_v9  ;;  %v2712_v10 = vrot.slane %v2612_v47, 2 }
 0x259   : > { %v2714_v21 = vrot.slane %v2614_v51, 2  ;;  %v2718_v54 = vrot.slane %v2616_v11, 2  ;;  %v1113_v20 = vmul.f32 %v7432_v61, %v949_v36  ;;  %v1157_v35 = vadd.f32 %v1109_v24, %v4870_v31 }
 0x25a   : > { %v1205_v28 = vmul.f32 %v7434_v14, %v5587_v32  ;;  %v2836_v9 = vadd.f32 %v2712_v10, %v2556_v39  ;;  %v1207_v15 = vmul.f32 %v7434_v14, %v5589_v27  ;;  %v1430_v37 = vmul.f32 %v4837_v18, %v5591_v62 }
 0x25b   : > { %v2715_v25 = vsel %vm1501_vm1, %v2712_v10, %v2714_v21  ;;  %v2719_v48 = vsel %vm1501_vm1, %v2714_v21, %v2718_v54  ;;  %v1161_v47 = vadd.f32 %v1113_v20, %v4870_v31  ;;  %v5609_v23 = vmul.f32 %v4837_v18, %v5589_v27  ;;  %v1029_v54 = vld [vmem:[#allocation4 + $0x138] sm:$0x1] }
 0x25c   : > { %v2838_v60 = vadd.f32 %v2715_v25, %v2558_v7  ;;  %v1278_v51 = vrot.slane %v1205_v28, 1  ;;  %v2840_v24 = vadd.f32 %v2719_v48, %v2560_v30  ;;  %v2932_v46 = vmul.f32 0.70710677, %v2836_v9 }
 0x25d   : > { %v1281_v0 = vrot.slane %v1207_v15, 1  ;;  %7435 = vst [vmem:[#allocation70_spill] sm:$0xff] %v5609_v23  ;;  %v2884_v4 = vmul.f32 0.5, %v2836_v9  ;;  %v5614_v30 = vmul.f32 %v4837_v18, %v1029_v54  ;;  %v1543_v28 = vrot.slane %v1430_v37, 2 }
 0x25e   : > { %v2934_v10 = vmul.f32 0.70710677, %v2838_v60  ;;  %v1374_v41 = vadd.f32 %v1278_v51, %v1157_v35  ;;  %v2886_v21 = vmul.f32 0.5, %v2838_v60  ;;  %v2936_v7 = vmul.f32 0.70710677, %v2840_v24 }
 0x25f   : > { %4041 = verf.f32 %v2932_v46  ;;  %v5611_v20 = vadd.f32 %v1281_v0, %v1161_v47  ;;  %7437 = vst [vmem:[#allocation38_spill] sm:$0xff] %v5614_v30  ;;  %v2888_v25 = vmul.f32 0.5, %v2840_v24  ;;  %v7219_v35 = vrot.slane %v5609_v23, 2  ;;  %v7441_v47 = vld [vmem:[#allocation49_spill] sm:$0xff] }
 0x260   : > { %4043 = verf.f32 %v2934_v10  ;;  %v1701_v15 = vmul.f32 %v4933_v2, %v5336_v50  ;;  %v5620_v9 = vsel %vm1252_vm0, %v1278_v51, %v1281_v0  ;;  %v5622_v48 = vadd.f32 %v1543_v28, %v1374_v41  ;;  %v7445_v10 = vld [vmem:[#allocation45_spill] sm:$0xff] }
 0x261   : > { %7436 = vst [vmem:[#allocation29_spill] sm:$0xff] %v5611_v20  ;;  %4045 = verf.f32 %v2936_v7  ;;  %7438 = vst [vmem:[#allocation108_spill] sm:$0xff] %v5620_v9  ;;  %v5626_v60 = vmul.f32 %v4933_v2, %v5571_v42  ;;  %v1751_v46 = vadd.f32 %v5385_v63, %v7441_v47  ;;  %v5633_v37 = vsel %vm1501_vm1, %v1543_v28, %v7219_v35 }
 0x262   : > { %7439 = vst [vmem:[#allocation109_spill] sm:$0xff] %v5622_v48  ;;  %7442 = vst [vmem:[#allocation49_spill] sm:$0xff] %v5633_v37  ;;  %v1799_v0 = vmul.f32 %v4945_v8, %v5336_v50  ;;  %v5640_v41 = vmul.f32 %v4945_v8, %v5589_v27  ;;  %v5643_v51 = vmul.f32 %v4933_v2, %v949_v36  ;;  %v7446_v63 = vrot.slane %v5381_v16, 1 }
 0x263   : > { %7440 = vst [vmem:[#allocation110_spill] sm:$0xff] %v5626_v60  ;;  %v1749_v7 = vadd.f32 %v1701_v15, %v7445_v10  ;;  %v5650_v28 = vmul.f32 %v5028_v33, %v5591_v62  ;;  %v5654_v50 = vmul.f32 %v5028_v33, %v5589_v27  ;;  %v5657_v24 = vmul.f32 %v5028_v33, %v1029_v54 }
 0x264   : > { %7443 = vst [vmem:[#allocation111_spill] sm:$0xff] %v5640_v41  ;;  %7444 = vst [vmem:[#allocation112_spill] sm:$0xff] %v5643_v51  ;;  %v1967_v47 = vadd.f32 %v7446_v63, %v1751_v46  ;;  %v1867_v35 = vrot.slane %v1799_v0, 1  ;;  %v7450_v39 = vrot.slane %v5419_v57, 2  ;;  %v7451_v11 = vrot.slane %v5404_v56, 2  ;;  %v7455_v57 = vld [vmem:[#allocation52_spill] sm:$0xff] }
 0x265   : > { %7447 = vst [vmem:[#allocation45_spill] sm:$0xff] %v5650_v28  ;;  %7448 = vst [vmem:[#allocation113_spill] sm:$0xff] %v5654_v50  ;;  %v7453_v63 = vrot.slane %v5393_v45, 2  ;;  %v7454_v37 = vrot.slane %v5381_v16, 1  ;;  %v2303_v46 = vmul.f32 %v5097_v17, %v949_v36  ;;  %v2401_v16 = vmul.f32 %v5102_v59, %v5589_v27  ;;  %v7469_v51 = vld [vmem:[#allocation39_spill] sm:$0xff] }
 0x266   : > { %7449 = vst [vmem:[#allocation114_spill] sm:$0xff] %v5657_v24  ;;  %v2131_v15 = vsel %vm1501_vm1, %v7451_v11, %v7450_v39  ;;  %v7452_v10 = vmov %v7451_v11  ;;  %v1963_v30 = vadd.f32 %v1867_v35, %v7455_v57  ;;  %v2299_v11 = vmul.f32 %v5097_v17, %v5571_v42 }
 0x267   : > { %v2127_v0 = vsel %vm1501_vm1, %v7453_v63, %v7452_v10  ;;  %v2247_v20 = vadd.f32 %v2131_v15, %v1967_v47  ;;  %v1871_v23 = vsel %vm1252_vm0, %v1867_v35, %v7454_v37  ;;  %v2301_v39 = vmul.f32 %v5097_v17, %v5587_v32 }
 0x268   : > { %v1965_v56 = vadd.f32 %v1871_v23, %v1749_v7  ;;  %v2399_v10 = vmul.f32 %v5102_v59, %v5587_v32  ;;  %v7456_v37 = vmov %v7453_v63  ;;  %v2619_v42 = vmul.f32 %v5041_v5, %v5591_v62 }
 0x269   : > { %v4042_v47 = vpop.eup %4041  ;;  %v2243_v35 = vadd.f32 %v7456_v37, %v1963_v30  ;;  %v2621_v15 = vmul.f32 %v5041_v5, %v5589_v27  ;;  %v2623_v23 = vmul.f32 %v5041_v5, %v1029_v54  ;;  %v2351_v57 = vadd.f32 %v2303_v46, %v2247_v20 }
 0x26a   : > { %v4044_v7 = vpop.eup %4043  ;;  %v3028_v36 = vadd.f32 1.0, %v4042_v47  ;;  %v2245_v63 = vadd.f32 %v2127_v0, %v1965_v56  ;;  %v2467_v48 = vrot.slane %v2399_v10, 1  ;;  %v7457_v17 = vstv %s4859_s13  ;;  %s4307_s13 = scalar_lea.vmem %s4306_s23, 4096 }
 0x26b   : > { %v4046_v9 = vpop.eup %4045  ;;  %vm5693_vm3 = vcmp.eq.s32.totalorder %v7457_v17, 1  ;;  %v3030_v45 = vadd.f32 1.0, %v4044_v7  ;;  %v2347_v30 = vadd.f32 %v2299_v11, %v2243_v35  ;;  %v2470_v37 = vrot.slane %v2401_v16, 1  ;;  %p4309_p7 = scmp.lt.s32.totalorder %s4307_s13, %s4301_s5 }
 0x26c   : > { %v2723_v62 = vrot.slane %v2619_v42, 2  ;;  %v3032_v28 = vadd.f32 1.0, %v4046_v9  ;;  %v3076_v41 = vmul.f32 %v3028_v36, %v2884_v4  ;;  %v2349_v27 = vadd.f32 %v2301_v39, %v2245_v63  ;;  %v5700_v9 = vld [vmem:[#allocation4 + $0x100] sm:$0x80] }
 0x26d   : > { %v2726_v33 = vrot.slane %v2621_v15, 2  ;;  %v3078_v5 = vmul.f32 %v3030_v45, %v2886_v21  ;;  %v2471_v54 = vsel %vm1252_vm0, %v2467_v48, %v2470_v37  ;;  %v2563_v0 = vadd.f32 %v2467_v48, %v2347_v30  ;;  %v5702_v21 = vld [vmem:[#allocation4 + $0x120] sm:$0x7f]  ;;  %p4310_p12 = por %p4309_p7, %p4308_p3 }
 0x26e   : > { %v2567_v20 = vadd.f32 %v2470_v37, %v2351_v57  ;;  %v3080_v46 = vmul.f32 %v3032_v28, %v2888_v25  ;;  %v3177_v56 = vrot.slane %v3076_v41, 7  ;;  %v2565_v10 = vadd.f32 %v2471_v54, %v2349_v27 }
 0x26f   : > { %v2727_v17 = vsel %vm1501_vm1, %v2723_v62, %v2726_v33  ;;  %v3178_v47 = vrot.slane %v3078_v5, 7  ;;  %v2730_v11 = vrot.slane %v2623_v23, 2  ;;  %v2843_v16 = vadd.f32 %v2723_v62, %v2563_v0  ;;  %v7465_v62 = vld [vmem:[#allocation35_spill] sm:$0xff]  ;;  %p4311_p1 = pnand %p4310_p12, %p4304_p13 }
 0x270   : > { %v3183_v4 = vrot.slane %v3080_v46, 7  ;;  %v2845_v39 = vadd.f32 %v2727_v17, %v2565_v10  ;;  %v1098_v48 = vmul.f32 %v4848_v22, %v5142_v6  ;;  %v1108_v25 = vmul.f32 %v4848_v22, %v5700_v9  ;;  %v5735_v17 = vld [vmem:[#allocation4 + $0x110] sm:$0xff] }
 0x271   : > { %v5709_v41 = vsel %vm3166_vm2, %v3177_v56, %v3178_v47  ;;  %v2731_v28 = vsel %vm1501_vm1, %v2726_v33, %v2730_v11  ;;  %v2939_v35 = vmul.f32 0.70710677, %v2843_v16  ;;  %v1112_v42 = vmul.f32 %v4848_v22, %v5702_v21 }
 0x272   : > { %7460 = vst [vmem:[#allocation52_spill] sm:$0xff] %v5709_v41  ;;  %v5715_v15 = vsel %vm3166_vm2, %v3178_v47, %v3183_v4  ;;  %v2847_v36 = vadd.f32 %v2731_v28, %v2567_v20  ;;  %v2941_v63 = vmul.f32 0.70710677, %v2845_v39  ;;  %v7462_v57 = vstv %s4867_s21  ;;  %v7466_v20 = vld [vmem:[#allocation36_spill] sm:$0xff] }
 0x273   : > { %7461 = vst [vmem:[#allocation115_spill] sm:$0xff] %v5715_v15  ;;  %vm5720_vm4 = vcmp.eq.s32.totalorder %v7462_v57, 1  ;;  %v5726_v30 = vmul.f32 0.5, %v2843_v16  ;;  %v5728_v37 = vmul.f32 0.5, %v2845_v39  ;;  %4047 = verf.f32 %v2939_v35 }
 0x274   : > { %v2943_v54 = vmul.f32 0.70710677, %v2847_v36  ;;  %4049 = verf.f32 %v2941_v63  ;;  %v1146_v0 = vadd.f32 %v1098_v48, %v4862_v29  ;;  %v5733_v10 = vmul.f32 0.5, %v2847_v36  ;;  %v5755_v36 = vld [vmem:[#allocation4 + $0x120] sm:$0xff] }
 0x275   : > { %v5738_v47 = vadd.f32 %v1108_v25, %v4862_v29  ;;  %v5741_v11 = vadd.f32 %v1112_v42, %v4862_v29  ;;  %v5748_v48 = vmul.f32 %v4887_v40, %v5735_v17 }
 0x276   : > { %4051 = verf.f32 %v2943_v54 }
 0x2d6   : > { %v876_v6 = vpop.f32.mrb[32].mxu0 }
 0x2d7   : > { %v877_v27 = vadd.f32 %v876_v6, %v7465_v62  ;;  %v878_v5 = vpop.f32.mrb[33].mxu0 }
 0x2d8   : > { %v879_v46 = vadd.f32 %v878_v5, %v7466_v20  ;;  %v880_v56 = vpop.f32.mrb[34].mxu0 }
 0x2d9   : > { %v899_v16 = vsel %vm5693_vm3, %v877_v27, 0.0  ;;  %v881_v4 = vadd.f32 %v880_v56, %v7465_v62  ;;  %v882_v39 = vpop.f32.mrb[35].mxu0  ;;  %v5763_v27 = vmul.f32 %v4887_v40, %v5755_v36  ;;  %v7467_v56 = vld [vmem:[#allocation69_spill] sm:$0xff] }
 0x2da   : > { %903 = vst [vmem:[#allocation4 + $0x10] sm:$0xff] %v899_v16  ;;  %v900_v28 = vsel %vm5693_vm3, %v879_v46, 0.0  ;;  %v883_v25 = vadd.f32 %v882_v39, %v7466_v20  ;;  %v1086_v35 = vmul.f32 %v4848_v22, %v899_v16  ;;  %v1188_v42 = vmul.f32 %v4887_v40, %v899_v16 }
 0x2db   : > { %904 = vst [vmem:[#allocation4 + $0x18] sm:$0xff] %v900_v28  ;;  %v901_v63 = vsel %vm5693_vm3, %v881_v4, 0.0  ;;  %v1087_v6 = vmul.f32 %v7432_v61, %v900_v28  ;;  %v1189_v57 = vmul.f32 %v7434_v14, %v900_v28  ;;  %v5771_v16 = vadd.f32 %v7467_v56, %v1146_v0 }
 0x2dc   : > { %905 = vst [vmem:[#allocation4 + $0x20] sm:$0xff] %v901_v63  ;;  %v902_v5 = vsel %vm5693_vm3, %v883_v25, 0.0  ;;  %v5768_v54 = vmul.f32 %v4887_v40, %v901_v63  ;;  %v1253_v46 = vrot.slane %v1188_v42, 1  ;;  %v1134_v25 = vadd.f32 %v1086_v35, %v4862_v29 }
 0x2dd   : > { %906 = vst [vmem:[#allocation4 + $0x28] sm:$0xff] %v902_v5  ;;  %v5774_v4 = vmul.f32 %v7434_v14, %v902_v5  ;;  %v1254_v39 = vrot.slane %v1189_v57, 1  ;;  %v1408_v28 = vmul.f32 %v4837_v18, %v902_v5  ;;  %v1135_v59 = vadd.f32 %v1087_v6, %v4870_v31  ;;  %v7468_v57 = vld [vmem:[#allocation40_spill] sm:$0xff]  ;;  %v4048_v5 = vpop.eup %4047 }
 0x2de   : > { %v886_v23 = vpop.f32.mrb[36].mxu0  ;;  %v1255_v33 = vrot.slane %v5768_v54, 1  ;;  %v1407_v42 = vmul.f32 %v7409_v49, %v901_v63  ;;  %v1349_v24 = vadd.f32 %v1253_v46, %v7468_v57  ;;  %v4050_v60 = vpop.eup %4049 }
 0x2df   : > { %v887_v0 = vadd.f32 %v886_v23, %v7465_v62  ;;  %v888_v56 = vpop.f32.mrb[37].mxu0  ;;  %v1257_v40 = vrot.slane %v5774_v4, 1  ;;  %v1506_v50 = vrot.slane %v1408_v28, 2  ;;  %v1350_v6 = vadd.f32 %v1254_v39, %v7469_v51  ;;  %v4052_v2 = vpop.eup %4051 }
 0x2e0   : > { %v889_v7 = vadd.f32 %v888_v56, %v7466_v20  ;;  %v890_v8 = vpop.f32.mrb[38].mxu0  ;;  %v1256_v35 = vsel %vm1252_vm0, %v1253_v46, %v1255_v33  ;;  %v1504_v41 = vrot.slane %v1407_v42, 2 }
 0x2e1   : > { %v911_v23 = vsel %vm5720_vm4, %v887_v0, 0.0  ;;  %v891_v63 = vadd.f32 %v890_v8, %v7465_v62  ;;  %v892_v4 = vpop.f32.mrb[39].mxu0  ;;  %v1258_v28 = vsel %vm1252_vm0, %v1254_v39, %v1257_v40  ;;  %v1000_v57 = vld [vmem:[#allocation4 + $0x10] sm:$0xfe]  ;;  %v1351_v54 = vadd.f32 %v1256_v35, %v1134_v25  ;;  %v7470_v62 = vld [vmem:[#allocation33_spill] sm:$0xff] }
 0x2e2   : > { %916 = vst [vmem:[#allocation4 + $0x250] sm:$0xff] %v911_v23  ;;  %v912_v56 = vsel %vm5720_vm4, %v889_v7, 0.0  ;;  %v893_v51 = vadd.f32 %v892_v4, %v7466_v20  ;;  %v1001_v46 = vld [vmem:[#allocation4 + $0x18] sm:$0xfe]  ;;  %v1352_v15 = vadd.f32 %v1258_v28, %v1135_v59  ;;  %v7471_v39 = vrot.slane %v7470_v62, 2  ;;  %v7472_v62 = vld [vmem:[#allocation34_spill] sm:$0xff] }
 0x2e3   : > { %917 = vst [vmem:[#allocation4 + $0x258] sm:$0xff] %v912_v56  ;;  %v913_v0 = vsel %vm5720_vm4, %v891_v63, 0.0  ;;  %v1406_v8 = vmul.f32 %v4837_v18, %v1001_v46  ;;  %v924_v23 = vld [vmem:[#allocation4 + $0x20] sm:$0x7f]  ;;  %v1405_v32 = vmul.f32 %v7409_v49, %v1000_v57  ;;  %v3035_v25 = vadd.f32 1.0, %v4048_v5 }
 0x2e4   : > { %v1511_v42 = vsel %vm1501_vm1, %v1506_v50, %v7471_v39  ;;  %918 = vst [vmem:[#allocation4 + $0x260] sm:$0xff] %v913_v0  ;;  %v914_v7 = vsel %vm5720_vm4, %v893_v51, 0.0  ;;  %v925_v20 = vld [vmem:[#allocation4 + $0x28] sm:$0x7f]  ;;  %v1088_v59 = vmul.f32 %v4848_v22, %v924_v23  ;;  %v3037_v35 = vadd.f32 1.0, %v4050_v60 }
 0x2e5   : > { %919 = vst [vmem:[#allocation4 + $0x268] sm:$0xff] %v914_v7  ;;  %v1089_v63 = vmul.f32 %v7432_v61, %v925_v20  ;;  %v1503_v4 = vrot.slane %v1406_v8, 2  ;;  %v1502_v28 = vrot.slane %v1405_v32, 2  ;;  %v3039_v56 = vadd.f32 1.0, %v4052_v2  ;;  %v7477_v22 = vld [vmem:[#allocation78_spill] sm:$0xff] }
 0x2e6   : > { %v1136_v46 = vadd.f32 %v1088_v59, %v4862_v29  ;;  %v7473_v39 = vrot.slane %v7472_v62, 2  ;;  %v3083_v45 = vmul.f32 %v3035_v25, %v5726_v30  ;;  %v3085_v51 = vmul.f32 %v3037_v35, %v5728_v37  ;;  %v7474_v59 = vld [vmem:[#allocation43_spill] sm:$0xff]  ;;  %v7475_v30 = vld [vmem:[#allocation44_spill] sm:$0xff]  ;;  %v7476_v35 = vld [vmem:[#allocation77_spill] sm:$0xff] }
 0x2e7   : > { %v1137_v0 = vadd.f32 %v1089_v63, %v4870_v31  ;;  %v1507_v60 = vsel %vm1501_vm1, %v1503_v4, %v1506_v50  ;;  %v1631_v5 = vadd.f32 %v1503_v4, %v1350_v6  ;;  %v1505_v23 = vsel %vm1501_vm1, %v1502_v28, %v1504_v41  ;;  %v7478_v4 = vld [vmem:[#allocation46_spill] sm:$0xff] }
 0x2e8   : > { %v1509_v57 = vsel %vm1501_vm1, %v1504_v41, %v7473_v39  ;;  %v1633_v8 = vadd.f32 %v1507_v60, %v1352_v15  ;;  %v1353_v32 = vadd.f32 %v1255_v33, %v1136_v46  ;;  %v1630_v2 = vadd.f32 %v1502_v28, %v1349_v24  ;;  %v7481_v28 = vld [vmem:[#allocation81_spill] sm:$0xff] }
 0x2e9   : > { %v1632_v7 = vadd.f32 %v1505_v23, %v1351_v54  ;;  %v1354_v20 = vadd.f32 %v1257_v40, %v1137_v0  ;;  %v1735_v62 = vadd.f32 %v7474_v59, %v1631_v5  ;;  %v3087_v39 = vmul.f32 %v3039_v56, %v5733_v10  ;;  %v7480_v54 = vld [vmem:[#allocation53_spill] sm:$0xff]  ;;  %v7482_v0 = vld [vmem:[#allocation82_spill] sm:$0xff]  ;;  %v7492_v59 = vld [vmem:[#allocation83_spill] sm:$0xff] }
 0x2ea   : > { %v3190_v29 = vrot.slane %v3083_v45, 7  ;;  %v1737_v25 = vadd.f32 %v7475_v30, %v1633_v8  ;;  %v1634_v37 = vadd.f32 %v1509_v57, %v1353_v32  ;;  %v1734_v63 = vadd.f32 %v7476_v35, %v1630_v2  ;;  %v7484_v45 = vld [vmem:[#allocation86_spill] sm:$0xff]  ;;  %v7485_v57 = vld [vmem:[#allocation51_spill] sm:$0xff]  ;;  %v7494_v30 = vld [vmem:[#allocation84_spill] sm:$0xff] }
 0x2eb   : > { %v1736_v50 = vadd.f32 %v7477_v22, %v1632_v7  ;;  %v1635_v6 = vadd.f32 %v1511_v42, %v1354_v20  ;;  %v7479_v41 = vrot.slane %v7478_v4, 1  ;;  %v3191_v33 = vrot.slane %v3085_v51, 7  ;;  %v7486_v23 = vld [vmem:[#allocation50_spill] sm:$0xff]  ;;  %v7491_v7 = vld [vmem:[#allocation55_spill] sm:$0xff]  ;;  %v7499_v4 = vld [vmem:[#allocation60_spill] sm:$0xff] }
 0x2ec   : > { %v3195_v24 = vrot.slane %v3087_v39, 7  ;;  %v1953_v40 = vadd.f32 %v7480_v54, %v1737_v25  ;;  %v1738_v46 = vadd.f32 %v7481_v28, %v1634_v37  ;;  %v7483_v10 = vrot.slane %v7482_v0, 1  ;;  %v7496_v35 = vld [vmem:[#allocation87_spill] sm:$0xff]  ;;  %v7502_v28 = vld [vmem:[#allocation61_spill] sm:$0xff]  ;;  %v7503_v0 = vld [vmem:[#allocation88_spill] sm:$0xff] }
 0x2ed   : > { %v1951_v15 = vadd.f32 %v7479_v41, %v1735_v62  ;;  %v1952_v60 = vadd.f32 %v7484_v45, %v1736_v50  ;;  %v1739_v5 = vadd.f32 %v7485_v57, %v1635_v6  ;;  %v7487_v8 = vrot.slane %v7486_v23, 2  ;;  %v7497_v50 = vld [vmem:[#allocation47_spill] sm:$0xff] }
 0x2ee   : > { %v1950_v56 = vadd.f32 %v7483_v10, %v1734_v63  ;;  %v5832_v42 = vsel %vm3166_vm2, %v3190_v29, %v3191_v33  ;;  %v7488_v51 = vrot.slane %v5763_v27, 1  ;;  %v7489_v32 = vrot.slane %v5748_v48, 1  ;;  %v5862_v23 = vld [vmem:[#allocation4 + $0x110] sm:$0xfe] }
 0x2ef   : > { %v2231_v22 = vadd.f32 %v7487_v8, %v1951_v15  ;;  %v2233_v20 = vadd.f32 %v7491_v7, %v1953_v40  ;;  %v7493_v62 = vrot.slane %v7492_v59, 1  ;;  %v7495_v25 = vrot.slane %v7494_v30, 2  ;;  %v7511_v59 = vld [vmem:[#allocation90_spill] sm:$0xff]  ;;  %v7513_v30 = vld [vmem:[#allocation93_spill] sm:$0xff] }
 0x2f0   : > { %v5839_v2 = vsel %vm1252_vm0, %v7489_v32, %v7488_v51  ;;  %v2232_v63 = vadd.f32 %v7496_v35, %v1952_v60  ;;  %v7498_v29 = vrot.slane %v7497_v50, 1  ;;  %v5851_v15 = vsel %vm3166_vm2, %v3191_v33, %v3195_v24  ;;  %v7505_v60 = vld [vmem:[#allocation92_spill] sm:$0xff] }
 0x2f1   : > { %7490 = vst [vmem:[#allocation35_spill] sm:$0xff] %v5839_v2  ;;  %v1954_v39 = vadd.f32 %v7493_v62, %v1738_v46  ;;  %v2230_v37 = vadd.f32 %v7495_v25, %v1950_v56  ;;  %v2335_v41 = vadd.f32 %v7499_v4, %v2231_v22  ;;  %v7500_v54 = vmov %v7488_v51  ;;  %v7504_v56 = vld [vmem:[#allocation89_spill] sm:$0xff]  ;;  %v7507_v22 = vld [vmem:[#allocation59_spill] sm:$0xff] }
 0x2f2   : > { %v1955_v6 = vadd.f32 %v7498_v29, %v1739_v5  ;;  %v5856_v40 = vadd.f32 %v7500_v54, %v5741_v11  ;;  %v2337_v46 = vadd.f32 %v7502_v28, %v2233_v20  ;;  %v2336_v57 = vadd.f32 %v7505_v60, %v2232_v63  ;;  %v7506_v5 = vld [vmem:[#allocation58_spill] sm:$0xff]  ;;  %v7521_v28 = vld [vmem:[#allocation80_spill] sm:$0xff] }
 0x2f3   : > { %v2234_v10 = vadd.f32 %v7503_v0, %v1954_v39  ;;  %v2334_v45 = vadd.f32 %v7504_v56, %v2230_v37  ;;  %v7508_v33 = vrot.slane %v7507_v22, 1  ;;  %v7509_v27 = vmov %v7489_v32  ;;  %v7510_v32 = vld [vmem:[#allocation68_spill] sm:$0xff]  ;;  %v7514_v37 = vld [vmem:[#allocation63_spill] sm:$0xff]  ;;  %v7515_v63 = vld [vmem:[#allocation54_spill] sm:$0xff] }
 0x2f4   : > { %7501 = vst [vmem:[#allocation36_spill] sm:$0xff] %v5856_v40  ;;  %v2235_v8 = vadd.f32 %v7506_v5, %v1955_v6  ;;  %v1373_v11 = vadd.f32 %v7509_v27, %v5738_v47  ;;  %v1429_v51 = vmul.f32 %v7409_v49, %v5862_v23  ;;  %v2553_v7 = vadd.f32 %v7510_v32, %v2337_v46  ;;  %v7518_v6 = vld [vmem:[#allocation64_spill] sm:$0xff]  ;;  %v7524_v60 = vld [vmem:[#allocation62_spill] sm:$0xff] }
 0x2f5   : > { %v2551_v24 = vadd.f32 %v7508_v33, %v2335_v41  ;;  %v2338_v20 = vadd.f32 %v5345_v3, %v2234_v10  ;;  %v7512_v62 = vrot.slane %v7511_v59, 1  ;;  %v2552_v25 = vadd.f32 %v7513_v30, %v2336_v57  ;;  %v7519_v3 = vld [vmem:[#allocation91_spill] sm:$0xff]  ;;  %v7523_v10 = vld [vmem:[#allocation96_spill] sm:$0xff]  ;;  %v7529_v27 = vld [vmem:[#allocation66_spill] sm:$0xff] }
 0x2f6   : > { %v2339_v35 = vadd.f32 %v7514_v37, %v2235_v8  ;;  %v7516_v50 = vrot.slane %v7515_v63, 2  ;;  %v5884_v48 = vmul.f32 %v7409_v49, %v5755_v36  ;;  %v2833_v4 = vadd.f32 %v7518_v6, %v2553_v7  ;;  %v7527_v33 = vld [vmem:[#allocation67_spill] sm:$0xff] }
 0x2f7   : > { %v2550_v39 = vadd.f32 %v7512_v62, %v2334_v45  ;;  %v7520_v41 = vrot.slane %v7519_v3, 1  ;;  %v7522_v46 = vrot.slane %v7521_v28, 2  ;;  %v2832_v56 = vadd.f32 %v7523_v10, %v2552_v25  ;;  %v5892_v45 = vld [vmem:[#allocation4 + $0x130] sm:$0x1]  ;;  %v7531_v62 = vld [vmem:[#allocation97_spill] sm:$0xff] }
 0x2f8   : > { %v2831_v29 = vadd.f32 %v7516_v50, %v2551_v24  ;;  %7517 = vst [vmem:[#allocation69_spill] sm:$0xff] %v5884_v48  ;;  %v7525_v57 = vrot.slane %v7524_v60, 1  ;;  %v5898_v22 = vmul.f32 %v7409_v49, %v5892_v45  ;;  %v7528_v24 = vrot.slane %v7527_v33, 2  ;;  %v7532_v25 = vld [vmem:[#allocation65_spill] sm:$0xff] }
 0x2f9   : > { %v2554_v54 = vadd.f32 %v7520_v41, %v2338_v20  ;;  %v2830_v0 = vadd.f32 %v7522_v46, %v2550_v39  ;;  %v7530_v32 = vrot.slane %v7529_v27, 2  ;;  %v2929_v59 = vmul.f32 0.70710677, %v2833_v4 }
 0x2fa   : > { %v2555_v5 = vadd.f32 %v7525_v57, %v2339_v35  ;;  %v2927_v8 = vmul.f32 0.70710677, %v2831_v29  ;;  %7526 = vst [vmem:[#allocation40_spill] sm:$0xff] %v5898_v22  ;;  %v2879_v20 = vmul.f32 0.5, %v2831_v29  ;;  %v1542_v30 = vrot.slane %v1429_v51, 2  ;;  %v7533_v51 = vld [vmem:[#allocation74_spill] sm:$0xff] }
 0x2fb   : > { %v1529_v7 = vsel %vm1501_vm1, %v7530_v32, %v7528_v24  ;;  %v2834_v39 = vadd.f32 %v7531_v62, %v2554_v54  ;;  %v2881_v63 = vmul.f32 0.5, %v2833_v4  ;;  %v2926_v35 = vmul.f32 0.70710677, %v2830_v0  ;;  %v7534_v4 = vld [vmem:[#allocation71_spill] sm:$0xff] }
 0x2fc   : > { %v2835_v37 = vadd.f32 %v7532_v25, %v2555_v5  ;;  %4053 = verf.f32 %v2927_v8  ;;  %v5907_v50 = vmul.f32 0.5, %v2830_v0  ;;  %v2928_v6 = vmul.f32 0.70710677, %v2832_v56  ;;  %v7537_v8 = vld [vmem:[#allocation75_spill] sm:$0xff] }
 0x2fd   : > { %4055 = verf.f32 %v2929_v59  ;;  %v2930_v3 = vmul.f32 0.70710677, %v2834_v39  ;;  %v5909_v28 = vmul.f32 0.5, %v2832_v56  ;;  %v7249_v29 = vrot.slane %v5884_v48, 2 }
 0x2fe   : > { %v2931_v41 = vmul.f32 0.70710677, %v2835_v37  ;;  %4057 = verf.f32 %v2926_v35  ;;  %v5912_v46 = vmul.f32 0.5, %v2834_v39  ;;  %v1644_v54 = vadd.f32 %v7533_v51, %v5771_v16 }
 0x2ff   : > { %4059 = verf.f32 %v2928_v6  ;;  %v1646_v10 = vadd.f32 %v1529_v7, %v7534_v4  ;;  %v5920_v0 = vsel %vm1501_vm1, %v1542_v30, %v7249_v29  ;;  %v5922_v60 = vadd.f32 %v1542_v30, %v1373_v11 }
 0x300   : > { %4061 = verf.f32 %v2931_v41  ;;  %7535 = vst [vmem:[#allocation39_spill] sm:$0xff] %v5920_v0  ;;  %v1700_v56 = vmul.f32 %v5212_v12, %v5450_v1  ;;  %v2883_v57 = vmul.f32 0.5, %v2835_v37  ;;  %v5929_v16 = vmul.f32 %v5212_v12, %v5700_v9 }
 0x301   : > { %7536 = vst [vmem:[#allocation33_spill] sm:$0xff] %v5922_v60  ;;  %4063 = verf.f32 %v2930_v3  ;;  %v1746_v33 = vadd.f32 %v5512_v13, %v7537_v8  ;;  %v1750_v24 = vadd.f32 %v5516_v55, %v1646_v10  ;;  %v1798_v11 = vmul.f32 %v5217_v19, %v5450_v1 }
 0x302   : > { %v5938_v27 = vmul.f32 %v5217_v19, %v5755_v36  ;;  %v5942_v32 = vmul.f32 %v5212_v12, %v5702_v21  ;;  %v1748_v7 = vadd.f32 %v1700_v56, %v1644_v54  ;;  %v5946_v59 = vmul.f32 %v7420_v43, %v5862_v23 }
 0x303   : > { %v5950_v13 = vmul.f32 %v7420_v43, %v5755_v36  ;;  %v1866_v55 = vrot.slane %v1798_v11, 1  ;;  %v7538_v1 = vrot.slane %v5524_v26, 1  ;;  %v5956_v39 = vmul.f32 %v7420_v43, %v5892_v45 }
 0x304   : > { %v7539_v30 = vrot.slane %v5540_v52, 2  ;;  %v7540_v25 = vrot.slane %v5536_v58, 2  ;;  %v7542_v3 = vrot.slane %v5528_v44, 2  ;;  %v2298_v54 = vmul.f32 %v5235_v38, %v5700_v9 }
 0x305   : > { %v1966_v62 = vadd.f32 %v7538_v1, %v1750_v24  ;;  %v7543_v52 = vmov %v7538_v1  ;;  %v1962_v56 = vadd.f32 %v1866_v55, %v1746_v33  ;;  %v2300_v24 = vmul.f32 %v5235_v38, %v5735_v17 }
 0x306   : > { %v2129_v37 = vsel %vm1501_vm1, %v7540_v25, %v7539_v30  ;;  %v7541_v6 = vmov %v7540_v25  ;;  %v4054_v4 = vpop.eup %4053  ;;  %v1869_v10 = vsel %vm1252_vm0, %v1866_v55, %v7543_v52  ;;  %v2302_v30 = vmul.f32 %v5235_v38, %v5702_v21  ;;  %v7544_v25 = vld [vmem:[#allocation79_spill] sm:$0xff] }
 0x307   : > { %v2125_v41 = vsel %vm1501_vm1, %v7542_v3, %v7541_v6  ;;  %v2246_v8 = vadd.f32 %v2129_v37, %v1966_v62  ;;  %v4056_v58 = vpop.eup %4055  ;;  %v3023_v11 = vadd.f32 1.0, %v4054_v4  ;;  %v1964_v1 = vadd.f32 %v1869_v10, %v1748_v7  ;;  %v5985_v55 = vld [vmem:[#allocation10 + $0x10] ss:$0 sm:$0xff] }
 0x308   : > { %v2398_v6 = vmul.f32 %v7544_v25, %v5735_v17  ;;  %v4058_v9 = vpop.eup %4057  ;;  %v3025_v3 = vadd.f32 1.0, %v4056_v58  ;;  %v7545_v26 = vrot.slane %v5528_v44, 2  ;;  %v2400_v33 = vmul.f32 %v7544_v25, %v5755_v36 }
 0x309   : > { %v2618_v62 = vmul.f32 %v5985_v55, %v5862_v23  ;;  %v4060_v7 = vpop.eup %4059  ;;  %v3071_v37 = vmul.f32 %v3023_v11, %v2879_v20  ;;  %v3022_v4 = vadd.f32 1.0, %v4058_v9  ;;  %v2244_v21 = vadd.f32 %v2125_v41, %v1964_v1 }
 0x30a   : > { %v2242_v29 = vadd.f32 %v7545_v26, %v1962_v56  ;;  %v2350_v52 = vadd.f32 %v2302_v30, %v2246_v8  ;;  %v4062_v10 = vpop.eup %4061  ;;  %v3073_v5 = vmul.f32 %v3025_v3, %v2881_v63  ;;  %v3024_v51 = vadd.f32 1.0, %v4060_v7 }
 0x30b   : > { %v2466_v35 = vrot.slane %v2398_v6, 1  ;;  %v4064_v44 = vpop.eup %4063  ;;  %v3027_v56 = vadd.f32 1.0, %v4062_v10  ;;  %v3170_v26 = vrot.slane %v3071_v37, 7  ;;  %v3070_v47 = vmul.f32 %v3022_v4, %v5907_v50  ;;  %v5999_v6 = vld [vmem:[#allocation4 + $0x148] sm:$0x80] }
 0x30c   : > { %v2346_v58 = vadd.f32 %v2298_v54, %v2242_v29  ;;  %v2348_v60 = vadd.f32 %v2300_v24, %v2244_v21  ;;  %v3171_v40 = vrot.slane %v3073_v5, 7  ;;  %v3026_v0 = vadd.f32 1.0, %v4064_v44 }
 0x30d   : > { %v3072_v23 = vmul.f32 %v3024_v51, %v5909_v28  ;;  %v2468_v48 = vrot.slane %v2400_v33, 1  ;;  %v3075_v20 = vmul.f32 %v3027_v56, %v2883_v57  ;;  %v3167_v11 = vrot.slane %v3070_v47, 7  ;;  %v6007_v33 = vld [vmem:[#allocation4 + $0x168] sm:$0x7f] }
 0x30e   : > { %v2562_v41 = vadd.f32 %v2466_v35, %v2346_v58  ;;  %v2620_v63 = vmul.f32 %v5985_v55, %v5755_v36  ;;  %v3172_v29 = vsel %vm3166_vm2, %v3170_v26, %v3171_v40  ;;  %v3074_v54 = vmul.f32 %v3026_v0, %v5912_v46  ;;  %v4132_v46 = vld [vmem:[#allocation4 + $0xd8] sm:$0xff] }
 0x30f   : > { %v3168_v8 = vrot.slane %v3072_v23, 7  ;;  %v2469_v1 = vsel %vm1252_vm0, %v2466_v35, %v2468_v48  ;;  %v3175_v50 = vrot.slane %v3075_v20, 7  ;;  %v2566_v5 = vadd.f32 %v2468_v48, %v2350_v52  ;;  %v6017_v26 = vld [vmem:[#allocation4 + $0x158] sm:$0xff] }
 0x310   : > { %v2564_v24 = vadd.f32 %v2469_v1, %v2348_v60  ;;  %v2622_v28 = vmul.f32 %v5985_v55, %v5892_v45  ;;  %v3173_v47 = vrot.slane %v3074_v54, 7  ;;  %v2722_v51 = vrot.slane %v2618_v62, 2 }
 0x311   : > { %v3169_v57 = vsel %vm3166_vm2, %v3167_v11, %v3168_v8  ;;  %v2724_v30 = vrot.slane %v2620_v63, 2  ;;  %v3176_v36 = vsel %vm3166_vm2, %v3171_v40, %v3175_v50  ;;  %v1105_v0 = vmul.f32 %v4132_v46, %v7432_v61  ;;  %v6025_v63 = vld [vmem:[#allocation4 + $0x158] sm:$0xfe]  ;;  %v7547_v50 = vld [vmem:[#allocation98_spill] sm:$0xff] }
 0x312   : > { %v2728_v9 = vrot.slane %v2622_v28, 2  ;;  %v1115_v60 = vmul.f32 %v7432_v61, %v5999_v6  ;;  %v3280_v48 = vpack.c.bf16 %v3176_v36, %v3172_v29  ;;  %v3174_v35 = vsel %vm3166_vm2, %v3168_v8, %v3173_v47  ;;  %v6030_v8 = vld [vmem:[#allocation4 + $0x178] sm:$0x1]  ;;  %v7552_v36 = vld [vmem:[#allocation94_spill] sm:$0xff] }
 0x313   : > { %v2725_v45 = vsel %vm1501_vm1, %v2722_v51, %v2724_v30  ;;  %v2842_v3 = vadd.f32 %v2722_v51, %v2562_v41  ;;  %v3279_v62 = vpack.c.bf16 %v3174_v35, %v3169_v57  ;;  %v1119_v40 = vmul.f32 %v7432_v61, %v6007_v33  ;;  %v6023_v41 = vld [vmem:[#allocation4 + $0x168] sm:$0xff]  ;;  %v7550_v51 = vld [vmem:[#allocation95_spill] sm:$0xff]  ;;  %v7554_v35 = vld [vmem:[#allocation100_spill] sm:$0xff] }
 0x314   : > { %v2729_v7 = vsel %vm1501_vm1, %v2724_v30, %v2728_v9  ;;  %v2844_v37 = vadd.f32 %v2725_v45, %v2564_v24  ;;  %3462 = vmatprep.mubr.bf16.mxu1 %v3280_v48  ;;  %v1153_v10 = vadd.f32 %v1105_v0, %v4870_v31  ;;  %v1163_v23 = vadd.f32 %v1115_v60, %v4870_v31 }
 0x315   : > { %v2846_v21 = vadd.f32 %v2729_v7, %v2566_v5  ;;  %v2938_v52 = vmul.f32 0.70710677, %v2842_v3  ;;  %3463 = vmatmul.mubr.bf16.vlgmr.msra.gmra.mrb[0].mxu1 %v3279_v62  ;;  %v6015_v44 = vmul.f32 0.5, %v2842_v3  ;;  %v7546_v20 = vpack.c.bf16 %v5583_v53, %v5580_v34  ;;  %v7555_v3 = vld [vmem:[#allocation99_spill] sm:$0xff] }
 0x316   : > { %v2940_v56 = vmul.f32 0.70710677, %v2844_v37  ;;  %v1167_v29 = vadd.f32 %v1119_v40, %v4870_v31  ;;  %v1209_v54 = vmul.f32 %v7434_v14, %v6017_v26  ;;  %v1211_v1 = vmul.f32 %v7434_v14, %v6023_v41 }
 0x317   : > { %3470 = vmatprep.mubr.bf16.mxu1 %v7546_v20  ;;  %v2942_v11 = vmul.f32 0.70710677, %v2846_v21  ;;  %4065 = verf.f32 %v2938_v52  ;;  %v1370_v34 = vadd.f32 %v7547_v50, %v1153_v10  ;;  %v1436_v53 = vmul.f32 %v4837_v18, %v6025_v63  ;;  %v7557_v52 = vld [vmem:[#allocation85_spill] sm:$0xff] }
 0x318   : > { %4067 = verf.f32 %v2940_v56  ;;  %v1284_v24 = vrot.slane %v1209_v54, 1  ;;  %v6039_v5 = vmul.f32 %v4837_v18, %v6023_v41  ;;  %v6043_v28 = vmul.f32 %v4837_v18, %v6030_v8  ;;  %v7558_v10 = vld [vmem:[#allocation41_spill] sm:$0xff]  ;;  %v7563_v54 = vld [vmem:[#allocation52_spill] sm:$0xff] }
 0x319   : > { %4069 = verf.f32 %v2942_v11  ;;  %v2892_v57 = vmul.f32 0.5, %v2844_v37  ;;  %v1287_v47 = vrot.slane %v1211_v1, 1  ;;  %v7551_v30 = vrot.slane %v7550_v51, 2  ;;  %v7565_v50 = vld [vmem:[#allocation101_spill] sm:$0xff]  ;;  %v7568_v51 = vld [vmem:[#allocation42_spill] sm:$0xff] }
 0x31a   : > { %7548 = vst [vmem:[#allocation34_spill] sm:$0xff] %v6039_v5  ;;  %7549 = vst [vmem:[#allocation43_spill] sm:$0xff] %v6043_v28  ;;  %v7553_v9 = vrot.slane %v7552_v36, 2  ;;  %v1553_v0 = vrot.slane %v1436_v53, 2  ;;  %v1380_v60 = vadd.f32 %v1284_v24, %v1163_v23  ;;  %v7251_v48 = vrot.slane %v6039_v5, 2 }
 0x31b   : > { %v1651_v45 = vadd.f32 %v7554_v35, %v1370_v34  ;;  %v2894_v7 = vmul.f32 0.5, %v2846_v21  ;;  %v6053_v40 = vadd.f32 %v1287_v47, %v1167_v29  ;;  %v1707_v56 = vmul.f32 %v7558_v10, %v7557_v52  ;;  %v7562_v29 = vld [vmem:[#allocation115_spill] sm:$0xff]  ;;  %v7566_v34 = vld [vmem:[#allocation110_spill] sm:$0xff] }
 0x31c   : > { %v1541_v46 = vsel %vm1501_vm1, %v7553_v9, %v7551_v30  ;;  %v6059_v20 = vsel %vm1252_vm0, %v1284_v24, %v1287_v47  ;;  %v6064_v23 = vsel %vm1501_vm1, %v1553_v0, %v7251_v48  ;;  %v6066_v11 = vadd.f32 %v1553_v0, %v1380_v60  ;;  %v7567_v24 = vld [vmem:[#allocation112_spill] sm:$0xff]  ;;  %v7578_v48 = vld [vmem:[#allocation45_spill] sm:$0xff] }
 0x31d   : > { %v1653_v62 = vadd.f32 %v1541_v46, %v7555_v3  ;;  %7556 = vst [vmem:[#allocation44_spill] sm:$0xff] %v6053_v40  ;;  %7559 = vst [vmem:[#allocation77_spill] sm:$0xff] %v6059_v20  ;;  %v6070_v21 = vmul.f32 %v7558_v10, %v5999_v6  ;;  %v7564_v1 = vpack.c.bf16 %v7562_v29, %v7563_v54  ;;  %v7570_v60 = vld [vmem:[#allocation48_spill] sm:$0xff] }
 0x31e   : > { %7560 = vst [vmem:[#allocation78_spill] sm:$0xff] %v6064_v23  ;;  %7561 = vst [vmem:[#allocation46_spill] sm:$0xff] %v6066_v11  ;;  %v1753_v53 = vadd.f32 %v7566_v34, %v7565_v50  ;;  %v1803_v30 = vmul.f32 %v7568_v51, %v7557_v52  ;;  %v6082_v36 = vmul.f32 %v7568_v51, %v6023_v41  ;;  %v7571_v52 = vld [vmem:[#allocation111_spill] sm:$0xff]  ;;  %v7575_v50 = vld [vmem:[#allocation113_spill] sm:$0xff] }
 0x31f   : > { %3471 = vmatmul.mubr.bf16.gmra.mrb[4].mxu1 %v7564_v1  ;;  %v1757_v47 = vadd.f32 %v7567_v24, %v1653_v62  ;;  %v7569_v9 = vpack.c.bf16 %v5851_v15, %v5832_v42  ;;  %v6089_v46 = vmul.f32 %v7558_v10, %v6007_v33  ;;  %v1755_v0 = vadd.f32 %v1707_v56, %v1651_v45  ;;  %v7573_v15 = vld [vmem:[#allocation114_spill] sm:$0xff] }
 0x320   : > { %v6093_v35 = vmul.f32 %v7570_v60, %v6025_v63  ;;  %v6097_v3 = vmul.f32 %v7570_v60, %v6023_v41  ;;  %v1873_v62 = vrot.slane %v1803_v30, 1  ;;  %v7572_v29 = vrot.slane %v7571_v52, 1 }
 0x321   : > { %3478 = vmatprep.mubr.bf16.mxu1 %v7569_v9  ;;  %v6103_v42 = vmul.f32 %v7570_v60, %v6030_v8  ;;  %v7574_v1 = vrot.slane %v7573_v15, 2  ;;  %v7576_v45 = vrot.slane %v7575_v50, 2  ;;  %v4066_v34 = vpop.eup %4065  ;;  %v7579_v30 = vrot.slane %v7578_v48, 2 }
 0x322   : > { %v1973_v54 = vadd.f32 %v7572_v29, %v1757_v47  ;;  %v7580_v29 = vld [vmem:[#allocation56_spill] sm:$0xff]  ;;  %v4068_v58 = vpop.eup %4067  ;;  %v3034_v15 = vadd.f32 1.0, %v4066_v34  ;;  %v7581_v11 = vrot.slane %v7571_v52, 1  ;;  %v7582_v34 = vrot.slane %v7578_v48, 2  ;;  %v7583_v52 = vld [vmem:[#allocation57_spill] sm:$0xff] }
 0x323   : > { %v2141_v56 = vsel %vm1501_vm1, %v7576_v45, %v7574_v1  ;;  %v7577_v9 = vmov %v7576_v45  ;;  %v2305_v4 = vmul.f32 %v7580_v29, %v5999_v6  ;;  %v1969_v45 = vadd.f32 %v1873_v62, %v1753_v53  ;;  %v4070_v24 = vpop.eup %4069 }
 0x324   : > { %v2137_v37 = vsel %vm1501_vm1, %v7579_v30, %v7577_v9  ;;  %v1877_v1 = vsel %vm1252_vm0, %v1873_v62, %v7581_v11  ;;  %v2253_v40 = vadd.f32 %v2141_v56, %v1973_v54  ;;  %v3036_v23 = vadd.f32 1.0, %v4068_v58 }
 0x325   : > { %v1971_v50 = vadd.f32 %v1877_v1, %v1755_v0  ;;  %v2307_v5 = vmul.f32 %v7580_v29, %v6017_v26  ;;  %v2309_v9 = vmul.f32 %v7580_v29, %v6007_v33  ;;  %v3038_v30 = vadd.f32 1.0, %v4070_v24 }
 0x326   : > { %v3082_v6 = vmul.f32 %v3034_v15, %v6015_v44  ;;  %v2249_v47 = vadd.f32 %v7582_v34, %v1969_v45  ;;  %v2403_v11 = vmul.f32 %v7583_v52, %v6017_v26  ;;  %v3084_v53 = vmul.f32 %v3036_v23, %v2892_v57  ;;  %v6133_v44 = vld [vmem:[#allocation10 + $0x18] ss:$0 sm:$0xff]  ;;  %v6146_v34 = vld [vmem:[#allocation4 + $0x150] sm:$0xff] }
 0x327   : > { %v2251_v62 = vadd.f32 %v2137_v37, %v1971_v50  ;;  %v2357_v54 = vadd.f32 %v2309_v9, %v2253_v40  ;;  %v2405_v58 = vmul.f32 %v7583_v52, %v6023_v41  ;;  %v3086_v0 = vmul.f32 %v3038_v30, %v2894_v7 }
 0x328   : > { %v3187_v56 = vrot.slane %v3082_v6, 7  ;;  %v2353_v1 = vadd.f32 %v2305_v4, %v2249_v47  ;;  %v2473_v28 = vrot.slane %v2403_v11, 1  ;;  %v3188_v33 = vrot.slane %v3084_v53, 7  ;;  %v7584_v11 = vld [vmem:[#allocation30_spill] sm:$0xff] }
 0x329   : > { %v2355_v24 = vadd.f32 %v2307_v5, %v2251_v62  ;;  %v2476_v20 = vrot.slane %v2405_v58, 1  ;;  %v2625_v48 = vmul.f32 %v6133_v44, %v6025_v63  ;;  %v3193_v15 = vrot.slane %v3086_v0, 7  ;;  %v6144_v63 = vld [vmem:[#allocation4 + $0x140] sm:$0x80] }
 0x32a   : > { %v2569_v45 = vadd.f32 %v2473_v28, %v2353_v1  ;;  %v2627_v57 = vmul.f32 %v6133_v44, %v6023_v41  ;;  %v2629_v40 = vmul.f32 %v6133_v44, %v6030_v8  ;;  %v3189_v7 = vsel %vm3166_vm2, %v3187_v56, %v3188_v33  ;;  %v6148_v41 = vld [vmem:[#allocation4 + $0x160] sm:$0x7f]  ;;  %v4134_v8 = vld [vmem:[#allocation4 + $0xd0] sm:$0xff] }
 0x32b   : > { %v2477_v4 = vsel %vm1252_vm0, %v2473_v28, %v2476_v20  ;;  %v2573_v37 = vadd.f32 %v2476_v20, %v2357_v54  ;;  %v2733_v5 = vrot.slane %v2625_v48, 2  ;;  %v3194_v23 = vsel %vm3166_vm2, %v3188_v33, %v3193_v15  ;;  %v7585_v58 = vld [vmem:[#allocation37_spill] sm:$0xff]  ;;  %v7586_v15 = vld [vmem:[#allocation32_spill] sm:$0xff] }
 0x32c   : > { %v2571_v47 = vadd.f32 %v2477_v4, %v2355_v24  ;;  %v2736_v50 = vrot.slane %v2627_v57, 2  ;;  %v2740_v9 = vrot.slane %v2629_v40, 2  ;;  %v3283_v30 = vpack.c.bf16 %v3194_v23, %v3189_v7  ;;  %v6160_v48 = vld [vmem:[#allocation4 + $0x160] sm:$0xff] }
 0x32d   : > { %v2849_v6 = vadd.f32 %v2733_v5, %v2569_v45  ;;  %v1104_v53 = vmul.f32 %v4134_v8, %v7584_v11  ;;  %v1114_v28 = vmul.f32 %v7584_v11, %v6144_v63  ;;  %v1118_v54 = vmul.f32 %v7584_v11, %v6148_v41  ;;  %v7587_v8 = vld [vmem:[#allocation104_spill] sm:$0xff] }
 0x32e   : > { %v2737_v20 = vsel %vm1501_vm1, %v2733_v5, %v2736_v50  ;;  %v2741_v62 = vsel %vm1501_vm1, %v2736_v50, %v2740_v9  ;;  %v1208_v0 = vmul.f32 %v7585_v58, %v6146_v34  ;;  %3479 = vmatmul.mubr.bf16.gmra.mrb[8].mxu1 %v3283_v30  ;;  %v1210_v7 = vmul.f32 %v7585_v58, %v6160_v48 }
 0x32f   : > { %v2851_v1 = vadd.f32 %v2737_v20, %v2571_v47  ;;  %v2853_v33 = vadd.f32 %v2741_v62, %v2573_v37  ;;  %v2945_v24 = vmul.f32 0.70710677, %v2849_v6  ;;  %v1152_v45 = vadd.f32 %v1104_v53, %v7586_v15  ;;  %v1030_v47 = vld [vmem:[#allocation4 + $0x150] sm:$0xfe]  ;;  %v6168_v37 = vld [vmem:[#allocation4 + $0x170] sm:$0x1] }
 0x330   : > { %v1162_v57 = vadd.f32 %v1114_v28, %v7586_v15  ;;  %v1166_v40 = vadd.f32 %v1118_v54, %v7586_v15  ;;  %v2897_v5 = vmul.f32 0.5, %v2849_v6  ;;  %v1283_v9 = vrot.slane %v1208_v0, 1 }
 0x331   : > { %v2947_v23 = vmul.f32 0.70710677, %v2851_v1  ;;  %v2949_v50 = vmul.f32 0.70710677, %v2853_v33  ;;  %4071 = verf.f32 %v2945_v24  ;;  %v1285_v30 = vrot.slane %v1210_v7, 1  ;;  %v7591_v7 = vld [vmem:[#allocation103_spill] sm:$0xff] }
 0x332   : > { %v1369_v53 = vadd.f32 %v7587_v8, %v1152_v45  ;;  %v1435_v28 = vmul.f32 %v7409_v49, %v1030_v47  ;;  %v6174_v20 = vmul.f32 %v7409_v49, %v6160_v48  ;;  %v6178_v6 = vmul.f32 %v7409_v49, %v6168_v37  ;;  %v7593_v45 = vld [vmem:[#allocation102_spill] sm:$0xff] }
 0x333   : > { %4073 = verf.f32 %v2947_v23  ;;  %v2899_v62 = vmul.f32 0.5, %v2851_v1  ;;  %v1379_v54 = vadd.f32 %v1283_v9, %v1162_v57  ;;  %v6180_v24 = vadd.f32 %v1285_v30, %v1166_v40  ;;  %v7596_v49 = vld [vmem:[#allocation106_spill] sm:$0xff]  ;;  %v7597_v1 = vld [vmem:[#allocation105_spill] sm:$0xff] }
 0x334   : > { %7588 = vst [vmem:[#allocation53_spill] sm:$0xff] %v6174_v20  ;;  %7589 = vst [vmem:[#allocation81_spill] sm:$0xff] %v6178_v6  ;;  %4075 = verf.f32 %v2949_v50  ;;  %v2901_v0 = vmul.f32 0.5, %v2853_v33  ;;  %v7592_v56 = vrot.slane %v7591_v7, 2  ;;  %v7594_v23 = vrot.slane %v7593_v45, 2 }
 0x335   : > { %7590 = vst [vmem:[#allocation82_spill] sm:$0xff] %v6180_v24  ;;  %v1552_v4 = vrot.slane %v1435_v28, 2  ;;  %v7257_v22 = vrot.slane %v6174_v20, 2  ;;  %v6189_v2 = vsel %vm1252_vm0, %v1283_v9, %v1285_v30  ;;  %v1650_v58 = vadd.f32 %v7596_v49, %v1369_v53  ;;  %v7600_v30 = vld [vmem:[#allocation107_spill] sm:$0xff] }
 0x336   : > { %v1539_v8 = vsel %vm1501_vm1, %v7594_v23, %v7592_v56  ;;  %7595 = vst [vmem:[#allocation86_spill] sm:$0xff] %v6189_v2  ;;  %v1706_v57 = vmul.f32 %v5212_v12, %v5735_v17  ;;  %v6205_v9 = vmul.f32 %v5212_v12, %v6144_v63  ;;  %v1752_v49 = vadd.f32 %v5929_v16, %v7600_v30 }
 0x337   : > { %v1652_v50 = vadd.f32 %v1539_v8, %v7597_v1  ;;  %v6198_v33 = vsel %vm1501_vm1, %v1552_v4, %v7257_v22  ;;  %v6201_v40 = vadd.f32 %v1552_v4, %v1379_v54  ;;  %v1802_v28 = vmul.f32 %v5217_v19, %v5735_v17 }
 0x338   : > { %7598 = vst [vmem:[#allocation51_spill] sm:$0xff] %v6198_v33  ;;  %v6214_v7 = vmul.f32 %v5217_v19, %v6160_v48  ;;  %v6218_v4 = vmul.f32 %v5212_v12, %v6148_v41  ;;  %v1754_v54 = vadd.f32 %v1706_v57, %v1650_v58  ;;  %v6221_v45 = vmul.f32 %v7420_v43, %v1030_v47 }
 0x339   : > { %7599 = vst [vmem:[#allocation50_spill] sm:$0xff] %v6201_v40  ;;  %v1756_v53 = vadd.f32 %v5942_v32, %v1652_v50  ;;  %v6225_v16 = vmul.f32 %v7420_v43, %v6160_v48  ;;  %v1872_v32 = vrot.slane %v1802_v28, 1  ;;  %v7602_v23 = vrot.slane %v5938_v27, 1 }
 0x33a   : > { %7601 = vst [vmem:[#allocation55_spill] sm:$0xff] %v6221_v45  ;;  %v6231_v8 = vmul.f32 %v7420_v43, %v6168_v37  ;;  %v7603_v1 = vrot.slane %v5956_v39, 2  ;;  %v7604_v50 = vrot.slane %v5950_v13, 2  ;;  %v7606_v22 = vrot.slane %v5946_v59, 2 }
 0x33b   : > { %v1972_v17 = vadd.f32 %v7602_v23, %v1756_v53  ;;  %v2304_v23 = vmul.f32 %v5235_v38, %v6144_v63  ;;  %v4072_v56 = vpop.eup %4071  ;;  %v7607_v39 = vrot.slane %v5938_v27, 1  ;;  %v1968_v24 = vadd.f32 %v1872_v32, %v1752_v49 }
 0x33c   : > { %v2139_v58 = vsel %vm1501_vm1, %v7604_v50, %v7603_v1  ;;  %v7605_v30 = vmov %v7604_v50  ;;  %v2306_v50 = vmul.f32 %v5235_v38, %v6146_v34  ;;  %v3041_v57 = vadd.f32 1.0, %v4072_v56 }
 0x33d   : > { %v2135_v28 = vsel %vm1501_vm1, %v7606_v22, %v7605_v30  ;;  %v1875_v40 = vsel %vm1252_vm0, %v1872_v32, %v7607_v39  ;;  %v2252_v1 = vadd.f32 %v2139_v58, %v1972_v17  ;;  %v4074_v13 = vpop.eup %4073  ;;  %v2308_v22 = vmul.f32 %v5235_v38, %v6148_v41 }
 0x33e   : > { %v1970_v33 = vadd.f32 %v1875_v40, %v1754_v54  ;;  %v2402_v30 = vmul.f32 %v7544_v25, %v6146_v34  ;;  %v4076_v63 = vpop.eup %4075  ;;  %v3043_v53 = vadd.f32 1.0, %v4074_v13  ;;  %v7608_v27 = vrot.slane %v5946_v59, 2 }
 0x33f   : > { %v2404_v49 = vmul.f32 %v7544_v25, %v6160_v48  ;;  %v2624_v32 = vmul.f32 %v5985_v55, %v1030_v47  ;;  %v3045_v17 = vadd.f32 1.0, %v4076_v63  ;;  %v3089_v58 = vmul.f32 %v3041_v57, %v2897_v5  ;;  %v6269_v57 = vld [vmem:[#allocation4 + $0x1a8] sm:$0x7f] }
 0x340   : > { %v2248_v20 = vadd.f32 %v7608_v27, %v1968_v24  ;;  %v2250_v56 = vadd.f32 %v2135_v28, %v1970_v33  ;;  %v2356_v40 = vadd.f32 %v2308_v22, %v2252_v1  ;;  %v3091_v54 = vmul.f32 %v3043_v53, %v2899_v62  ;;  %v4135_v28 = vld [vmem:[#allocation4 + $0x118] sm:$0xff] }
 0x341   : > { %v2472_v41 = vrot.slane %v2402_v30, 1  ;;  %v2474_v6 = vrot.slane %v2404_v49, 1  ;;  %v3093_v2 = vmul.f32 %v3045_v17, %v2901_v0  ;;  %v3200_v38 = vrot.slane %v3089_v58, 7  ;;  %v6283_v17 = vld [vmem:[#allocation4 + $0x1a8] sm:$0xff] }
 0x342   : > { %v2352_v39 = vadd.f32 %v2304_v23, %v2248_v20  ;;  %v2354_v45 = vadd.f32 %v2306_v50, %v2250_v56  ;;  %v2626_v59 = vmul.f32 %v5985_v55, %v6160_v48  ;;  %v3201_v24 = vrot.slane %v3091_v54, 7  ;;  %v6266_v20 = vld [vmem:[#allocation4 + $0x188] sm:$0x80] }
 0x343   : > { %v2475_v13 = vsel %vm1252_vm0, %v2472_v41, %v2474_v6  ;;  %v2572_v25 = vadd.f32 %v2474_v6, %v2356_v40  ;;  %v3205_v47 = vrot.slane %v3093_v2, 7  ;;  %v2628_v5 = vmul.f32 %v5985_v55, %v6168_v37 }
 0x344   : > { %v2568_v27 = vadd.f32 %v2472_v41, %v2352_v39  ;;  %v2570_v63 = vadd.f32 %v2475_v13, %v2354_v45  ;;  %v2732_v62 = vrot.slane %v2624_v32, 2  ;;  %v3202_v0 = vsel %vm3166_vm2, %v3200_v38, %v3201_v24  ;;  %v6281_v32 = vld [vmem:[#allocation4 + $0x198] sm:$0xff] }
 0x345   : > { %v2734_v33 = vrot.slane %v2626_v59, 2  ;;  %v1111_v48 = vmul.f32 %v4135_v28, %v7432_v61  ;;  %v1121_v53 = vmul.f32 %v7432_v61, %v6266_v20  ;;  %v3206_v2 = vsel %vm3166_vm2, %v3201_v24, %v3205_v47  ;;  %v6292_v13 = vld [vmem:[#allocation4 + $0x198] sm:$0xfe]  ;;  %v6294_v47 = vld [vmem:[#allocation4 + $0x1b8] sm:$0x1] }
 0x346   : > { %v2738_v6 = vrot.slane %v2628_v5, 2  ;;  %v2848_v45 = vadd.f32 %v2732_v62, %v2568_v27  ;;  %v1125_v37 = vmul.f32 %v7432_v61, %v6269_v57  ;;  %v3286_v23 = vpack.c.bf16 %v3206_v2, %v3202_v0  ;;  %v7609_v5 = vld [vmem:[#allocation108_spill] sm:$0xff] }
 0x347   : > { %v2735_v38 = vsel %vm1501_vm1, %v2732_v62, %v2734_v33  ;;  %v1159_v50 = vadd.f32 %v1111_v48, %v4870_v31  ;;  %v1169_v58 = vadd.f32 %v1121_v53, %v4870_v31  ;;  %v1213_v54 = vmul.f32 %v7434_v14, %v6281_v32 }
 0x348   : > { %v2739_v22 = vsel %vm1501_vm1, %v2734_v33, %v2738_v6  ;;  %v2850_v30 = vadd.f32 %v2735_v38, %v2570_v63  ;;  %v2944_v49 = vmul.f32 0.70710677, %v2848_v45  ;;  %3486 = vmatprep.mubr.bf16.mxu1 %v3286_v23  ;;  %v1173_v40 = vadd.f32 %v1125_v37, %v4870_v31  ;;  %v7615_v23 = vld [vmem:[#allocation70_spill] sm:$0xff] }
 0x349   : > { %v2852_v56 = vadd.f32 %v2739_v22, %v2572_v25  ;;  %v1215_v39 = vmul.f32 %v7434_v14, %v6283_v17  ;;  %v2896_v59 = vmul.f32 0.5, %v2848_v45  ;;  %v1290_v63 = vrot.slane %v1213_v54, 1  ;;  %v7613_v45 = vld [vmem:[#allocation38_spill] sm:$0xff] }
 0x34a   : > { %v2946_v24 = vmul.f32 0.70710677, %v2850_v30  ;;  %4077 = verf.f32 %v2944_v49  ;;  %v1376_v62 = vadd.f32 %v7609_v5, %v1159_v50  ;;  %v1442_v0 = vmul.f32 %v4837_v18, %v6292_v13 }
 0x34b   : > { %v2948_v27 = vmul.f32 0.70710677, %v2852_v56  ;;  %v1293_v25 = vrot.slane %v1215_v39, 1  ;;  %v6301_v33 = vmul.f32 %v4837_v18, %v6283_v17  ;;  %v6305_v28 = vmul.f32 %v4837_v18, %v6294_v47  ;;  %v7618_v39 = vld [vmem:[#allocation49_spill] sm:$0xff] }
 0x34c   : > { %4079 = verf.f32 %v2946_v24  ;;  %v2898_v48 = vmul.f32 0.5, %v2850_v30  ;;  %v1386_v53 = vadd.f32 %v1290_v63, %v1169_v58  ;;  %v2900_v6 = vmul.f32 0.5, %v2852_v56  ;;  %v7619_v30 = vld [vmem:[#allocation29_spill] sm:$0xff] }
 0x34d   : > { %7610 = vst [vmem:[#allocation83_spill] sm:$0xff] %v6301_v33  ;;  %7611 = vst [vmem:[#allocation84_spill] sm:$0xff] %v6305_v28  ;;  %4081 = verf.f32 %v2948_v27  ;;  %v6307_v2 = vadd.f32 %v1293_v25, %v1173_v40  ;;  %v7614_v37 = vrot.slane %v7613_v45, 2  ;;  %v7616_v38 = vrot.slane %v7615_v23, 2 }
 0x34e   : > { %v1563_v22 = vrot.slane %v1442_v0, 2  ;;  %v7265_v49 = vrot.slane %v6301_v33, 2  ;;  %v6316_v54 = vsel %vm1252_vm0, %v1290_v63, %v1293_v25  ;;  %v1657_v24 = vadd.f32 %v7618_v39, %v1376_v62  ;;  %v7622_v25 = vld [vmem:[#allocation109_spill] sm:$0xff] }
 0x34f   : > { %7612 = vst [vmem:[#allocation87_spill] sm:$0xff] %v6307_v2  ;;  %v1551_v50 = vsel %vm1501_vm1, %v7616_v38, %v7614_v37  ;;  %7617 = vst [vmem:[#allocation47_spill] sm:$0xff] %v6316_v54  ;;  %v1713_v58 = vmul.f32 %v7558_v10, %v6017_v26  ;;  %v6332_v63 = vmul.f32 %v7558_v10, %v6266_v20 }
 0x350   : > { %v1659_v27 = vadd.f32 %v1551_v50, %v7619_v30  ;;  %v6325_v56 = vsel %vm1501_vm1, %v1563_v22, %v7265_v49  ;;  %v6328_v5 = vadd.f32 %v1563_v22, %v1386_v53  ;;  %v1759_v62 = vadd.f32 %v6070_v21, %v7622_v25 }
 0x351   : > { %7620 = vst [vmem:[#allocation60_spill] sm:$0xff] %v6325_v56  ;;  %v1807_v45 = vmul.f32 %v7568_v51, %v6017_v26  ;;  %v6341_v37 = vmul.f32 %v7568_v51, %v6283_v17  ;;  %v6345_v53 = vmul.f32 %v7558_v10, %v6269_v57  ;;  %v1761_v23 = vadd.f32 %v1713_v58, %v1657_v24 }
 0x352   : > { %7621 = vst [vmem:[#allocation61_spill] sm:$0xff] %v6328_v5  ;;  %v1763_v0 = vadd.f32 %v6089_v46, %v1659_v27  ;;  %v6349_v38 = vmul.f32 %v7570_v60, %v6292_v13  ;;  %v6353_v21 = vmul.f32 %v7570_v60, %v6283_v17  ;;  %v7623_v50 = vrot.slane %v6082_v36, 1 }
 0x353   : > { %v1879_v46 = vrot.slane %v1807_v45, 1  ;;  %v6359_v39 = vmul.f32 %v7570_v60, %v6294_v47  ;;  %v7624_v30 = vrot.slane %v6103_v42, 2  ;;  %v7625_v24 = vrot.slane %v6097_v3, 2 }
 0x354   : > { %v1979_v22 = vadd.f32 %v7623_v50, %v1763_v0  ;;  %v4078_v58 = vpop.eup %4077  ;;  %v7627_v45 = vrot.slane %v6093_v35, 2  ;;  %v2311_v50 = vmul.f32 %v7580_v29, %v6266_v20  ;;  %v7628_v42 = vrot.slane %v6082_v36, 1 }
 0x355   : > { %v2151_v27 = vsel %vm1501_vm1, %v7625_v24, %v7624_v30  ;;  %v7626_v49 = vmov %v7625_v24  ;;  %v3040_v1 = vadd.f32 1.0, %v4078_v58  ;;  %v1975_v30 = vadd.f32 %v1879_v46, %v1759_v62 }
 0x356   : > { %v2147_v40 = vsel %vm1501_vm1, %v7627_v45, %v7626_v49  ;;  %v1883_v41 = vsel %vm1252_vm0, %v1879_v46, %v7628_v42  ;;  %v2259_v24 = vadd.f32 %v2151_v27, %v1979_v22  ;;  %v4080_v5 = vpop.eup %4079  ;;  %v2313_v3 = vmul.f32 %v7580_v29, %v6281_v32 }
 0x357   : > { %v1977_v25 = vadd.f32 %v1883_v41, %v1761_v23  ;;  %v2315_v49 = vmul.f32 %v7580_v29, %v6269_v57  ;;  %v2407_v45 = vmul.f32 %v7583_v52, %v6281_v32  ;;  %v4082_v0 = vpop.eup %4081  ;;  %v3042_v20 = vadd.f32 1.0, %v4080_v5 }
 0x358   : > { %v3088_v58 = vmul.f32 %v3040_v1, %v2896_v59  ;;  %v7629_v36 = vrot.slane %v6093_v35, 2  ;;  %v2409_v62 = vmul.f32 %v7583_v52, %v6283_v17  ;;  %v3044_v46 = vadd.f32 1.0, %v4082_v0 }
 0x359   : > { %v2257_v41 = vadd.f32 %v2147_v40, %v1977_v25  ;;  %v2363_v23 = vadd.f32 %v2315_v49, %v2259_v24  ;;  %v2479_v22 = vrot.slane %v2407_v45, 1  ;;  %v3090_v27 = vmul.f32 %v3042_v20, %v2898_v48 }
 0x35a   : > { %v2255_v56 = vadd.f32 %v7629_v36, %v1975_v30  ;;  %v3197_v42 = vrot.slane %v3088_v58, 7  ;;  %v2482_v57 = vrot.slane %v2409_v62, 1  ;;  %v3092_v2 = vmul.f32 %v3044_v46, %v2900_v6 }
 0x35b   : > { %v2361_v33 = vadd.f32 %v2313_v3, %v2257_v41  ;;  %v2631_v5 = vmul.f32 %v6133_v44, %v6292_v13  ;;  %v2633_v35 = vmul.f32 %v6133_v44, %v6283_v17  ;;  %v3198_v1 = vrot.slane %v3090_v27, 7  ;;  %v6398_v13 = vld [vmem:[#allocation4 + $0x1a0] sm:$0x7f]  ;;  %v4136_v3 = vld [vmem:[#allocation4 + $0x110] sm:$0xff] }
 0x35c   : > { %v2359_v54 = vadd.f32 %v2311_v50, %v2255_v56  ;;  %v2483_v59 = vsel %vm1252_vm0, %v2479_v22, %v2482_v57  ;;  %v2579_v0 = vadd.f32 %v2482_v57, %v2363_v23  ;;  %v3203_v40 = vrot.slane %v3092_v2, 7  ;;  %v6395_v50 = vld [vmem:[#allocation4 + $0x180] sm:$0x80]  ;;  %v6410_v23 = vld [vmem:[#allocation4 + $0x190] sm:$0xff] }
 0x35d   : > { %v2577_v25 = vadd.f32 %v2483_v59, %v2361_v33  ;;  %v2635_v48 = vmul.f32 %v6133_v44, %v6294_v47  ;;  %v2743_v56 = vrot.slane %v2631_v5, 2  ;;  %v3199_v6 = vsel %vm3166_vm2, %v3197_v42, %v3198_v1  ;;  %v7630_v5 = vld [vmem:[#allocation37_spill] sm:$0xff]  ;;  %v7641_v59 = vld [vmem:[#allocation39_spill] sm:$0xff] }
 0x35e   : > { %v2575_v30 = vadd.f32 %v2479_v22, %v2359_v54  ;;  %v2746_v24 = vrot.slane %v2633_v35, 2  ;;  %v1110_v17 = vmul.f32 %v4136_v3, %v7584_v11  ;;  %v1120_v54 = vmul.f32 %v7584_v11, %v6395_v50  ;;  %v6412_v22 = vld [vmem:[#allocation4 + $0x1a0] sm:$0xff] }
 0x35f   : > { %v3204_v2 = vsel %vm3166_vm2, %v3198_v1, %v3203_v40  ;;  %v2750_v33 = vrot.slane %v2635_v48, 2  ;;  %v1124_v47 = vmul.f32 %v7584_v11, %v6398_v13  ;;  %v1212_v35 = vmul.f32 %v7630_v5, %v6410_v23 }
 0x360   : > { %v2855_v49 = vadd.f32 %v2743_v56, %v2575_v30  ;;  %v3285_v45 = vpack.c.bf16 %v3204_v2, %v3199_v6  ;;  %v2747_v58 = vsel %vm1501_vm1, %v2743_v56, %v2746_v24  ;;  %v1158_v36 = vadd.f32 %v1110_v17, %v7586_v15  ;;  %v6423_v56 = vld [vmem:[#allocation4 + $0x1b0] sm:$0x1] }
 0x361   : > { %v2751_v62 = vsel %vm1501_vm1, %v2746_v24, %v2750_v33  ;;  %v2857_v46 = vadd.f32 %v2747_v58, %v2577_v25  ;;  %v1168_v27 = vadd.f32 %v1120_v54, %v7586_v15  ;;  %v1172_v57 = vadd.f32 %v1124_v47, %v7586_v15  ;;  %v6421_v25 = vld [vmem:[#allocation4 + $0x190] sm:$0xfe] }
 0x362   : > { %v2951_v41 = vmul.f32 0.70710677, %v2855_v49  ;;  %3487 = vmatmul.mubr.bf16.gmra.mrb[12].mxu1 %v3285_v45  ;;  %v2859_v42 = vadd.f32 %v2751_v62, %v2579_v0  ;;  %v1214_v1 = vmul.f32 %v7630_v5, %v6412_v22  ;;  %v2903_v30 = vmul.f32 0.5, %v2855_v49  ;;  %v7631_v24 = vld [vmem:[#allocation35_spill] sm:$0xff]  ;;  %v7636_v62 = vld [vmem:[#allocation40_spill] sm:$0xff] }
 0x363   : > { %v2953_v40 = vmul.f32 0.70710677, %v2857_v46  ;;  %v1289_v6 = vrot.slane %v1212_v35, 1  ;;  %v1375_v3 = vadd.f32 %v7631_v24, %v1158_v36  ;;  %v7632_v17 = vld [vmem:[#allocation31_spill] sm:$0xff]  ;;  %v2905_v49 = vmul.f32 0.5, %v2857_v46  ;;  %v7642_v46 = vld [vmem:[#allocation36_spill] sm:$0xff] }
 0x364   : > { %4083 = verf.f32 %v2951_v41  ;;  %v2955_v48 = vmul.f32 0.70710677, %v2859_v42  ;;  %v1291_v0 = vrot.slane %v1214_v1, 1  ;;  %v1441_v54 = vmul.f32 %v7632_v17, %v6421_v25  ;;  %v7638_v41 = vld [vmem:[#allocation69_spill] sm:$0xff] }
 0x365   : > { %4085 = verf.f32 %v2953_v40  ;;  %v6430_v2 = vmul.f32 %v7632_v17, %v6412_v22  ;;  %v6434_v33 = vmul.f32 %v7632_v17, %v6423_v56  ;;  %v1385_v47 = vadd.f32 %v1289_v6, %v1168_v27 }
 0x366   : > { %4087 = verf.f32 %v2955_v48  ;;  %v6436_v45 = vadd.f32 %v1291_v0, %v1172_v57  ;;  %v2907_v58 = vmul.f32 0.5, %v2859_v42  ;;  %v7637_v36 = vrot.slane %v7636_v62, 2 }
 0x367   : > { %7633 = vst [vmem:[#allocation88_spill] sm:$0xff] %v6430_v2  ;;  %7634 = vst [vmem:[#allocation89_spill] sm:$0xff] %v6434_v33  ;;  %v7639_v35 = vrot.slane %v7638_v41, 2  ;;  %v1562_v40 = vrot.slane %v1441_v54, 2  ;;  %v7268_v24 = vrot.slane %v6430_v2, 2  ;;  %v6445_v20 = vsel %vm1252_vm0, %v1289_v6, %v1291_v0  ;;  %v7645_v0 = vld [vmem:[#allocation33_spill] sm:$0xff] }
 0x368   : > { %7635 = vst [vmem:[#allocation92_spill] sm:$0xff] %v6436_v45  ;;  %7640 = vst [vmem:[#allocation58_spill] sm:$0xff] %v6445_v20  ;;  %v1656_v28 = vadd.f32 %v7641_v59, %v1375_v3  ;;  %v1712_v27 = vmul.f32 %v5212_v12, %v6146_v34  ;;  %v6461_v6 = vmul.f32 %v5212_v12, %v6395_v50 }
 0x369   : > { %v1549_v1 = vsel %vm1501_vm1, %v7639_v35, %v7637_v36  ;;  %v6454_v42 = vsel %vm1501_vm1, %v1562_v40, %v7268_v24  ;;  %v6457_v54 = vadd.f32 %v1562_v40, %v1385_v47  ;;  %v1758_v59 = vadd.f32 %v6205_v9, %v7645_v0 }
 0x36a   : > { %v1658_v48 = vadd.f32 %v1549_v1, %v7642_v46  ;;  %7643 = vst [vmem:[#allocation59_spill] sm:$0xff] %v6454_v42  ;;  %v1806_v62 = vmul.f32 %v5217_v19, %v6146_v34  ;;  %v6470_v36 = vmul.f32 %v5217_v19, %v6412_v22  ;;  %v6474_v47 = vmul.f32 %v5212_v12, %v6398_v13 }
 0x36b   : > { %7644 = vst [vmem:[#allocation68_spill] sm:$0xff] %v6457_v54  ;;  %v1760_v41 = vadd.f32 %v1712_v27, %v1656_v28  ;;  %v6478_v35 = vmul.f32 %v7420_v43, %v6421_v25  ;;  %v6482_v9 = vmul.f32 %v7420_v43, %v6412_v22  ;;  %v7648_v1 = vrot.slane %v6214_v7, 1  ;;  %v7652_v54 = vld [vmem:[#allocation55_spill] sm:$0xff] }
 0x36c   : > { %v1762_v3 = vadd.f32 %v6218_v4, %v1658_v48  ;;  %7646 = vst [vmem:[#allocation90_spill] sm:$0xff] %v6470_v36  ;;  %v1878_v4 = vrot.slane %v1806_v62, 1  ;;  %v6488_v46 = vmul.f32 %v7420_v43, %v6423_v56  ;;  %v7649_v48 = vrot.slane %v6231_v8, 2 }
 0x36d   : > { %7647 = vst [vmem:[#allocation93_spill] sm:$0xff] %v6478_v35  ;;  %v7650_v28 = vrot.slane %v6225_v16, 2  ;;  %v7653_v62 = vrot.slane %v7652_v54, 2  ;;  %v7655_v8 = vrot.slane %v6214_v7, 1  ;;  %v7657_v7 = vrot.slane %v7652_v54, 2 }
 0x36e   : > { %v1978_v40 = vadd.f32 %v7648_v1, %v1762_v3  ;;  %v4084_v0 = vpop.eup %4083  ;;  %v7654_v1 = vld [vmem:[#allocation76_spill] sm:$0xff] }
 0x36f   : > { %v2149_v27 = vsel %vm1501_vm1, %v7650_v28, %v7649_v48  ;;  %v7651_v57 = vmov %v7650_v28  ;;  %v2310_v45 = vmul.f32 %v7654_v1, %v6395_v50  ;;  %v3047_v20 = vadd.f32 1.0, %v4084_v0  ;;  %v4086_v33 = vpop.eup %4085 }
 0x370   : > { %v2145_v42 = vsel %vm1501_vm1, %v7653_v62, %v7651_v57  ;;  %v1881_v2 = vsel %vm1252_vm0, %v1878_v4, %v7655_v8  ;;  %v1974_v48 = vadd.f32 %v1878_v4, %v1758_v59  ;;  %v2258_v28 = vadd.f32 %v2149_v27, %v1978_v40  ;;  %v7656_v62 = vld [vmem:[#allocation79_spill] sm:$0xff]  ;;  %v4088_v35 = vpop.eup %4087 }
 0x371   : > { %v1976_v24 = vadd.f32 %v1881_v2, %v1760_v41  ;;  %v2312_v16 = vmul.f32 %v7654_v1, %v6410_v23  ;;  %v2314_v57 = vmul.f32 %v7654_v1, %v6398_v13  ;;  %v2406_v3 = vmul.f32 %v7656_v62, %v6410_v23 }
 0x372   : > { %v3049_v50 = vadd.f32 1.0, %v4086_v33  ;;  %v3095_v0 = vmul.f32 %v3047_v20, %v2903_v30  ;;  %v2254_v36 = vadd.f32 %v7657_v7, %v1974_v48  ;;  %v2408_v59 = vmul.f32 %v7656_v62, %v6412_v22  ;;  %v6521_v30 = vld [vmem:[#allocation4 + $0x1c8] sm:$0x80] }
 0x373   : > { %v3051_v4 = vadd.f32 1.0, %v4088_v35  ;;  %v2256_v2 = vadd.f32 %v2145_v42, %v1976_v24  ;;  %v2362_v41 = vadd.f32 %v2314_v57, %v2258_v28  ;;  %v2478_v40 = vrot.slane %v2406_v3, 1  ;;  %v6524_v3 = vld [vmem:[#allocation4 + $0x1e8] sm:$0x7f] }
 0x374   : > { %v3097_v27 = vmul.f32 %v3049_v50, %v2905_v49  ;;  %v3210_v8 = vrot.slane %v3095_v0, 7  ;;  %v2358_v43 = vadd.f32 %v2310_v45, %v2254_v36  ;;  %v2480_v13 = vrot.slane %v2408_v59, 1  ;;  %v6534_v50 = vld [vmem:[#allocation4 + $0x1d8] sm:$0xff] }
 0x375   : > { %v3099_v1 = vmul.f32 %v3051_v4, %v2907_v58  ;;  %v2360_v19 = vadd.f32 %v2312_v16, %v2256_v2  ;;  %v2630_v33 = vmul.f32 %v5985_v55, %v6421_v25  ;;  %v2632_v20 = vmul.f32 %v5985_v55, %v6412_v22 }
 0x376   : > { %v3211_v54 = vrot.slane %v3097_v27, 7  ;;  %v2481_v35 = vsel %vm1252_vm0, %v2478_v40, %v2480_v13  ;;  %v2574_v24 = vadd.f32 %v2478_v40, %v2358_v43  ;;  %v2578_v42 = vadd.f32 %v2480_v13, %v2362_v41  ;;  %v6545_v40 = vld [vmem:[#allocation4 + $0x1d8] sm:$0xfe]  ;;  %v6547_v27 = vld [vmem:[#allocation4 + $0x1f8] sm:$0x1] }
 0x377   : > { %v3215_v49 = vrot.slane %v3099_v1, 7  ;;  %v2576_v45 = vadd.f32 %v2481_v35, %v2360_v19  ;;  %v2634_v58 = vmul.f32 %v5985_v55, %v6423_v56  ;;  %v2742_v36 = vrot.slane %v2630_v33, 2  ;;  %v6536_v19 = vld [vmem:[#allocation4 + $0x1e8] sm:$0xff] }
 0x378   : > { %v3212_v25 = vsel %vm3166_vm2, %v3210_v8, %v3211_v54  ;;  %v2744_v48 = vrot.slane %v2632_v20, 2  ;;  %v1117_v22 = vmul.f32 %v7432_v61, %v6017_v26  ;;  %v1127_v28 = vmul.f32 %v7432_v61, %v6521_v30 }
 0x379   : > { %v3216_v43 = vsel %vm3166_vm2, %v3211_v54, %v3215_v49  ;;  %v2748_v16 = vrot.slane %v2634_v58, 2  ;;  %v2854_v57 = vadd.f32 %v2742_v36, %v2574_v24  ;;  %v1131_v55 = vmul.f32 %v7432_v61, %v6524_v3 }
 0x37a   : > { %v3288_v56 = vpack.c.bf16 %v3216_v43, %v3212_v25  ;;  %v2745_v0 = vsel %vm1501_vm1, %v2742_v36, %v2744_v48  ;;  %v1165_v26 = vadd.f32 %v1117_v22, %v4870_v31  ;;  %v1175_v2 = vadd.f32 %v1127_v28, %v4870_v31 }
 0x37b   : > { %v2749_v7 = vsel %vm1501_vm1, %v2744_v48, %v2748_v16  ;;  %v2856_v59 = vadd.f32 %v2745_v0, %v2576_v45  ;;  %v2950_v4 = vmul.f32 0.70710677, %v2854_v57  ;;  %v1179_v8 = vadd.f32 %v1131_v55, %v4870_v31  ;;  %v7658_v45 = vld [vmem:[#allocation77_spill] sm:$0xff]  ;;  %v7662_v16 = vld [vmem:[#allocation43_spill] sm:$0xff]  ;;  %v7664_v55 = vld [vmem:[#allocation34_spill] sm:$0xff] }
 0x37c   : > { %3494 = vmatprep.mubr.bf16.mxu1 %v3288_v56  ;;  %v2858_v41 = vadd.f32 %v2749_v7, %v2578_v42  ;;  %v1217_v13 = vmul.f32 %v7434_v14, %v6534_v50  ;;  %v1219_v33 = vmul.f32 %v7434_v14, %v6536_v19  ;;  %v2902_v54 = vmul.f32 0.5, %v2854_v57 }
 0x37d   : > { %v2952_v35 = vmul.f32 0.70710677, %v2856_v59  ;;  %4089 = verf.f32 %v2950_v4  ;;  %v1382_v58 = vadd.f32 %v7658_v45, %v1165_v26  ;;  %v1448_v36 = vmul.f32 %v4837_v18, %v6545_v40 }
 0x37e   : > { %v2954_v24 = vmul.f32 0.70710677, %v2858_v41  ;;  %v1296_v49 = vrot.slane %v1217_v13, 1  ;;  %v1299_v42 = vrot.slane %v1219_v33, 1  ;;  %v6560_v25 = vmul.f32 %v4837_v18, %v6536_v19 }
 0x37f   : > { %4091 = verf.f32 %v2952_v35  ;;  %v6564_v14 = vmul.f32 %v4837_v18, %v6547_v27  ;;  %v2904_v48 = vmul.f32 0.5, %v2856_v59  ;;  %v2906_v43 = vmul.f32 0.5, %v2858_v41  ;;  %v7667_v18 = vld [vmem:[#allocation78_spill] sm:$0xff]  ;;  %v7668_v59 = vld [vmem:[#allocation44_spill] sm:$0xff] }
 0x380   : > { %7659 = vst [vmem:[#allocation63_spill] sm:$0xff] %v6560_v25  ;;  %4093 = verf.f32 %v2954_v24  ;;  %v1392_v22 = vadd.f32 %v1296_v49, %v1175_v2  ;;  %v6566_v28 = vadd.f32 %v1299_v42, %v1179_v8  ;;  %v7663_v57 = vrot.slane %v7662_v16, 2 }
 0x381   : > { %7660 = vst [vmem:[#allocation54_spill] sm:$0xff] %v6564_v14  ;;  %v7665_v56 = vrot.slane %v7664_v55, 2  ;;  %v1573_v26 = vrot.slane %v1448_v36, 2  ;;  %v7279_v7 = vrot.slane %v6560_v25, 2  ;;  %v6575_v4 = vsel %vm1252_vm0, %v1296_v49, %v1299_v42  ;;  %v7671_v49 = vld [vmem:[#allocation46_spill] sm:$0xff] }
 0x382   : > { %7661 = vst [vmem:[#allocation64_spill] sm:$0xff] %v6566_v28  ;;  %7666 = vst [vmem:[#allocation91_spill] sm:$0xff] %v6575_v4  ;;  %v1663_v13 = vadd.f32 %v7667_v18, %v1382_v58  ;;  %v1719_v2 = vmul.f32 %v7558_v10, %v6281_v32  ;;  %v6591_v24 = vmul.f32 %v7558_v10, %v6521_v30  ;;  %v7672_v55 = vrot.slane %v6341_v37, 1  ;;  %v6777_v14 = vld [vmem:[#allocation10 + $0x10] ss:$0 sm:$0xff] }
 0x383   : > { %v1561_v0 = vsel %vm1501_vm1, %v7665_v56, %v7663_v57  ;;  %v6584_v41 = vsel %vm1501_vm1, %v1573_v26, %v7279_v7  ;;  %v6587_v35 = vadd.f32 %v1573_v26, %v1392_v22  ;;  %v1765_v42 = vadd.f32 %v6332_v63, %v7671_v49 }
 0x384   : > { %v1665_v33 = vadd.f32 %v1561_v0, %v7668_v59  ;;  %7669 = vst [vmem:[#allocation80_spill] sm:$0xff] %v6584_v41  ;;  %v1811_v58 = vmul.f32 %v7568_v51, %v6281_v32  ;;  %v6600_v36 = vmul.f32 %v7568_v51, %v6536_v19  ;;  %v6604_v22 = vmul.f32 %v7558_v10, %v6524_v3 }
 0x385   : > { %7670 = vst [vmem:[#allocation96_spill] sm:$0xff] %v6587_v35  ;;  %v1767_v16 = vadd.f32 %v1719_v2, %v1663_v13  ;;  %v6608_v57 = vmul.f32 %v7570_v60, %v6545_v40  ;;  %v6612_v63 = vmul.f32 %v7570_v60, %v6536_v19  ;;  %v6618_v0 = vmul.f32 %v7570_v60, %v6547_v27 }
 0x386   : > { %v1769_v45 = vadd.f32 %v6345_v53, %v1665_v33  ;;  %v1885_v53 = vrot.slane %v1811_v58, 1  ;;  %v7673_v26 = vrot.slane %v6359_v39, 2  ;;  %v7674_v18 = vrot.slane %v6353_v21, 2 }
 0x387   : > { %v4090_v59 = vpop.eup %4089  ;;  %v7676_v49 = vrot.slane %v6349_v38, 2  ;;  %v7677_v39 = vrot.slane %v6341_v37, 1  ;;  %v2319_v21 = vmul.f32 %v7580_v29, %v6534_v50  ;;  %v7678_v37 = vrot.slane %v6349_v38, 2 }
 0x388   : > { %v1985_v56 = vadd.f32 %v7672_v55, %v1769_v45  ;;  %v2161_v13 = vsel %vm1501_vm1, %v7674_v18, %v7673_v26  ;;  %v7675_v2 = vmov %v7674_v18  ;;  %v2317_v55 = vmul.f32 %v7580_v29, %v6521_v30 }
 0x389   : > { %v2157_v58 = vsel %vm1501_vm1, %v7676_v49, %v7675_v2  ;;  %v3046_v7 = vadd.f32 1.0, %v4090_v59  ;;  %v1889_v8 = vsel %vm1252_vm0, %v1885_v53, %v7677_v39  ;;  %v1981_v26 = vadd.f32 %v1885_v53, %v1765_v42  ;;  %v4092_v1 = vpop.eup %4091 }
 0x38a   : > { %v2265_v18 = vadd.f32 %v2161_v13, %v1985_v56  ;;  %v1983_v33 = vadd.f32 %v1889_v8, %v1767_v16  ;;  %v2321_v2 = vmul.f32 %v7580_v29, %v6524_v3  ;;  %v2411_v49 = vmul.f32 %v7583_v52, %v6534_v50  ;;  %v4094_v45 = vpop.eup %4093 }
 0x38b   : > { %v3048_v30 = vadd.f32 1.0, %v4092_v1  ;;  %v3094_v59 = vmul.f32 %v3046_v7, %v2902_v54  ;;  %v2261_v20 = vadd.f32 %v7678_v37, %v1981_v26  ;;  %v2413_v42 = vmul.f32 %v7583_v52, %v6536_v19  ;;  %v6651_v54 = vld [vmem:[#allocation4 + $0x1c0] sm:$0x80]  ;;  %v6654_v26 = vld [vmem:[#allocation4 + $0x1e0] sm:$0x7f] }
 0x38c   : > { %v3050_v53 = vadd.f32 1.0, %v4094_v45  ;;  %v2263_v8 = vadd.f32 %v2157_v58, %v1983_v33  ;;  %v2369_v16 = vadd.f32 %v2321_v2, %v2265_v18  ;;  %v2485_v56 = vrot.slane %v2411_v49, 1  ;;  %v7700_v37 = vld [vmem:[#allocation93_spill] sm:$0xff] }
 0x38d   : > { %v3096_v13 = vmul.f32 %v3048_v30, %v2904_v48  ;;  %v3207_v39 = vrot.slane %v3094_v59, 7  ;;  %v2365_v41 = vadd.f32 %v2317_v55, %v2261_v20  ;;  %v2488_v3 = vrot.slane %v2413_v42, 1  ;;  %v6664_v30 = vld [vmem:[#allocation4 + $0x1d0] sm:$0xff] }
 0x38e   : > { %v3098_v35 = vmul.f32 %v3050_v53, %v2906_v43  ;;  %v2367_v4 = vadd.f32 %v2319_v21, %v2263_v8  ;;  %v2637_v1 = vmul.f32 %v6133_v44, %v6545_v40  ;;  %v2639_v38 = vmul.f32 %v6133_v44, %v6536_v19 }
 0x38f   : > { %v3208_v7 = vrot.slane %v3096_v13, 7  ;;  %v2489_v45 = vsel %vm1252_vm0, %v2485_v56, %v2488_v3  ;;  %v2581_v33 = vadd.f32 %v2485_v56, %v2365_v41  ;;  %v2585_v58 = vadd.f32 %v2488_v3, %v2369_v16  ;;  %v6675_v56 = vld [vmem:[#allocation4 + $0x1d0] sm:$0xfe]  ;;  %v6677_v13 = vld [vmem:[#allocation4 + $0x1f0] sm:$0x1] }
 0x390   : > { %v3213_v48 = vrot.slane %v3098_v35, 7  ;;  %v2583_v20 = vadd.f32 %v2489_v45, %v2367_v4  ;;  %v2641_v43 = vmul.f32 %v6133_v44, %v6547_v27  ;;  %v2753_v55 = vrot.slane %v2637_v1, 2  ;;  %v6666_v4 = vld [vmem:[#allocation4 + $0x1e0] sm:$0xff] }
 0x391   : > { %v3209_v40 = vsel %vm3166_vm2, %v3207_v39, %v3208_v7  ;;  %v2756_v18 = vrot.slane %v2639_v38, 2  ;;  %v1116_v19 = vmul.f32 %v7584_v11, %v6146_v34  ;;  %v1126_v21 = vmul.f32 %v7584_v11, %v6651_v54 }
 0x392   : > { %v3214_v41 = vsel %vm3166_vm2, %v3208_v7, %v3213_v48  ;;  %v2760_v2 = vrot.slane %v2641_v43, 2  ;;  %v2861_v49 = vadd.f32 %v2753_v55, %v2581_v33  ;;  %v1130_v44 = vmul.f32 %v7584_v11, %v6654_v26 }
 0x393   : > { %v3287_v27 = vpack.c.bf16 %v3214_v41, %v3209_v40  ;;  %v2757_v59 = vsel %vm1501_vm1, %v2753_v55, %v2756_v18  ;;  %v1164_v34 = vadd.f32 %v1116_v19, %v7586_v15  ;;  %v1174_v39 = vadd.f32 %v1126_v21, %v7586_v15 }
 0x394   : > { %v2761_v42 = vsel %vm1501_vm1, %v2756_v18, %v2760_v2  ;;  %v2863_v53 = vadd.f32 %v2757_v59, %v2583_v20  ;;  %v2957_v8 = vmul.f32 0.70710677, %v2861_v49  ;;  %v1216_v3 = vmul.f32 %v7630_v5, %v6664_v30  ;;  %v7679_v20 = vld [vmem:[#allocation86_spill] sm:$0xff]  ;;  %v7683_v2 = vld [vmem:[#allocation81_spill] sm:$0xff] }
 0x395   : > { %3495 = vmatmul.mubr.bf16.gmra.mrb[16].mxu1 %v3287_v27  ;;  %v2865_v16 = vadd.f32 %v2761_v42, %v2585_v58  ;;  %v1218_v1 = vmul.f32 %v7630_v5, %v6666_v4  ;;  %v2909_v38 = vmul.f32 0.5, %v2861_v49  ;;  %v1178_v45 = vadd.f32 %v1130_v44, %v7586_v15  ;;  %v7685_v44 = vld [vmem:[#allocation53_spill] sm:$0xff] }
 0x396   : > { %v2959_v7 = vmul.f32 0.70710677, %v2863_v53  ;;  %4095 = verf.f32 %v2957_v8  ;;  %v1295_v48 = vrot.slane %v1216_v3, 1  ;;  %v1381_v43 = vadd.f32 %v7679_v20, %v1164_v34 }
 0x397   : > { %v2961_v33 = vmul.f32 0.70710677, %v2865_v16  ;;  %v1297_v58 = vrot.slane %v1218_v1, 1  ;;  %v1447_v55 = vmul.f32 %v7632_v17, %v6675_v56  ;;  %v6690_v40 = vmul.f32 %v7632_v17, %v6666_v4 }
 0x398   : > { %4097 = verf.f32 %v2959_v7  ;;  %v6694_v5 = vmul.f32 %v7632_v17, %v6677_v13  ;;  %v2911_v18 = vmul.f32 0.5, %v2863_v53  ;;  %v2913_v19 = vmul.f32 0.5, %v2865_v16  ;;  %v7688_v17 = vld [vmem:[#allocation51_spill] sm:$0xff]  ;;  %v7689_v53 = vld [vmem:[#allocation82_spill] sm:$0xff] }
 0x399   : > { %7680 = vst [vmem:[#allocation62_spill] sm:$0xff] %v6690_v40  ;;  %4099 = verf.f32 %v2961_v33  ;;  %v1391_v21 = vadd.f32 %v1295_v48, %v1174_v39  ;;  %v6697_v41 = vsel %vm1252_vm0, %v1295_v48, %v1297_v58  ;;  %v7684_v49 = vrot.slane %v7683_v2, 2  ;;  %v7692_v48 = vld [vmem:[#allocation50_spill] sm:$0xff] }
 0x39a   : > { %7681 = vst [vmem:[#allocation67_spill] sm:$0xff] %v6694_v5  ;;  %7682 = vst [vmem:[#allocation66_spill] sm:$0xff] %v6697_v41  ;;  %v7686_v27 = vrot.slane %v7685_v44, 2  ;;  %v1572_v34 = vrot.slane %v1447_v55, 2  ;;  %v7280_v42 = vrot.slane %v6690_v40, 2  ;;  %v6705_v8 = vadd.f32 %v1297_v58, %v1178_v45  ;;  %v7694_v44 = vld [vmem:[#allocation73_spill] sm:$0xff] }
 0x39b   : > { %v1662_v3 = vadd.f32 %v7688_v17, %v1381_v43  ;;  %v1718_v39 = vmul.f32 %v5212_v12, %v6410_v23  ;;  %v6721_v45 = vmul.f32 %v5212_v12, %v6651_v54  ;;  %v1764_v58 = vadd.f32 %v6461_v6, %v7692_v48  ;;  %v7693_v43 = vld [vmem:[#allocation72_spill] sm:$0xff] }
 0x39c   : > { %v1559_v59 = vsel %vm1501_vm1, %v7686_v27, %v7684_v49  ;;  %7687 = vst [vmem:[#allocation97_spill] sm:$0xff] %v6705_v8  ;;  %v6714_v1 = vsel %vm1501_vm1, %v1572_v34, %v7280_v42  ;;  %v6717_v33 = vadd.f32 %v1572_v34, %v1391_v21  ;;  %v1810_v55 = vmul.f32 %v7693_v43, %v6410_v23 }
 0x39d   : > { %v1664_v16 = vadd.f32 %v1559_v59, %v7689_v53  ;;  %7690 = vst [vmem:[#allocation65_spill] sm:$0xff] %v6714_v1  ;;  %v6730_v2 = vmul.f32 %v7693_v43, %v6666_v4  ;;  %v6734_v21 = vmul.f32 %v5212_v12, %v6654_v26  ;;  %v1766_v49 = vadd.f32 %v1718_v39, %v1662_v3  ;;  %v7695_v59 = vld [vmem:[#allocation90_spill] sm:$0xff] }
 0x39e   : > { %7691 = vst [vmem:[#allocation74_spill] sm:$0xff] %v6717_v33  ;;  %v6738_v27 = vmul.f32 %v7694_v44, %v6675_v56  ;;  %v6742_v6 = vmul.f32 %v7694_v44, %v6666_v4  ;;  %v7696_v34 = vrot.slane %v7695_v59, 1  ;;  %v6748_v53 = vmul.f32 %v7694_v44, %v6677_v13 }
 0x39f   : > { %v1768_v20 = vadd.f32 %v6474_v47, %v1664_v16  ;;  %v1884_v47 = vrot.slane %v1810_v55, 1  ;;  %v7697_v16 = vrot.slane %v6488_v46, 2  ;;  %v7698_v3 = vrot.slane %v6482_v9, 2 }
 0x3a0   : > { %v4096_v48 = vpop.eup %4095  ;;  %v7701_v55 = vrot.slane %v7700_v37, 2  ;;  %v7703_v46 = vrot.slane %v7695_v59, 1  ;;  %v7704_v59 = vrot.slane %v7700_v37, 2  ;;  %v2638_v37 = vmul.f32 %v6777_v14, %v6666_v4 }
 0x3a1   : > { %v1984_v17 = vadd.f32 %v7696_v34, %v1768_v20  ;;  %v2159_v39 = vsel %vm1501_vm1, %v7698_v3, %v7697_v16  ;;  %v7699_v7 = vmov %v7698_v3  ;;  %v7702_v34 = vld [vmem:[#allocation76_spill] sm:$0xff]  ;;  %v3053_v1 = vadd.f32 1.0, %v4096_v48 }
 0x3a2   : > { %v2155_v35 = vsel %vm1501_vm1, %v7701_v55, %v7699_v7  ;;  %v2316_v33 = vmul.f32 %v7702_v34, %v6651_v54  ;;  %v1887_v8 = vsel %vm1252_vm0, %v1884_v47, %v7703_v46  ;;  %v1980_v16 = vadd.f32 %v1884_v47, %v1764_v58  ;;  %v4098_v41 = vpop.eup %4097 }
 0x3a3   : > { %v2264_v3 = vadd.f32 %v2159_v39, %v1984_v17  ;;  %v1982_v42 = vadd.f32 %v1887_v8, %v1766_v49  ;;  %v2318_v9 = vmul.f32 %v7702_v34, %v6664_v30  ;;  %v2320_v7 = vmul.f32 %v7702_v34, %v6654_v26  ;;  %v4100_v20 = vpop.eup %4099 }
 0x3a4   : > { %v2410_v55 = vmul.f32 %v7656_v62, %v6664_v30  ;;  %v3055_v54 = vadd.f32 1.0, %v4098_v41  ;;  %v3101_v48 = vmul.f32 %v3053_v1, %v2909_v38  ;;  %v2260_v40 = vadd.f32 %v7704_v59, %v1980_v16 }
 0x3a5   : > { %v2412_v58 = vmul.f32 %v7656_v62, %v6666_v4  ;;  %v3057_v47 = vadd.f32 1.0, %v4100_v20  ;;  %v2262_v8 = vadd.f32 %v2155_v35, %v1982_v42  ;;  %v2368_v49 = vadd.f32 %v2320_v7, %v2264_v3  ;;  %v7705_v3 = vld [vmem:[#allocation84_spill] sm:$0xff]  ;;  %v7707_v4 = vld [vmem:[#allocation83_spill] sm:$0xff] }
 0x3a6   : > { %v2484_v17 = vrot.slane %v2410_v55, 1  ;;  %v3103_v39 = vmul.f32 %v3055_v54, %v2911_v18  ;;  %v3220_v46 = vrot.slane %v3101_v48, 7  ;;  %v2364_v5 = vadd.f32 %v2316_v33, %v2260_v40  ;;  %v7709_v54 = vld [vmem:[#allocation87_spill] sm:$0xff] }
 0x3a7   : > { %v2486_v26 = vrot.slane %v2412_v58, 1  ;;  %v3105_v28 = vmul.f32 %v3057_v47, %v2913_v19  ;;  %v2366_v25 = vadd.f32 %v2318_v9, %v2262_v8  ;;  %v2636_v38 = vmul.f32 %v6777_v14, %v6675_v56  ;;  %v969_v47 = vld [vmem:[#allocation4 + $0x208] sm:$0x80]  ;;  %v973_v8 = vld [vmem:[#allocation4 + $0x228] sm:$0x7f] }
 0x3a8   : > { %v3221_v41 = vrot.slane %v3103_v39, 7  ;;  %v2580_v35 = vadd.f32 %v2484_v17, %v2364_v5  ;;  %v2640_v40 = vmul.f32 %v6777_v14, %v6677_v13  ;;  %v2754_v16 = vrot.slane %v2638_v37, 2  ;;  %v997_v37 = vld [vmem:[#allocation4 + $0x228] sm:$0xff] }
 0x3a9   : > { %v2487_v1 = vsel %vm1252_vm0, %v2484_v17, %v2486_v26  ;;  %v2584_v42 = vadd.f32 %v2486_v26, %v2368_v49  ;;  %v3225_v20 = vrot.slane %v3105_v28, 7  ;;  %v2752_v19 = vrot.slane %v2636_v38, 2 }
 0x3aa   : > { %v2582_v18 = vadd.f32 %v2487_v1, %v2366_v25  ;;  %v3222_v33 = vsel %vm3166_vm2, %v3220_v46, %v3221_v41  ;;  %v1123_v56 = vmul.f32 %v7432_v61, %v6281_v32  ;;  %v7706_v9 = vrot.slane %v7705_v3, 2  ;;  %v7710_v1 = vld [vmem:[#allocation47_spill] sm:$0xff] }
 0x3ab   : > { %v7708_v7 = vrot.slane %v7707_v4, 2  ;;  %v3226_v5 = vsel %vm3166_vm2, %v3221_v41, %v3225_v20  ;;  %v2758_v28 = vrot.slane %v2640_v40, 2  ;;  %v2860_v25 = vadd.f32 %v2752_v19, %v2580_v35  ;;  %v1049_v41 = vld [vmem:[#allocation4 + $0x218] sm:$0xfe]  ;;  %v1053_v4 = vld [vmem:[#allocation4 + $0x238] sm:$0x1] }
 0x3ac   : > { %v3290_v13 = vpack.c.bf16 %v3226_v5, %v3222_v33  ;;  %v2164_v59 = vrot.slane %v6742_v6, 2  ;;  %v2755_v58 = vsel %vm1501_vm1, %v2752_v19, %v2754_v16  ;;  %v1171_v32 = vadd.f32 %v1123_v56, %v4870_v31  ;;  %v7712_v56 = vld [vmem:[#allocation61_spill] sm:$0xff] }
 0x3ad   : > { %v1571_v55 = vsel %vm1501_vm1, %v7708_v7, %v7706_v9  ;;  %v2168_v49 = vrot.slane %v6748_v53, 2  ;;  %v2759_v17 = vsel %vm1501_vm1, %v2754_v16, %v2758_v28  ;;  %v2862_v39 = vadd.f32 %v2755_v58, %v2582_v18  ;;  %v7711_v16 = vld [vmem:[#allocation60_spill] sm:$0xff] }
 0x3ae   : > { %v1671_v48 = vadd.f32 %v1571_v55, %v7709_v54  ;;  %v2956_v46 = vmul.f32 0.70710677, %v2860_v25  ;;  %3502 = vmatprep.mubr.bf16.mxu1 %v3290_v13  ;;  %v2864_v26 = vadd.f32 %v2759_v17, %v2584_v42  ;;  %v6801_v38 = vmul.f32 0.5, %v2860_v25 }
 0x3af   : > { %v1388_v35 = vadd.f32 %v7710_v1, %v1171_v32  ;;  %v1725_v20 = vmul.f32 %v7558_v10, %v6534_v50  ;;  %v2958_v40 = vmul.f32 0.70710677, %v2862_v39  ;;  %v6807_v19 = vmul.f32 %v7558_v10, %v969_v47 }
 0x3b0   : > { %4101 = verf.f32 %v2956_v46  ;;  %v6810_v33 = vmul.f32 %v7558_v10, %v973_v8  ;;  %v2960_v18 = vmul.f32 0.70710677, %v2864_v26  ;;  %v1771_v3 = vadd.f32 %v6591_v24, %v7712_v56 }
 0x3b1   : > { %v1669_v42 = vadd.f32 %v7711_v16, %v1388_v35  ;;  %v1775_v9 = vadd.f32 %v6604_v22, %v1671_v48  ;;  %4103 = verf.f32 %v2958_v40  ;;  %v1815_v7 = vmul.f32 %v7568_v51, %v6534_v50  ;;  %v6844_v40 = vld [vmem:[#allocation4 + $0x218] sm:$0xff] }
 0x3b2   : > { %v6819_v55 = vmul.f32 %v7568_v51, %v997_v37  ;;  %v6822_v5 = vmul.f32 %v7570_v60, %v1049_v41  ;;  %v2910_v28 = vmul.f32 0.5, %v2862_v39  ;;  %4105 = verf.f32 %v2960_v18 }
 0x3b3   : > { %v1773_v25 = vadd.f32 %v1725_v20, %v1669_v42  ;;  %v7713_v54 = vrot.slane %v6600_v36, 1  ;;  %v2912_v24 = vmul.f32 0.5, %v2864_v26  ;;  %v1891_v58 = vrot.slane %v1815_v7, 1 }
 0x3b4   : > { %v6828_v48 = vmul.f32 %v7570_v60, %v997_v37  ;;  %v6831_v32 = vmul.f32 %v7570_v60, %v1053_v4  ;;  %v7714_v17 = vrot.slane %v6612_v63, 2  ;;  %v7715_v46 = vrot.slane %v6608_v57, 2 }
 0x3b5   : > { %v1991_v13 = vadd.f32 %v7713_v54, %v1775_v9  ;;  %v7716_v1 = vrot.slane %v6618_v0, 2  ;;  %v7718_v18 = vmov %v7713_v54  ;;  %v1987_v16 = vadd.f32 %v1891_v58, %v1771_v3 }
 0x3b6   : > { %v2167_v39 = vsel %vm1501_vm1, %v7715_v46, %v7714_v17  ;;  %v7717_v35 = vmov %v7714_v17  ;;  %v1895_v60 = vsel %vm1252_vm0, %v1891_v58, %v7718_v18  ;;  %v2323_v56 = vmul.f32 %v7580_v29, %v969_v47 }
 0x3b7   : > { %v2171_v26 = vsel %vm1501_vm1, %v7717_v35, %v7716_v1  ;;  %v1989_v9 = vadd.f32 %v1895_v60, %v1773_v25  ;;  %v2325_v0 = vmul.f32 %v7580_v29, %v6844_v40  ;;  %v2327_v63 = vmul.f32 %v7580_v29, %v973_v8 }
 0x3b8   : > { %v2271_v42 = vadd.f32 %v2171_v26, %v1991_v13  ;;  %v2415_v7 = vmul.f32 %v7583_v52, %v6844_v40  ;;  %v7719_v54 = vmov %v7715_v46  ;;  %v2417_v36 = vmul.f32 %v7583_v52, %v997_v37  ;;  %v6858_v46 = vld [vmem:[#allocation10 + $0x18] ss:$0 sm:$0xff] }
 0x3b9   : > { %v2267_v17 = vadd.f32 %v7719_v54, %v1987_v16  ;;  %v2643_v3 = vmul.f32 %v6858_v46, %v1049_v41  ;;  %v2645_v47 = vmul.f32 %v6858_v46, %v997_v37  ;;  %v2269_v25 = vadd.f32 %v2167_v39, %v1989_v9 }
 0x3ba   : > { %v2375_v13 = vadd.f32 %v2327_v63, %v2271_v42  ;;  %v2491_v58 = vrot.slane %v2415_v7, 1  ;;  %v2647_v1 = vmul.f32 %v6858_v46, %v1053_v4  ;;  %v4102_v8 = vpop.eup %4101  ;;  %v2494_v26 = vrot.slane %v2417_v36, 1 }
 0x3bb   : > { %v2371_v35 = vadd.f32 %v2323_v56, %v2267_v17  ;;  %v2763_v18 = vrot.slane %v2643_v3, 2  ;;  %v2766_v60 = vrot.slane %v2645_v47, 2  ;;  %v3052_v57 = vadd.f32 1.0, %v4102_v8  ;;  %v4104_v20 = vpop.eup %4103 }
 0x3bc   : > { %v2373_v16 = vadd.f32 %v2325_v0, %v2269_v25  ;;  %v2770_v54 = vrot.slane %v2647_v1, 2  ;;  %v1122_v22 = vmul.f32 %v7584_v11, %v6410_v23  ;;  %v2495_v41 = vsel %vm1252_vm0, %v2491_v58, %v2494_v26  ;;  %v4106_v9 = vpop.eup %4105  ;;  %v7720_v1 = vld [vmem:[#allocation89_spill] sm:$0xff] }
 0x3bd   : > { %v2587_v37 = vadd.f32 %v2491_v58, %v2371_v35  ;;  %v2591_v39 = vadd.f32 %v2494_v26, %v2375_v13  ;;  %v2767_v42 = vsel %vm1501_vm1, %v2763_v18, %v2766_v60  ;;  %v3054_v4 = vadd.f32 1.0, %v4104_v20  ;;  %v7722_v13 = vld [vmem:[#allocation88_spill] sm:$0xff] }
 0x3be   : > { %v3100_v56 = vmul.f32 %v3052_v57, %v6801_v38  ;;  %v2589_v63 = vadd.f32 %v2495_v41, %v2373_v16  ;;  %v2771_v7 = vsel %vm1501_vm1, %v2766_v60, %v2770_v54  ;;  %v3056_v17 = vadd.f32 1.0, %v4106_v9  ;;  %v7724_v54 = vld [vmem:[#allocation58_spill] sm:$0xff] }
 0x3bf   : > { %v2867_v0 = vadd.f32 %v2763_v18, %v2587_v37  ;;  %v2871_v36 = vadd.f32 %v2771_v7, %v2591_v39  ;;  %v1170_v3 = vadd.f32 %v1122_v22, %v7586_v15  ;;  %v3102_v23 = vmul.f32 %v3054_v4, %v2910_v28  ;;  %v7725_v37 = vld [vmem:[#allocation92_spill] sm:$0xff]  ;;  %v1048_v4 = vld [vmem:[#allocation4 + $0x210] sm:$0xfe] }
 0x3c0   : > { %v3217_v47 = vrot.slane %v3100_v56, 7  ;;  %v2869_v25 = vadd.f32 %v2767_v42, %v2589_v63  ;;  %v7721_v58 = vrot.slane %v7720_v1, 2  ;;  %v7723_v8 = vrot.slane %v7722_v13, 2  ;;  %v7727_v13 = vld [vmem:[#allocation68_spill] sm:$0xff] }
 0x3c1   : > { %v3104_v20 = vmul.f32 %v3056_v17, %v2912_v24  ;;  %v2176_v38 = vrot.slane %v6828_v48, 2  ;;  %v2180_v26 = vrot.slane %v6831_v32, 2  ;;  %v2963_v60 = vmul.f32 0.70710677, %v2867_v0  ;;  %v968_v24 = vld [vmem:[#allocation4 + $0x200] sm:$0x80] }
 0x3c2   : > { %v1569_v35 = vsel %vm1501_vm1, %v7723_v8, %v7721_v58  ;;  %v3218_v57 = vrot.slane %v3102_v23, 7  ;;  %v6877_v18 = vmul.f32 0.5, %v2867_v0  ;;  %v2965_v16 = vmul.f32 0.70710677, %v2869_v25  ;;  %v972_v17 = vld [vmem:[#allocation4 + $0x220] sm:$0x7f] }
 0x3c3   : > { %v2967_v22 = vmul.f32 0.70710677, %v2871_v36  ;;  %v3223_v28 = vrot.slane %v3104_v20, 7  ;;  %4107 = verf.f32 %v2963_v60  ;;  %v1387_v41 = vadd.f32 %v7724_v54, %v1170_v3  ;;  %v996_v0 = vld [vmem:[#allocation4 + $0x220] sm:$0xff]  ;;  %v7726_v23 = vld [vmem:[#allocation59_spill] sm:$0xff] }
 0x3c4   : > { %v1670_v39 = vadd.f32 %v1569_v35, %v7725_v37  ;;  %v3219_v42 = vsel %vm3166_vm2, %v3217_v47, %v3218_v57  ;;  %v6882_v9 = vmul.f32 0.5, %v2871_v36  ;;  %4109 = verf.f32 %v2965_v16  ;;  %v1052_v58 = vld [vmem:[#allocation4 + $0x230] sm:$0x1] }
 0x3c5   : > { %v1724_v56 = vmul.f32 %v5212_v12, %v6664_v30  ;;  %v3224_v63 = vsel %vm3166_vm2, %v3218_v57, %v3223_v28  ;;  %v2917_v7 = vmul.f32 0.5, %v2869_v25  ;;  %4111 = verf.f32 %v2967_v22 }
 0x3c6   : > { %v1668_v3 = vadd.f32 %v7726_v23, %v1387_v41  ;;  %v3289_v1 = vpack.c.bf16 %v3224_v63, %v3219_v42  ;;  %v1770_v36 = vadd.f32 %v6721_v45, %v7727_v13  ;;  %v1774_v47 = vadd.f32 %v6734_v21, %v1670_v39  ;;  %v6924_v42 = vld [vmem:[#allocation4 + $0x210] sm:$0xff] }
 0x3c7   : > { %v1814_v8 = vmul.f32 %v7693_v43, %v6664_v30  ;;  %v6894_v35 = vmul.f32 %v5212_v12, %v968_v24  ;;  %v6897_v25 = vmul.f32 %v7694_v44, %v1048_v4  ;;  %v6900_v60 = vmul.f32 %v7694_v44, %v996_v0 }
 0x3c8   : > { %v1772_v20 = vadd.f32 %v1724_v56, %v1668_v3  ;;  %3503 = vmatmul.mubr.bf16.gmra.mrb[20].mxu1 %v3289_v1  ;;  %v6903_v57 = vmul.f32 %v5212_v12, %v972_v17  ;;  %v6906_v45 = vmul.f32 %v7693_v43, %v996_v0  ;;  %v7728_v16 = vrot.slane %v6730_v2, 1 }
 0x3c9   : > { %v1890_v21 = vrot.slane %v1814_v8, 1  ;;  %v6911_v28 = vmul.f32 %v7694_v44, %v1052_v58  ;;  %v7729_v54 = vrot.slane %v6738_v27, 2  ;;  %v2169_v37 = vsel %vm1501_vm1, %v2164_v59, %v2168_v49 }
 0x3ca   : > { %v1990_v22 = vadd.f32 %v7728_v16, %v1774_v47  ;;  %v7730_v56 = vmov %v7728_v16  ;;  %v2322_v13 = vmul.f32 %v7702_v34, %v968_v24  ;;  %v2324_v6 = vmul.f32 %v7702_v34, %v6924_v42 }
 0x3cb   : > { %v2165_v41 = vsel %vm1501_vm1, %v7729_v54, %v2164_v59  ;;  %v1893_v44 = vsel %vm1252_vm0, %v1890_v21, %v7730_v56  ;;  %v1986_v63 = vadd.f32 %v1890_v21, %v1770_v36  ;;  %v2326_v53 = vmul.f32 %v7702_v34, %v972_v17 }
 0x3cc   : > { %v2270_v3 = vadd.f32 %v2169_v37, %v1990_v22  ;;  %v1988_v1 = vadd.f32 %v1893_v44, %v1772_v20  ;;  %v7731_v59 = vmov %v7729_v54  ;;  %v2414_v2 = vmul.f32 %v7656_v62, %v6924_v42 }
 0x3cd   : > { %v2266_v49 = vadd.f32 %v7731_v59, %v1986_v63  ;;  %v2416_v47 = vmul.f32 %v7656_v62, %v996_v0  ;;  %v2642_v36 = vmul.f32 %v6777_v14, %v1048_v4  ;;  %v4108_v8 = vpop.eup %4107  ;;  %v2644_v24 = vmul.f32 %v6777_v14, %v996_v0 }
 0x3ce   : > { %v2268_v21 = vadd.f32 %v2165_v41, %v1988_v1  ;;  %v2374_v20 = vadd.f32 %v2326_v53, %v2270_v3  ;;  %v2646_v16 = vmul.f32 %v6777_v14, %v1052_v58  ;;  %v4110_v22 = vpop.eup %4109  ;;  %v3059_v54 = vadd.f32 1.0, %v4108_v8 }
 0x3cf   : > { %v2370_v17 = vadd.f32 %v2322_v13, %v2266_v49  ;;  %v2490_v37 = vrot.slane %v2414_v2, 1  ;;  %v2492_v27 = vrot.slane %v2416_v47, 1  ;;  %v4112_v56 = vpop.eup %4111  ;;  %v3061_v44 = vadd.f32 1.0, %v4110_v22 }
 0x3d0   : > { %v2372_v63 = vadd.f32 %v2324_v6, %v2268_v21  ;;  %v2762_v59 = vrot.slane %v2642_v36, 2  ;;  %v2764_v39 = vrot.slane %v2644_v24, 2  ;;  %v3063_v23 = vadd.f32 1.0, %v4112_v56  ;;  %v7732_v21 = vld [vmem:[#allocation54_spill] sm:$0xff]  ;;  %v7734_v24 = vld [vmem:[#allocation63_spill] sm:$0xff]  ;;  %v7736_v56 = vld [vmem:[#allocation64_spill] sm:$0xff] }
 0x3d1   : > { %v3107_v4 = vmul.f32 %v3059_v54, %v6877_v18  ;;  %v2493_v41 = vsel %vm1252_vm0, %v2490_v37, %v2492_v27  ;;  %v2586_v3 = vadd.f32 %v2490_v37, %v2370_v17  ;;  %v3109_v1 = vmul.f32 %v3061_v44, %v2917_v7 }
 0x3d2   : > { %v2588_v0 = vadd.f32 %v2493_v41, %v2372_v63  ;;  %v2590_v53 = vadd.f32 %v2492_v27, %v2374_v20  ;;  %v2765_v58 = vsel %vm1501_vm1, %v2762_v59, %v2764_v39  ;;  %v3111_v13 = vmul.f32 %v3063_v23, %v6882_v9  ;;  %v975_v41 = vld [vmem:[#allocation4 + $0x248] sm:$0x80] }
 0x3d3   : > { %v3230_v49 = vrot.slane %v3107_v4, 7  ;;  %v2768_v2 = vrot.slane %v2646_v16, 2  ;;  %v2866_v47 = vadd.f32 %v2762_v59, %v2586_v3  ;;  %v3231_v8 = vrot.slane %v3109_v1, 7  ;;  %v979_v3 = vld [vmem:[#allocation4 + $0x268] sm:$0x7f] }
 0x3d4   : > { %v2868_v6 = vadd.f32 %v2765_v58, %v2588_v0  ;;  %v1129_v36 = vmul.f32 %v7432_v61, %v6534_v50  ;;  %v7733_v18 = vrot.slane %v7732_v21, 2  ;;  %v7735_v22 = vrot.slane %v7734_v24, 2  ;;  %v999_v1 = vld [vmem:[#allocation4 + $0x268] sm:$0xff]  ;;  %v7737_v0 = vld [vmem:[#allocation91_spill] sm:$0xff] }
 0x3d5   : > { %v3235_v54 = vrot.slane %v3111_v13, 7  ;;  %v2178_v20 = vrot.slane %v6911_v28, 2  ;;  %v2769_v17 = vsel %vm1501_vm1, %v2764_v39, %v2768_v2  ;;  %v2962_v9 = vmul.f32 0.70710677, %v2866_v47  ;;  %v977_v39 = vld [vmem:[#allocation4 + $0x258] sm:$0xff] }
 0x3d6   : > { %v1581_v7 = vsel %vm1501_vm1, %v7735_v22, %v7733_v18  ;;  %v3232_v23 = vsel %vm3166_vm2, %v3230_v49, %v3231_v8  ;;  %v2870_v16 = vadd.f32 %v2769_v17, %v2590_v53  ;;  %v6956_v37 = vmul.f32 0.5, %v2866_v47  ;;  %v7738_v13 = vld [vmem:[#allocation96_spill] sm:$0xff] }
 0x3d7   : > { %v2964_v27 = vmul.f32 0.70710677, %v2868_v6  ;;  %v3236_v61 = vsel %vm3166_vm2, %v3231_v8, %v3235_v54  ;;  %4113 = verf.f32 %v2962_v9  ;;  %v1177_v50 = vadd.f32 %v1129_v36, %v4870_v31  ;;  %v1055_v2 = vld [vmem:[#allocation4 + $0x258] sm:$0xfe] }
 0x3d8   : > { %v1677_v44 = vadd.f32 %v1581_v7, %v7736_v56  ;;  %v3292_v63 = vpack.c.bf16 %v3236_v61, %v3232_v23  ;;  %v2916_v59 = vmul.f32 0.5, %v2868_v6  ;;  %v2966_v4 = vmul.f32 0.70710677, %v2870_v16 }
 0x3d9   : > { %4115 = verf.f32 %v2964_v27  ;;  %v1394_v53 = vadd.f32 %v7737_v0, %v1177_v50  ;;  %v1731_v58 = vmul.f32 %v7558_v10, %v6844_v40  ;;  %v1777_v49 = vadd.f32 %v6807_v19, %v7738_v13  ;;  %v7740_v19 = vld [vmem:[#allocation80_spill] sm:$0xff] }
 0x3da   : > { %v1781_v31 = vadd.f32 %v6810_v33, %v1677_v44  ;;  %3510 = vmatprep.mubr.bf16.mxu1 %v3292_v63  ;;  %4117 = verf.f32 %v2966_v4  ;;  %v1819_v47 = vmul.f32 %v7568_v51, %v6844_v40  ;;  %v7739_v8 = vrot.slane %v6822_v5, 2  ;;  %v1059_v40 = vld [vmem:[#allocation4 + $0x278] sm:$0x1] }
 0x3db   : > { %v2181_v10 = vsel %vm1501_vm1, %v2176_v38, %v2180_v26  ;;  %v1675_v33 = vadd.f32 %v7740_v19, %v1394_v53  ;;  %v7741_v36 = vrot.slane %v6819_v55, 1  ;;  %v2329_v18 = vmul.f32 %v7580_v29, %v975_v41 }
 0x3dc   : > { %v2177_v6 = vsel %vm1501_vm1, %v7739_v8, %v2176_v38  ;;  %v2331_v51 = vmul.f32 %v7580_v29, %v977_v39  ;;  %v1897_v24 = vrot.slane %v1819_v47, 1  ;;  %v2333_v22 = vmul.f32 %v7580_v29, %v979_v3 }
 0x3dd   : > { %v1997_v21 = vadd.f32 %v7741_v36, %v1781_v31  ;;  %v2419_v7 = vmul.f32 %v7583_v52, %v977_v39  ;;  %v2421_v32 = vmul.f32 %v7583_v52, %v999_v1  ;;  %v1779_v48 = vadd.f32 %v1731_v58, %v1675_v33  ;;  %v7744_v31 = vld [vmem:[#allocation67_spill] sm:$0xff] }
 0x3de   : > { %v2649_v38 = vmul.f32 %v6858_v46, %v1055_v2  ;;  %v2651_v26 = vmul.f32 %v6858_v46, %v999_v1  ;;  %v7742_v17 = vmov %v7741_v36  ;;  %v1993_v23 = vadd.f32 %v1897_v24, %v1777_v49  ;;  %v7746_v2 = vld [vmem:[#allocation62_spill] sm:$0xff] }
 0x3df   : > { %v2277_v54 = vadd.f32 %v2181_v10, %v1997_v21  ;;  %v1901_v9 = vsel %vm1252_vm0, %v1897_v24, %v7742_v17  ;;  %v2497_v27 = vrot.slane %v2419_v7, 1  ;;  %v2500_v61 = vrot.slane %v2421_v32, 1  ;;  %v7748_v21 = vld [vmem:[#allocation66_spill] sm:$0xff] }
 0x3e0   : > { %v1995_v50 = vadd.f32 %v1901_v9, %v1779_v48  ;;  %v2653_v29 = vmul.f32 %v6858_v46, %v1059_v40  ;;  %v2773_v44 = vrot.slane %v2649_v38, 2  ;;  %v2918_v63 = vmul.f32 0.5, %v2870_v16  ;;  %v7750_v9 = vld [vmem:[#allocation65_spill] sm:$0xff] }
 0x3e1   : > { %v2381_v56 = vadd.f32 %v2333_v22, %v2277_v54  ;;  %v7743_v52 = vmov %v7739_v8  ;;  %v2776_v41 = vrot.slane %v2651_v26, 2  ;;  %v1128_v39 = vmul.f32 %v7584_v11, %v6664_v30  ;;  %v4114_v3 = vpop.eup %4113  ;;  %v7749_v22 = vld [vmem:[#allocation97_spill] sm:$0xff] }
 0x3e2   : > { %v2273_v4 = vadd.f32 %v7743_v52, %v1993_v23  ;;  %v2275_v55 = vadd.f32 %v2177_v6, %v1995_v50  ;;  %v2501_v1 = vsel %vm1252_vm0, %v2497_v27, %v2500_v61  ;;  %v2780_v53 = vrot.slane %v2653_v29, 2  ;;  %v7751_v29 = vld [vmem:[#allocation74_spill] sm:$0xff]  ;;  %v976_v52 = vld [vmem:[#allocation4 + $0x250] sm:$0xff] }
 0x3e3   : > { %v2597_v0 = vadd.f32 %v2500_v61, %v2381_v56  ;;  %v4116_v58 = vpop.eup %4115  ;;  %v3058_v13 = vadd.f32 1.0, %v4114_v3  ;;  %v1176_v46 = vadd.f32 %v1128_v39, %v7586_v15  ;;  %v7745_v16 = vrot.slane %v7744_v31, 2  ;;  %v974_v56 = vld [vmem:[#allocation4 + $0x240] sm:$0x80]  ;;  %v1054_v3 = vld [vmem:[#allocation4 + $0x250] sm:$0xfe] }
 0x3e4   : > { %v2377_v49 = vadd.f32 %v2329_v18, %v2273_v4  ;;  %v7747_v5 = vrot.slane %v7746_v2, 2  ;;  %v3060_v8 = vadd.f32 1.0, %v4116_v58  ;;  %v2379_v10 = vadd.f32 %v2331_v51, %v2275_v55  ;;  %v4118_v6 = vpop.eup %4117 }
 0x3e5   : > { %v2777_v11 = vsel %vm1501_vm1, %v2773_v44, %v2776_v41  ;;  %v2781_v30 = vsel %vm1501_vm1, %v2776_v41, %v2780_v53  ;;  %v3106_v19 = vmul.f32 %v3058_v13, %v6956_v37  ;;  %v1393_v18 = vadd.f32 %v7748_v21, %v1176_v46 }
 0x3e6   : > { %v1579_v47 = vsel %vm1501_vm1, %v7747_v5, %v7745_v16  ;;  %v2593_v33 = vadd.f32 %v2497_v27, %v2377_v49  ;;  %v2877_v36 = vadd.f32 %v2781_v30, %v2597_v0  ;;  %v3062_v15 = vadd.f32 1.0, %v4118_v6 }
 0x3e7   : > { %v3108_v40 = vmul.f32 %v3060_v8, %v2916_v59  ;;  %v2595_v24 = vadd.f32 %v2501_v1, %v2379_v10  ;;  %v1676_v7 = vadd.f32 %v1579_v47, %v7749_v22  ;;  %v3227_v32 = vrot.slane %v3106_v19, 7 }
 0x3e8   : > { %v2873_v48 = vadd.f32 %v2773_v44, %v2593_v33  ;;  %v2973_v54 = vmul.f32 0.70710677, %v2877_v36  ;;  %v1730_v51 = vmul.f32 %v5212_v12, %v6924_v42  ;;  %v3110_v38 = vmul.f32 %v3062_v15, %v2918_v63  ;;  %v978_v12 = vld [vmem:[#allocation4 + $0x260] sm:$0x7f] }
 0x3e9   : > { %v3228_v26 = vrot.slane %v3108_v40, 7  ;;  %v2875_v17 = vadd.f32 %v2777_v11, %v2595_v24  ;;  %v1674_v37 = vadd.f32 %v7750_v9, %v1393_v18  ;;  %v1898_v23 = vrot.slane %v6906_v45, 1  ;;  %v998_v63 = vld [vmem:[#allocation4 + $0x260] sm:$0xff]  ;;  %v3802_v9 = vpop.f32.mrb[0].mxu1 }
 0x3ea   : > { %v2969_v27 = vmul.f32 0.70710677, %v2873_v48  ;;  %4119 = verf.f32 %v2973_v54  ;;  %v3233_v61 = vrot.slane %v3110_v38, 7  ;;  %v1776_v44 = vadd.f32 %v6894_v35, %v7751_v29 }
 0x3eb   : > { %v3229_v59 = vsel %vm3166_vm2, %v3227_v32, %v3228_v26  ;;  %v2971_v50 = vmul.f32 0.70710677, %v2875_v17  ;;  %v1778_v4 = vadd.f32 %v1730_v51, %v1674_v37  ;;  %v1780_v41 = vadd.f32 %v6903_v57, %v1676_v7 }
 0x3ec   : > { %4121 = verf.f32 %v2969_v27  ;;  %v1818_v45 = vmul.f32 %v7693_v43, %v6924_v42  ;;  %v3234_v39 = vsel %vm3166_vm2, %v3228_v26, %v3233_v61  ;;  %v7752_v55 = vrot.slane %v6900_v60, 2  ;;  %v1058_v42 = vld [vmem:[#allocation4 + $0x270] sm:$0x1]  ;;  %v3803_v61 = vpop.f32.mrb[1].mxu1 }
 0x3ed   : > { %4123 = verf.f32 %v2971_v50  ;;  %v7753_v1 = vrot.slane %v6897_v25, 2  ;;  %v3291_v57 = vpack.c.bf16 %v3234_v39, %v3229_v59  ;;  %v1996_v13 = vadd.f32 %v1898_v23, %v1780_v41  ;;  %v3805_v29 = vpop.f32.mrb[2].mxu1 }
 0x3ee   : > { %v7754_v0 = vmov %v7752_v55  ;;  %v1896_v58 = vrot.slane %v1818_v45, 1  ;;  %v2328_v43 = vmul.f32 %v7702_v34, %v974_v56  ;;  %v2330_v49 = vmul.f32 %v7702_v34, %v976_v52 }
 0x3ef   : > { %v2175_v35 = vsel %vm1501_vm1, %v7753_v1, %v7752_v55  ;;  %v2179_v53 = vsel %vm1501_vm1, %v7754_v0, %v2178_v20  ;;  %v2332_v46 = vmul.f32 %v7702_v34, %v978_v12  ;;  %v2418_v31 = vmul.f32 %v7656_v62, %v976_v52  ;;  %3511 = vmatmul.mubr.bf16.gmra.mrb[24].mxu1 %v3291_v57  ;;  %v3806_v12 = vpop.f32.mrb[3].mxu1 }
 0x3f0   : > { %v2420_v16 = vmul.f32 %v7656_v62, %v998_v63  ;;  %v1899_v28 = vsel %vm1252_vm0, %v1896_v58, %v1898_v23  ;;  %v1992_v60 = vadd.f32 %v1896_v58, %v1776_v44  ;;  %v2276_v2 = vadd.f32 %v2179_v53, %v1996_v13 }
 0x3f1   : > { %v2648_v20 = vmul.f32 %v6777_v14, %v1054_v3  ;;  %v1994_v5 = vadd.f32 %v1899_v28, %v1778_v4  ;;  %v2496_v47 = vrot.slane %v2418_v31, 1  ;;  %v2650_v10 = vmul.f32 %v6777_v14, %v998_v63 }
 0x3f2   : > { %v2498_v8 = vrot.slane %v2420_v16, 1  ;;  %v7755_v11 = vmov %v7753_v1  ;;  %v2380_v34 = vadd.f32 %v2332_v46, %v2276_v2  ;;  %v2652_v6 = vmul.f32 %v6777_v14, %v1058_v42  ;;  %v3808_v58 = vpop.f32.mrb[4].mxu1 }
 0x3f3   : > { %v2272_v30 = vadd.f32 %v7755_v11, %v1992_v60  ;;  %v2772_v19 = vrot.slane %v2648_v20, 2  ;;  %v2925_v62 = vmul.f32 0.5, %v2877_v36  ;;  %v2274_v33 = vadd.f32 %v2175_v35, %v1994_v5 }
 0x3f4   : > { %v2774_v21 = vrot.slane %v2650_v10, 2  ;;  %v4120_v18 = vpop.eup %4119  ;;  %v2499_v40 = vsel %vm1252_vm0, %v2496_v47, %v2498_v8  ;;  %v2596_v24 = vadd.f32 %v2498_v8, %v2380_v34  ;;  %v2778_v22 = vrot.slane %v2652_v6, 2 }
 0x3f5   : > { %v2376_v15 = vadd.f32 %v2328_v43, %v2272_v30  ;;  %v2921_v7 = vmul.f32 0.5, %v2873_v48  ;;  %v3069_v32 = vadd.f32 1.0, %v4120_v18  ;;  %v2378_v54 = vadd.f32 %v2330_v49, %v2274_v33  ;;  %v7047_v48 = vld [vmem:[%s7756_s26] ss:$0 sm:$0xff]  ;;  %v3809_v43 = vpop.f32.mrb[5].mxu1 }
 0x3f6   : > { %v4122_v51 = vpop.eup %4121  ;;  %v2923_v38 = vmul.f32 0.5, %v2875_v17  ;;  %v2775_v26 = vsel %vm1501_vm1, %v2772_v19, %v2774_v21  ;;  %v2779_v14 = vsel %vm1501_vm1, %v2774_v21, %v2778_v22  ;;  %v3804_v17 = vadd.f32 %v3803_v61, %v3802_v9  ;;  %v3811_v49 = vpop.f32.mrb[6].mxu1 }
 0x3f7   : > { %v2592_v25 = vadd.f32 %v2496_v47, %v2376_v15  ;;  %v4124_v36 = vpop.eup %4123  ;;  %v3065_v37 = vadd.f32 1.0, %v4122_v51  ;;  %v3117_v23 = vmul.f32 %v3069_v32, %v2925_v62  ;;  %v2594_v27 = vadd.f32 %v2499_v40, %v2378_v54  ;;  %v3812_v46 = vpop.f32.mrb[7].mxu1 }
 0x3f8   : > { %v2876_v59 = vadd.f32 %v2779_v14, %v2596_v24  ;;  %v3067_v50 = vadd.f32 1.0, %v4124_v36  ;;  %v3465_v55 = vadd.f32 %v3804_v17, %v7047_v48  ;;  %v3807_v35 = vadd.f32 %v3806_v12, %v3805_v29 }
 0x3f9   : > { %v2872_v56 = vadd.f32 %v2772_v19, %v2592_v25  ;;  %v3113_v44 = vmul.f32 %v3065_v37, %v2921_v7  ;;  %v2874_v52 = vadd.f32 %v2775_v26, %v2594_v27  ;;  %v3245_v4 = vrot.slane %v3117_v23, 7 }
 0x3fa   : > { %v3115_v63 = vmul.f32 %v3067_v50, %v2923_v38  ;;  %v2972_v45 = vmul.f32 0.70710677, %v2876_v59  ;;  %3527 = vst [vmem:[%s4826_s25] sm:$0xff] %v3465_v55  ;;  %v3468_v57 = vadd.f32 %v3807_v35, %v7047_v48  ;;  %v3810_v42 = vadd.f32 %v3809_v43, %v3808_v58 }
 0x3fb   : > { %v2968_v41 = vmul.f32 0.70710677, %v2872_v56  ;;  %v3240_v39 = vrot.slane %v3113_v44, 7  ;;  %v2970_v3 = vmul.f32 0.70710677, %v2874_v52  ;;  %v3813_v16 = vadd.f32 %v3812_v46, %v3811_v49 }
 0x3fc   : > { %v3241_v1 = vrot.slane %v3115_v63, 7  ;;  %3528 = vst [vmem:[%s4826_s25 + $0x8] sm:$0xff] %v3468_v57  ;;  %v3473_v31 = vadd.f32 %v3810_v42, %v7047_v48  ;;  %v2920_v60 = vmul.f32 0.5, %v2872_v56  ;;  %v2922_v20 = vmul.f32 0.5, %v2874_v52 }
 0x3fd   : > { %4125 = verf.f32 %v2968_v41  ;;  %v3476_v28 = vadd.f32 %v3813_v16, %v7047_v48  ;;  %v2924_v47 = vmul.f32 0.5, %v2876_v59 }
 0x3fe   : > { %4127 = verf.f32 %v2970_v3  ;;  %v3242_v0 = vsel %vm3166_vm2, %v3240_v39, %v3241_v1  ;;  %v3246_v53 = vsel %vm3166_vm2, %v3241_v1, %v3245_v4  ;;  %3529 = vst [vmem:[%s4826_s25 + $0x10] sm:$0xff] %v3473_v31 }
 0x3ff   : > { %4129 = verf.f32 %v2972_v45  ;;  %v3294_v13 = vpack.c.bf16 %v3246_v53, %v3242_v0  ;;  %3530 = vst [vmem:[%s4826_s25 + $0x18] sm:$0xff] %v3476_v28 }
 0x401   : > { %3518 = vmatprep.mubr.bf16.mxu1 %v3294_v13  ;;  %v3814_v18 = vpop.f32.mrb[8].mxu1 }
 0x402   : > { %v3815_v40 = vpop.f32.mrb[9].mxu1 }
 0x403   : > { %v3816_v22 = vadd.f32 %v3815_v40, %v3814_v18  ;;  %v3817_v7 = vpop.f32.mrb[10].mxu1 }
 0x404   : > { %v3818_v54 = vpop.f32.mrb[11].mxu1 }
 0x405   : > { %v3481_v51 = vadd.f32 %v3816_v22, %v7047_v48  ;;  %v3819_v38 = vadd.f32 %v3818_v54, %v3817_v7 }
 0x407   : > { %v4126_v2 = vpop.eup %4125  ;;  %3531 = vst [vmem:[%s4826_s25 + $0x20] sm:$0xff] %v3481_v51  ;;  %v3484_v25 = vadd.f32 %v3819_v38, %v7047_v48 }
 0x408   : > { %v4128_v5 = vpop.eup %4127  ;;  %v3064_v8 = vadd.f32 1.0, %v4126_v2 }
 0x409   : > { %v4130_v10 = vpop.eup %4129  ;;  %v3066_v11 = vadd.f32 1.0, %v4128_v5  ;;  %3532 = vst [vmem:[%s4826_s25 + $0x28] sm:$0xff] %v3484_v25 }
 0x40a   : > { %v3068_v30 = vadd.f32 1.0, %v4130_v10  ;;  %v3112_v34 = vmul.f32 %v3064_v8, %v2920_v60 }
 0x40b   : > { %v3114_v6 = vmul.f32 %v3066_v11, %v2922_v20 }
 0x40c   : > { %v3116_v19 = vmul.f32 %v3068_v30, %v2924_v47  ;;  %v3237_v62 = vrot.slane %v3112_v34, 7 }
 0x40d   : > { %v3238_v33 = vrot.slane %v3114_v6, 7 }
 0x40e   : > { %v3243_v21 = vrot.slane %v3116_v19, 7 }
 0x40f   : > { %v3239_v15 = vsel %vm3166_vm2, %v3237_v62, %v3238_v33 }
 0x410   : > { %v3244_v24 = vsel %vm3166_vm2, %v3238_v33, %v3243_v21 }
 0x411   : > { %v3293_v32 = vpack.c.bf16 %v3244_v24, %v3239_v15 }
 0x413   : > { %3519 = vmatmul.mubr.bf16.gmra.mrb[28].mxu1 %v3293_v32 }
 0x435   : > { %v3820_v26 = vpop.f32.mrb[12].mxu1 }
 0x436   : > { %v3821_v14 = vpop.f32.mrb[13].mxu1 }
 0x437   : > { %v3822_v9 = vadd.f32 %v3821_v14, %v3820_v26  ;;  %v3823_v36 = vpop.f32.mrb[14].mxu1 }
 0x438   : > { %v3824_v37 = vpop.f32.mrb[15].mxu1 }
 0x439   : > { %v3489_v23 = vadd.f32 %v3822_v9, %v7047_v48  ;;  %v3825_v27 = vadd.f32 %v3824_v37, %v3823_v36 }
 0x43b   : > { %3533 = vst [vmem:[%s4826_s25 + $0x30] sm:$0xff] %v3489_v23  ;;  %v3492_v59 = vadd.f32 %v3825_v27, %v7047_v48 }
 0x43d   : > { %3534 = vst [vmem:[%s4826_s25 + $0x38] sm:$0xff] %v3492_v59 }
 0x468   : > { %v3826_v61 = vpop.f32.mrb[16].mxu1 }
 0x469   : > { %v3827_v50 = vpop.f32.mrb[17].mxu1 }
 0x46a   : > { %v3828_v56 = vadd.f32 %v3827_v50, %v3826_v61  ;;  %v3829_v17 = vpop.f32.mrb[18].mxu1 }
 0x46b   : > { %v3830_v29 = vpop.f32.mrb[19].mxu1 }
 0x46c   : > { %v3497_v44 = vadd.f32 %v3828_v56, %v7047_v48  ;;  %v3831_v52 = vadd.f32 %v3830_v29, %v3829_v17 }
 0x46e   : > { %3535 = vst [vmem:[%s4826_s25 + $0x40] sm:$0xff] %v3497_v44  ;;  %v3500_v12 = vadd.f32 %v3831_v52, %v7047_v48 }
 0x470   : > { %3536 = vst [vmem:[%s4826_s25 + $0x48] sm:$0xff] %v3500_v12 }
 0x49b   : > { %v3832_v63 = vpop.f32.mrb[20].mxu1 }
 0x49c   : > { %v3833_v4 = vpop.f32.mrb[21].mxu1 }
 0x49d   : > { %v3834_v41 = vadd.f32 %v3833_v4, %v3832_v63  ;;  %v3835_v45 = vpop.f32.mrb[22].mxu1 }
 0x49e   : > { %v3836_v39 = vpop.f32.mrb[23].mxu1 }
 0x49f   : > { %v3505_v3 = vadd.f32 %v3834_v41, %v7047_v48  ;;  %v3837_v55 = vadd.f32 %v3836_v39, %v3835_v45 }
 0x4a1   : > { %3537 = vst [vmem:[%s4826_s25 + $0x50] sm:$0xff] %v3505_v3  ;;  %v3508_v1 = vadd.f32 %v3837_v55, %v7047_v48 }
 0x4a3   : > { %3538 = vst [vmem:[%s4826_s25 + $0x58] sm:$0xff] %v3508_v1 }
 0x4c2   : > { %v3838_v35 = vpop.f32.mrb[24].mxu1 }
 0x4c3   : > { %v3839_v0 = vpop.f32.mrb[25].mxu1 }
 0x4c4   : > { %v3840_v53 = vadd.f32 %v3839_v0, %v3838_v35  ;;  %v3841_v57 = vpop.f32.mrb[26].mxu1 }
 0x4c5   : > { %v3842_v58 = vpop.f32.mrb[27].mxu1 }
 0x4c6   : > { %v3513_v13 = vadd.f32 %v3840_v53, %v7047_v48  ;;  %v3843_v43 = vadd.f32 %v3842_v58, %v3841_v57 }
 0x4c8   : > { %3539 = vst [vmem:[%s4826_s25 + $0x60] sm:$0xff] %v3513_v13  ;;  %v3516_v42 = vadd.f32 %v3843_v43, %v7047_v48 }
 0x4ca   : > { %3540 = vst [vmem:[%s4826_s25 + $0x68] sm:$0xff] %v3516_v42 }
 0x4e6   : > { %v3844_v49 = vpop.f32.mrb[28].mxu1 }
 0x4e7   : > { %v3845_v46 = vpop.f32.mrb[29].mxu1 }
 0x4e8   : > { %v3846_v31 = vadd.f32 %v3845_v46, %v3844_v49  ;;  %v3847_v16 = vpop.f32.mrb[30].mxu1 }
 0x4e9   : > { %v3848_v28 = vpop.f32.mrb[31].mxu1 }
 0x4ea   : > { %v3521_v60 = vadd.f32 %v3846_v31, %v7047_v48  ;;  %v3849_v2 = vadd.f32 %v3848_v28, %v3847_v16 }
 0x4ec   : > { %3541 = vst [vmem:[%s4826_s25 + $0x70] sm:$0xff] %v3521_v60  ;;  %v3524_v20 = vadd.f32 %v3849_v2, %v7047_v48 }
 0x4ee   : > { %3542 = vst [vmem:[%s4826_s25 + $0x78] sm:$0xff] %v3524_v20 }
 0x4ef   : > { %4314 = shalt.err (!%p4311_p1)
}
 0x4f0   : > { %s4315_s25 = scalar_lea.hbm %s7092_s27, 2048  ;;  %s4319_s20 = scalar_lea.hbm %s7757_s16, 8192 }
 0x4f1   : > { %p4316_p2 = scmp.ne.s32.totalorder %s7092_s27, %s4315_s25  ;;  %p4320_p0 = scmp.lt.u32.totalorder %s7092_s27, %s7757_s16 }
 0x4f2   : > { %p4321_p4 = scmp.lt.u32.totalorder %s4319_s20, %s4315_s25  ;;  %p4323_p10 = scmp.lt.u32.totalorder %s4315_s25, %s7092_s27 }
 0x4f3   : > { %p4317_p5 = pnand %p4316_p2, %p4634_p8 }
 0x4f4   : > { %p4322_p6 = por %p4321_p4, %p4320_p0 }
 0x4f5   : > { %p4318_p9 = pneg %p4317_p5 }
 0x4f6   : > { %p4324_p11 = por %p4323_p10, %p4322_p6 }
 0x4f8   : > { %p4325_p13 = pnand %p4324_p11, %p4318_p9 }
 0x4fa   : > { %4328 = shalt.err (!%p4325_p13)
}
 0x4fb   : > { %s4428_s15 = smov 128   ;;  %s4429_s17 = smov 8  }
 0x4fc   : > { %3864 = dma.vmem_to_hbm [thread:$0]  (%p4634_p8), %s7085_s19, 2048, %s7092_s27, %s3544_s18, %s4428_s15, %s4428_s15, %s4429_s17  }
 0x4fd PF: > { %s7758_s8 = sld [smem:[#allocation26_spill]]  ;;  %s7759_s30 = sld [smem:[#allocation27_spill]] }
 0x4fe   : > { %p3891_p3 = scmp.ge.s32.totalorder %s4411_s12, 2 }
 0x503   : > { %s3574_s9 = sand.u32 1, %s7758_s8   ;;  %p7760_p7 = scmp.ne.s32.totalorder %s7759_s30, 0 }
 0x504   : > { %s3575_s5 = scalar_lea.sflag [#allocation7], %s3574_s9 }
 0x505   : > { %p3881_p12 = pnand %p3891_p3, %p7760_p7 }
 0x507   : > { %4378 = dma.done.wait (!%p3881_p12), %s3575_s5, 2048  }
 0x508   : > { %4380 = vsyncadd (!%p3881_p12), %s3575_s5, 4294965248  ;;  %s26_s12 = sadd.s32 1, %s4411_s12   ;;  %s7761_s22 = sld [smem:[#allocation28_spill]] }
 0x509   : > { %p23_p1 = scmp.ge.s32.totalorder %s26_s12, 6   ;;  %s7762_s27 = smov %s4387_s28 }
 0x50a   : > { %s7763_s28 = smov %s4391_s29  ;;  %s7764_s29 = smov %s4651_s2 }
 0x50b   : > { %s7765_s30 = smov %s4403_s10  ;;  %s7766_s9 = smov %s4407_s11 }
 0x50c   : > { %s7767_s10 = smov %s7770_s7  ;;  %25 = sbr.rel (!%p23_p1) target bundleno = 17 (0x11), region = 120 }
 0x50e   : > { %s7768_s11 = smov %s7761_s22 }
 0x513   :  { %3580 = vsyncpa [#allocation6], 1 }
 0x514   :  { %3582 = vsyncpa [#allocation6 + $0x1], 1 }
 0x515   :  { %3583 = vsyncpa [#allocation9], 1 }
 0x516   :  { %3584 = vsyncpa [#allocation12], 1 }
 0x517   :  { %3585 = vsyncpa [#allocation7], 1 }
 0x518   :  { %3587 = vsyncpa [#allocation7 + $0x1], 1 }
 0x519   :  { %3588 = vsyncmov [#allocation3] }
 0x51c   :  { %s3589_s14 = vpop.sfrf %3588 }
 0x51d   :  { %p3783_p8 = scmp.ne.s32.totalorder %s3589_s14, 0 }
 0x51f   :  { %3593 = shalt.err (%p3783_p8)  }
 0x520   :  { %3595 = vsyncmov [#allocation3 + $0x1] }
 0x523   :  { %s3596_s2 = vpop.sfrf %3595 }
 0x524   :  { %p3784_p2 = scmp.ne.s32.totalorder %s3596_s2, 0 }
 0x526   :  { %3600 = shalt.err (%p3784_p2)  }

</bundles_post_ra>
